<compile_context>
chip_gen: v7x
topology: tpu7x:2x2x1
jax: 0.10.0
libtpu: 0.0.40
codegen_flags: <defaults>
</compile_context>

<pallas_src>
import functools

import jax
import jax.numpy as jnp
from jax.experimental import pallas as pl
from jax.experimental.pallas import tpu as pltpu


# ----------------------------------------------------------------------------
# Tiled dense: y = x @ W + b (W already transposed to (in, out)), optional ReLU
# ----------------------------------------------------------------------------
def _round_up(x, m):
    return (x + m - 1) // m * m


def _dense_kernel(x_ref, w_ref, b_ref, o_ref, acc_ref, *, relu):
    k = pl.program_id(1)

    @pl.when(k == 0)
    def _():
        acc_ref[...] = jnp.zeros_like(acc_ref)

    # Weight may be bf16 (encoder streaming); accumulate in f32 on the MXU.
    acc_ref[...] += jnp.dot(x_ref[...].astype(w_ref.dtype), w_ref[...],
                            preferred_element_type=jnp.float32)

    @pl.when(k == pl.num_programs(1) - 1)
    def _():
        y = acc_ref[...] + b_ref[...]
        if relu:
            y = jnp.maximum(y, 0.0)
        o_ref[...] = y.astype(o_ref.dtype)


def dense_tiled(x, w_t, b, *, relu, tn_cap=256, tk_cap=8192):
    """x: (M, K) f32, w_t: (K, N) [f32 or bf16], b: (N,) f32 -> (M, N) f32.

    Grid over (N tiles, K tiles); K/N are zero-padded up to the tile size so the
    (8,128) block constraint always holds (zero padding is exact for the matmul).
    """
    m, k = x.shape
    k_w, n = w_t.shape
    assert k == k_w

    tk = min(_round_up(k, 128), tk_cap)
    tn = min(_round_up(n, 128), tn_cap)
    kp = _round_up(k, tk)
    np_ = _round_up(n, tn)

    if kp != k:
        x = jnp.pad(x, ((0, 0), (0, kp - k)))
        w_t = jnp.pad(w_t, ((0, kp - k), (0, 0)))
    if np_ != n:
        w_t = jnp.pad(w_t, ((0, 0), (0, np_ - n)))
        b = jnp.pad(b, (0, np_ - n))
    b2 = b.reshape(1, np_).astype(jnp.float32)

    out = pl.pallas_call(
        functools.partial(_dense_kernel, relu=relu),
        out_shape=jax.ShapeDtypeStruct((m, np_), jnp.float32),
        grid_spec=pltpu.PrefetchScalarGridSpec(
            num_scalar_prefetch=0,
            grid=(np_ // tn, kp // tk),
            in_specs=[
                pl.BlockSpec((m, tk), lambda j, kk: (0, kk)),
                pl.BlockSpec((tk, tn), lambda j, kk: (kk, j)),
                pl.BlockSpec((1, tn), lambda j, kk: (0, j)),
            ],
            out_specs=pl.BlockSpec((m, tn), lambda j, kk: (0, j)),
            scratch_shapes=[pltpu.VMEM((m, tn), jnp.float32)],
        ),
        compiler_params=pltpu.CompilerParams(
            dimension_semantics=("parallel", "arbitrary"),
            vmem_limit_bytes=64 * 1024 * 1024,
        ),
    )(x, w_t, b2)
    if np_ != n:
        out = out[:, :n]
    return out


# ----------------------------------------------------------------------------
# Fused multi-layer LSTM (all layers + time loop in one pallas_call)
# ----------------------------------------------------------------------------
def _fused_lstm_kernel(gx_ref, whh0_ref, wcat_ref, b_ref, out_ref, h_scr, c_scr):
    t = pl.program_id(0)
    num_layers = h_scr.shape[0]
    hdim = h_scr.shape[2]

    @pl.when(t == 0)
    def _():
        h_scr[...] = jnp.zeros_like(h_scr)
        c_scr[...] = jnp.zeros_like(c_scr)

    def lstm_cell(gates, c_prev):
        # PyTorch gate layout [i, f, g, o]; hdim is 128-aligned so slices stay
        # on (8,128) vreg tiles. Gate math kept in f32 (v5e has no bf16 VPU/EUP).
        i_g = jax.nn.sigmoid(gates[:, 0 * hdim:1 * hdim])
        f_g = jax.nn.sigmoid(gates[:, 1 * hdim:2 * hdim])
        g_g = jnp.tanh(gates[:, 2 * hdim:3 * hdim])
        o_g = jax.nn.sigmoid(gates[:, 3 * hdim:4 * hdim])
        c_new = f_g * c_prev + i_g * g_g
        h_new = o_g * jnp.tanh(c_new)
        return h_new, c_new

    # Layer 0: input projection (x_t @ W_ih0^T + b0) was hoisted out of the
    # recurrence; it arrives precomputed in gx_ref. Only the recurrent matmul here.
    gates = gx_ref[0] + jnp.dot(h_scr[0], whh0_ref[...],
                                preferred_element_type=jnp.float32)
    h_below, c_new = lstm_cell(gates, c_scr[0])
    h_scr[0] = h_below
    c_scr[0] = c_new

    # Layers 1..L-1: single (B, 2H) @ (2H, 4H) matmul against the
    # pre-concatenated [W_ih^T ; W_hh^T] weight (halves MXU push/pop per step).
    for l in range(1, num_layers):
        xh = jnp.concatenate([h_below, h_scr[l]], axis=-1)        # (B, 2H)
        gates = jnp.dot(xh, wcat_ref[l - 1],
                        preferred_element_type=jnp.float32) + b_ref[l - 1]
        h_below, c_new = lstm_cell(gates, c_scr[l])
        h_scr[l] = h_below
        c_scr[l] = c_new

    # Output block index is constant across the grid -> single HBM writeback of
    # the final (B, H) at the end of the time loop.
    out_ref[...] = h_below.astype(out_ref.dtype)


def fused_lstm(gx, w_hh0_t, w_cat_t, b_rest):
    """gx: (S, B, 4H) precomputed layer-0 input gates (bias folded in).
    w_hh0_t: (H, 4H); w_cat_t: (L-1, 2H, 4H); b_rest: (L-1, 1, 4H) -> (B, H)."""
    seq, bsz, g4 = gx.shape
    hdim = w_hh0_t.shape[0]
    num_layers = w_cat_t.shape[0] + 1
    return pl.pallas_call(
        _fused_lstm_kernel,
        out_shape=jax.ShapeDtypeStruct((bsz, hdim), jnp.float32),
        grid_spec=pltpu.PrefetchScalarGridSpec(
            num_scalar_prefetch=0,
            grid=(seq,),
            in_specs=[
                pl.BlockSpec((1, bsz, g4), lambda t: (t, 0, 0)),
                pl.BlockSpec((hdim, g4), lambda t: (0, 0)),
                pl.BlockSpec((num_layers - 1, 2 * hdim, g4), lambda t: (0, 0, 0)),
                pl.BlockSpec((num_layers - 1, 1, g4), lambda t: (0, 0, 0)),
            ],
            out_specs=pl.BlockSpec((bsz, hdim), lambda t: (0, 0)),
            scratch_shapes=[
                pltpu.VMEM((num_layers, bsz, hdim), jnp.float32),  # h per layer
                pltpu.VMEM((num_layers, bsz, hdim), jnp.float32),  # c per layer
            ],
        ),
        compiler_params=pltpu.CompilerParams(dimension_semantics=("arbitrary",)),
    )(gx, w_hh0_t, w_cat_t, b_rest)


# ----------------------------------------------------------------------------
# Fused MLP head: 1024 -> 512 -> 256 -> 128 -> 1, ReLU after every layer
# ----------------------------------------------------------------------------
def _mlp_head_kernel(x_ref, *refs):
    *wb_refs, o_ref = refs
    h = x_ref[...]
    for i in range(0, len(wb_refs), 2):
        w_ref, b_ref = wb_refs[i], wb_refs[i + 1]
        h = jnp.maximum(
            jnp.dot(h, w_ref[...], preferred_element_type=jnp.float32) + b_ref[...],
            0.0)
    o_ref[...] = h.astype(o_ref.dtype)


def mlp_head(x, ws, bs):
    """x: (B, H); ws[i]: (din, dout) pre-transposed; bs[i]: (dout,). ~3 MB total
    of weights -> everything resident in VMEM, single kernel launch."""
    n = x.shape[0]
    args = []
    for w, b in zip(ws, bs):
        args += [w, b.reshape(1, -1)]
    return pl.pallas_call(
        _mlp_head_kernel,
        out_shape=jax.ShapeDtypeStruct((n, ws[-1].shape[1]), jnp.float32),
    )(x, *args)


# ----------------------------------------------------------------------------
# Parameter construction (deterministic, pre-transposed layouts)
# ----------------------------------------------------------------------------
def build_params(key, enc_in, rnn_in, hidden_dim, num_layers):
    assert num_layers >= 2
    keys = jax.random.split(key, 64)
    ki = iter(keys)
    p = {}

    # TODO(synk): real encoder is `autoencoder.load_stacked_fc(checkpoint)`;
    # architecture/weights unavailable — deterministic single Linear stand-in
    # with the same (enc_in -> rnn_in) contract. Stored pre-transposed and in
    # bf16: at real sizes (8192x69366) the forward is pure weight streaming.
    p["w_enc_t"] = (jax.random.normal(next(ki), (enc_in, rnn_in), jnp.float32)
                    * 0.02).astype(jnp.bfloat16)
    p["b_enc"] = jnp.zeros((rnn_in,), jnp.float32)

    # LSTM, PyTorch default init uniform(-1/sqrt(H), 1/sqrt(H)); b_ih + b_hh fused.
    kinit = 1.0 / float(jnp.sqrt(jnp.float32(hidden_dim)))

    def u(shape):
        return jax.random.uniform(next(ki), shape, jnp.float32, -kinit, kinit)

    g4 = 4 * hidden_dim
    p["w_ih0_t"] = u((rnn_in, g4))                 # layer-0 input proj (hoisted)
    p["w_hh0_t"] = u((hidden_dim, g4))
    p["b0"] = u((g4,)) + u((g4,))

    wcat, brest = [], []
    for _ in range(1, num_layers):
        w_ih_t = u((hidden_dim, g4))
        w_hh_t = u((hidden_dim, g4))
        wcat.append(jnp.concatenate([w_ih_t, w_hh_t], axis=0))   # (2H, 4H)
        brest.append(u((g4,)) + u((g4,)))
    p["w_cat_t"] = jnp.stack(wcat)                               # (L-1, 2H, 4H)
    p["b_rest"] = jnp.stack(brest)[:, None, :]                   # (L-1, 1, 4H)

    # MLP head: init_weights() -> uniform(-0.1, 0.1) weights, zero biases.
    dims = [(hidden_dim, 1024), (1024, 512), (512, 256), (256, 128), (128, 1)]
    p["head_w"] = [jax.random.uniform(next(ki), (din, dout), jnp.float32, -0.1, 0.1)
                   for (din, dout) in dims]
    p["head_b"] = [jnp.zeros((dout,), jnp.float32) for (_, dout) in dims]
    return p


# ----------------------------------------------------------------------------
# Net.forward
# ----------------------------------------------------------------------------
def net_forward(params, x, batch_size):
    enc_in = params["w_enc_t"].shape[0]
    hidden_dim = params["w_hh0_t"].shape[0]
    g4 = 4 * hidden_dim

    # with torch.no_grad(): x.view(-1, enc_in) -> encoder -> view(B, -1, rnn_in)
    x2 = x.reshape(-1, enc_in)
    enc = dense_tiled(x2, params["w_enc_t"], params["b_enc"], relu=False,
                      tn_cap=256, tk_cap=8192)                  # (B*S, rnn_in)

    # LSTM layer-0 input projection hoisted out of the recurrence: one MXU-sized
    # (B*S, rnn_in) @ (rnn_in, 4H) matmul with the bias folded in.
    gx0 = dense_tiled(enc, params["w_ih0_t"], params["b0"], relu=False,
                      tn_cap=512, tk_cap=2048)                  # (B*S, 4H)

    # ERFH5_RNN time-major layout: only the small (B, S, 4H) projected tensor is
    # permuted (the wide rnn_in-dim encoder output is never transposed).
    gx = jnp.transpose(gx0.reshape(batch_size, -1, g4), (1, 0, 2))  # (S, B, 4H)

    last_h = fused_lstm(gx, params["w_hh0_t"], params["w_cat_t"],
                        params["b_rest"])                        # lstm_out[-1]

    # TODO(synk): Dropout(p=0.2) between head layers treated as inference identity.
    out = mlp_head(last_h, params["head_w"], params["head_b"])   # (B, 1)
    return out


# ----------------------------------------------------------------------------
if __name__ == "__main__":
    batch = 2
    seq = 4
    enc_in = 256      # stand-in for 69366
    rnn_in = 128      # stand-in for 8192 (encoder output / LSTM input_dim)
    hidden_dim = 128  # lane-aligned so gate slices stay on (8,128) tiles
    num_layers = 4

    key = jax.random.PRNGKey(0)
    pkey, xkey = jax.random.split(key)
    params = build_params(pkey, enc_in, rnn_in, hidden_dim, num_layers)
    x = jax.random.normal(xkey, (batch, seq, enc_in), jnp.float32)

    fwd = jax.jit(net_forward, static_argnames=("batch_size",))
    out = fwd(params, x, batch_size=batch)
    out = jax.block_until_ready(out)

    assert out.shape == (batch, 1), out.shape
    assert bool(jnp.all(jnp.isfinite(out)))
    print("KERNEL_OK")
</pallas_src>

<mosaic_0001>
module attributes {stable_mosaic.version = 11 : i64} {
  func.func @_dense_kernel(%arg0: i32, %arg1: i32, %arg2: memref<8x256xf32, #tpu.memory_space<vmem>>, %arg3: memref<256x128xbf16, #tpu.memory_space<vmem>>, %arg4: memref<1x128xf32, #tpu.memory_space<vmem>>, %arg5: memref<8x128xf32, #tpu.memory_space<vmem>>, %arg6: memref<8x128xf32, #tpu.memory_space<vmem>>) attributes {dimension_semantics = [#tpu.dimension_semantics<parallel>, #tpu.dimension_semantics<arbitrary>], iteration_bounds = array<i64: 1, 1>, scalar_prefetch = 0 : i64, scratch_operands = 1 : i64, tpu.core_type = #tpu.core_type<tc>, window_params = [{transform_indices = @transform_0, window_bounds = array<i64: 8, 256>}, {transform_indices = @transform_1, window_bounds = array<i64: 256, 128>}, {transform_indices = @transform_2, window_bounds = array<i64: 1, 128>}, {transform_indices = @transform_3, window_bounds = array<i64: 8, 128>}]} {
    %c0_i32 = arith.constant 0 : i32
    %0 = arith.cmpi eq, %arg1, %c0_i32 : i32
    %1 = arith.extui %0 : i1 to i32
    %c0_i32_0 = arith.constant 0 : i32
    %2 = arith.cmpi ne, %1, %c0_i32_0 : i32
    scf.if %2 {
      %cst_10 = arith.constant 0.000000e+00 : f32
      %13 = vector.broadcast %cst_10 : f32 to vector<8x128xf32>
      %c0_11 = arith.constant 0 : index
      %c0_12 = arith.constant 0 : index
      %14 = vector.load %arg6[%c0_11, %c0_12] : memref<8x128xf32, #tpu.memory_space<vmem>>, vector<8x128xf32>
      tpu.vector_store %arg6[%c0_11, %c0_12], %13 {strides = array<i32>} : memref<8x128xf32, #tpu.memory_space<vmem>>, vector<8x128xf32>,
    } else {
    }
    %c0 = arith.constant 0 : index
    %c0_1 = arith.constant 0 : index
    %3 = vector.load %arg6[%c0, %c0_1] : memref<8x128xf32, #tpu.memory_space<vmem>>, vector<8x128xf32>
    %c0_2 = arith.constant 0 : index
    %c0_3 = arith.constant 0 : index
    %4 = vector.load %arg2[%c0_2, %c0_3] : memref<8x256xf32, #tpu.memory_space<vmem>>, vector<8x256xf32>
    %5 = arith.truncf %4 : vector<8x256xf32> to vector<8x256xbf16>
    %c0_4 = arith.constant 0 : index
    %c0_5 = arith.constant 0 : index
    %6 = vector.load %arg3[%c0_4, %c0_5] : memref<256x128xbf16, #tpu.memory_space<vmem>>, vector<256x128xbf16>
    %cst = arith.constant dense<0.000000e+00> : vector<8x128xf32>
    %7 = tpu.matmul %5, %6, %cst {dimension_numbers = #tpu.dot_dimension_numbers<[1], [0], [0], [1], [0, 0, 1, 1], [], []>} : vector<8x256xbf16>, vector<256x128xbf16>, vector<8x128xf32> -> vector<8x128xf32>
    %8 = arith.addf %3, %7 : vector<8x128xf32>
    %c0_6 = arith.constant 0 : index
    %c0_7 = arith.constant 0 : index
    %9 = vector.load %arg6[%c0_6, %c0_7] : memref<8x128xf32, #tpu.memory_space<vmem>>, vector<8x128xf32>
    tpu.vector_store %arg6[%c0_6, %c0_7], %8 {strides = array<i32>} : memref<8x128xf32, #tpu.memory_space<vmem>>, vector<8x128xf32>,
    %c0_i32_8 = arith.constant 0 : i32
    %10 = arith.cmpi eq, %arg1, %c0_i32_8 : i32
    %11 = arith.extui %10 : i1 to i32
    %c0_i32_9 = arith.constant 0 : i32
    %12 = arith.cmpi ne, %11, %c0_i32_9 : i32
    scf.if %12 {
      %c0_10 = arith.constant 0 : index
      %c0_11 = arith.constant 0 : index
      %13 = vector.load %arg6[%c0_10, %c0_11] : memref<8x128xf32, #tpu.memory_space<vmem>>, vector<8x128xf32>
      %c0_12 = arith.constant 0 : index
      %c0_13 = arith.constant 0 : index
      %14 = vector.load %arg4[%c0_12, %c0_13] : memref<1x128xf32, #tpu.memory_space<vmem>>, vector<1x128xf32>
      %15 = vector.broadcast %14 : vector<1x128xf32> to vector<8x128xf32>
      %16 = arith.addf %13, %15 : vector<8x128xf32>
      %c0_14 = arith.constant 0 : index
      %c0_15 = arith.constant 0 : index
      %17 = vector.load %arg5[%c0_14, %c0_15] : memref<8x128xf32, #tpu.memory_space<vmem>>, vector<8x128xf32>
      tpu.vector_store %arg5[%c0_14, %c0_15], %16 {strides = array<i32>} : memref<8x128xf32, #tpu.memory_space<vmem>>, vector<8x128xf32>,
    } else {
    }
    return
  }
  func.func @transform_0(%arg0: i32, %arg1: i32) -> (i32, i32) {
    %c0_i32 = arith.constant 0 : i32
    %c0_i32_0 = arith.constant 0 : i32
    return %c0_i32, %arg1 : i32, i32
  }
  func.func @transform_1(%arg0: i32, %arg1: i32) -> (i32, i32) {
    %c0_i32 = arith.constant 0 : i32
    return %arg1, %arg0 : i32, i32
  }
  func.func @transform_2(%arg0: i32, %arg1: i32) -> (i32, i32) {
    %c0_i32 = arith.constant 0 : i32
    %c0_i32_0 = arith.constant 0 : i32
    return %c0_i32, %arg0 : i32, i32
  }
  func.func @transform_3(%arg0: i32, %arg1: i32) -> (i32, i32) {
    %c0_i32 = arith.constant 0 : i32
    %c0_i32_0 = arith.constant 0 : i32
    return %c0_i32, %arg0 : i32, i32
  }
}

module attributes {stable_mosaic.version = 11 : i64} {
  func.func @_dense_kernel(%arg0: i32, %arg1: i32, %arg2: memref<8x128xf32, #tpu.memory_space<vmem>>, %arg3: memref<128x512xf32, #tpu.memory_space<vmem>>, %arg4: memref<1x512xf32, #tpu.memory_space<vmem>>, %arg5: memref<8x512xf32, #tpu.memory_space<vmem>>, %arg6: memref<8x512xf32, #tpu.memory_space<vmem>>) attributes {dimension_semantics = [#tpu.dimension_semantics<parallel>, #tpu.dimension_semantics<arbitrary>], iteration_bounds = array<i64: 1, 1>, scalar_prefetch = 0 : i64, scratch_operands = 1 : i64, tpu.core_type = #tpu.core_type<tc>, window_params = [{transform_indices = @transform_0, window_bounds = array<i64: 8, 128>}, {transform_indices = @transform_1, window_bounds = array<i64: 128, 512>}, {transform_indices = @transform_2, window_bounds = array<i64: 1, 512>}, {transform_indices = @transform_3, window_bounds = array<i64: 8, 512>}]} {
    %c0_i32 = arith.constant 0 : i32
    %0 = arith.cmpi eq, %arg1, %c0_i32 : i32
    %1 = arith.extui %0 : i1 to i32
    %c0_i32_0 = arith.constant 0 : i32
    %2 = arith.cmpi ne, %1, %c0_i32_0 : i32
    scf.if %2 {
      %cst_10 = arith.constant 0.000000e+00 : f32
      %12 = vector.broadcast %cst_10 : f32 to vector<8x512xf32>
      %c0_11 = arith.constant 0 : index
      %c0_12 = arith.constant 0 : index
      %13 = vector.load %arg6[%c0_11, %c0_12] : memref<8x512xf32, #tpu.memory_space<vmem>>, vector<8x512xf32>
      tpu.vector_store %arg6[%c0_11, %c0_12], %12 {strides = array<i32>} : memref<8x512xf32, #tpu.memory_space<vmem>>, vector<8x512xf32>,
    } else {
    }
    %c0 = arith.constant 0 : index
    %c0_1 = arith.constant 0 : index
    %3 = vector.load %arg6[%c0, %c0_1] : memref<8x512xf32, #tpu.memory_space<vmem>>, vector<8x512xf32>
    %c0_2 = arith.constant 0 : index
    %c0_3 = arith.constant 0 : index
    %4 = vector.load %arg2[%c0_2, %c0_3] : memref<8x128xf32, #tpu.memory_space<vmem>>, vector<8x128xf32>
    %c0_4 = arith.constant 0 : index
    %c0_5 = arith.constant 0 : index
    %5 = vector.load %arg3[%c0_4, %c0_5] : memref<128x512xf32, #tpu.memory_space<vmem>>, vector<128x512xf32>
    %cst = arith.constant dense<0.000000e+00> : vector<8x512xf32>
    %6 = tpu.matmul %4, %5, %cst {dimension_numbers = #tpu.dot_dimension_numbers<[1], [0], [0], [1], [0, 0, 1, 1], [], []>} : vector<8x128xf32>, vector<128x512xf32>, vector<8x512xf32> -> vector<8x512xf32>
    %7 = arith.addf %3, %6 : vector<8x512xf32>
    %c0_6 = arith.constant 0 : index
    %c0_7 = arith.constant 0 : index
    %8 = vector.load %arg6[%c0_6, %c0_7] : memref<8x512xf32, #tpu.memory_space<vmem>>, vector<8x512xf32>
    tpu.vector_store %arg6[%c0_6, %c0_7], %7 {strides = array<i32>} : memref<8x512xf32, #tpu.memory_space<vmem>>, vector<8x512xf32>,
    %c0_i32_8 = arith.constant 0 : i32
    %9 = arith.cmpi eq, %arg1, %c0_i32_8 : i32
    %10 = arith.extui %9 : i1 to i32
    %c0_i32_9 = arith.constant 0 : i32
    %11 = arith.cmpi ne, %10, %c0_i32_9 : i32
    scf.if %11 {
      %c0_10 = arith.constant 0 : index
      %c0_11 = arith.constant 0 : index
      %12 = vector.load %arg6[%c0_10, %c0_11] : memref<8x512xf32, #tpu.memory_space<vmem>>, vector<8x512xf32>
      %c0_12 = arith.constant 0 : index
      %c0_13 = arith.constant 0 : index
      %13 = vector.load %arg4[%c0_12, %c0_13] : memref<1x512xf32, #tpu.memory_space<vmem>>, vector<1x512xf32>
      %14 = vector.broadcast %13 : vector<1x512xf32> to vector<8x512xf32>
      %15 = arith.addf %12, %14 : vector<8x512xf32>
      %c0_14 = arith.constant 0 : index
      %c0_15 = arith.constant 0 : index
      %16 = vector.load %arg5[%c0_14, %c0_15] : memref<8x512xf32, #tpu.memory_space<vmem>>, vector<8x512xf32>
      tpu.vector_store %arg5[%c0_14, %c0_15], %15 {strides = array<i32>} : memref<8x512xf32, #tpu.memory_space<vmem>>, vector<8x512xf32>,
    } else {
    }
    return
  }
  func.func @transform_0(%arg0: i32, %arg1: i32) -> (i32, i32) {
    %c0_i32 = arith.constant 0 : i32
    %c0_i32_0 = arith.constant 0 : i32
    return %c0_i32, %arg1 : i32, i32
  }
  func.func @transform_1(%arg0: i32, %arg1: i32) -> (i32, i32) {
    %c0_i32 = arith.constant 0 : i32
    return %arg1, %arg0 : i32, i32
  }
  func.func @transform_2(%arg0: i32, %arg1: i32) -> (i32, i32) {
    %c0_i32 = arith.constant 0 : i32
    %c0_i32_0 = arith.constant 0 : i32
    return %c0_i32, %arg0 : i32, i32
  }
  func.func @transform_3(%arg0: i32, %arg1: i32) -> (i32, i32) {
    %c0_i32 = arith.constant 0 : i32
    %c0_i32_0 = arith.constant 0 : i32
    return %c0_i32, %arg0 : i32, i32
  }
}

module attributes {stable_mosaic.version = 11 : i64} {
  func.func @_fused_lstm_kernel(%arg0: i32, %arg1: memref<1x2x512xf32, #tpu.memory_space<vmem>>, %arg2: memref<128x512xf32, #tpu.memory_space<vmem>>, %arg3: memref<3x256x512xf32, #tpu.memory_space<vmem>>, %arg4: memref<3x1x512xf32, #tpu.memory_space<vmem>>, %arg5: memref<2x128xf32, #tpu.memory_space<vmem>>, %arg6: memref<4x2x128xf32, #tpu.memory_space<vmem>>, %arg7: memref<4x2x128xf32, #tpu.memory_space<vmem>>) attributes {dimension_semantics = [#tpu.dimension_semantics<arbitrary>], iteration_bounds = array<i64: 4>, scalar_prefetch = 0 : i64, scratch_operands = 2 : i64, tpu.core_type = #tpu.core_type<tc>, window_params = [{transform_indices = @transform_0, window_bounds = array<i64: 1, 2, 512>}, {pipeline_mode = #tpu.pipeline_mode<synchronous>, transform_indices = @transform_1, window_bounds = array<i64: 128, 512>}, {pipeline_mode = #tpu.pipeline_mode<synchronous>, transform_indices = @transform_2, window_bounds = array<i64: 3, 256, 512>}, {pipeline_mode = #tpu.pipeline_mode<synchronous>, transform_indices = @transform_3, window_bounds = array<i64: 3, 1, 512>}, {pipeline_mode = #tpu.pipeline_mode<synchronous>, transform_indices = @transform_4, window_bounds = array<i64: 2, 128>}]} {
    %c0_i32 = arith.constant 0 : i32
    %0 = arith.cmpi eq, %arg0, %c0_i32 : i32
    %1 = arith.extui %0 : i1 to i32
    %c0_i32_0 = arith.constant 0 : i32
    %2 = arith.cmpi ne, %1, %c0_i32_0 : i32
    scf.if %2 {
      %cst_85 = arith.constant 0.000000e+00 : f32
      %173 = vector.broadcast %cst_85 : f32 to vector<4x2x128xf32>
      %c0_86 = arith.constant 0 : index
      %c0_87 = arith.constant 0 : index
      %c0_88 = arith.constant 0 : index
      %174 = vector.load %arg6[%c0_86, %c0_87, %c0_88] : memref<4x2x128xf32, #tpu.memory_space<vmem>>, vector<4x2x128xf32>
      tpu.vector_store %arg6[%c0_86, %c0_87, %c0_88], %173 {strides = array<i32>} : memref<4x2x128xf32, #tpu.memory_space<vmem>>, vector<4x2x128xf32>,
      %cst_89 = arith.constant 0.000000e+00 : f32
      %175 = vector.broadcast %cst_89 : f32 to vector<4x2x128xf32>
      %c0_90 = arith.constant 0 : index
      %c0_91 = arith.constant 0 : index
      %c0_92 = arith.constant 0 : index
      %176 = vector.load %arg7[%c0_90, %c0_91, %c0_92] : memref<4x2x128xf32, #tpu.memory_space<vmem>>, vector<4x2x128xf32>
      tpu.vector_store %arg7[%c0_90, %c0_91, %c0_92], %175 {strides = array<i32>} : memref<4x2x128xf32, #tpu.memory_space<vmem>>, vector<4x2x128xf32>,
    } else {
    }
    %c0 = arith.constant 0 : index
    %c0_1 = arith.constant 0 : index
    %c0_2 = arith.constant 0 : index
    %3 = vector.load %arg1[%c0, %c0_1, %c0_2] : memref<1x2x512xf32, #tpu.memory_space<vmem>>, vector<1x2x512xf32>
    %4 = vector.shape_cast %3 : vector<1x2x512xf32> to vector<2x512xf32>
    %c0_3 = arith.constant 0 : index
    %c0_4 = arith.constant 0 : index
    %c0_5 = arith.constant 0 : index
    %5 = vector.load %arg6[%c0_3, %c0_4, %c0_5] : memref<4x2x128xf32, #tpu.memory_space<vmem>>, vector<1x2x128xf32>
    %6 = vector.shape_cast %5 : vector<1x2x128xf32> to vector<2x128xf32>
    %c0_6 = arith.constant 0 : index
    %c0_7 = arith.constant 0 : index
    %7 = vector.load %arg2[%c0_6, %c0_7] : memref<128x512xf32, #tpu.memory_space<vmem>>, vector<128x512xf32>
    %cst = arith.constant dense<0.000000e+00> : vector<2x512xf32>
    %8 = tpu.matmul %6, %7, %cst {dimension_numbers = #tpu.dot_dimension_numbers<[1], [0], [0], [1], [0, 0, 1, 1], [], []>} : vector<2x128xf32>, vector<128x512xf32>, vector<2x512xf32> -> vector<2x512xf32>
    %9 = arith.addf %4, %8 : vector<2x512xf32>
    %c0_8 = arith.constant 0 : index
    %c0_9 = arith.constant 0 : index
    %c0_10 = arith.constant 0 : index
    %10 = vector.load %arg7[%c0_8, %c0_9, %c0_10] : memref<4x2x128xf32, #tpu.memory_space<vmem>>, vector<1x2x128xf32>
    %11 = vector.shape_cast %10 : vector<1x2x128xf32> to vector<2x128xf32>
    %12 = vector.extract_strided_slice %9 {offsets = [0, 0], sizes = [2, 128], strides = [1, 1]} : vector<2x512xf32> to vector<2x128xf32>
    %13 = arith.negf %12 : vector<2x128xf32>
    %14 = math.exp %13 : vector<2x128xf32>
    %cst_11 = arith.constant 1.000000e+00 : f32
    %15 = vector.broadcast %cst_11 : f32 to vector<2x128xf32>
    %16 = arith.addf %15, %14 : vector<2x128xf32>
    %17 = arith.divf %15, %16 : vector<2x128xf32>
    %18 = vector.extract_strided_slice %9 {offsets = [0, 128], sizes = [2, 128], strides = [1, 1]} : vector<2x512xf32> to vector<2x128xf32>
    %19 = arith.negf %18 : vector<2x128xf32>
    %20 = math.exp %19 : vector<2x128xf32>
    %cst_12 = arith.constant 1.000000e+00 : f32
    %21 = vector.broadcast %cst_12 : f32 to vector<2x128xf32>
    %22 = arith.addf %21, %20 : vector<2x128xf32>
    %23 = arith.divf %21, %22 : vector<2x128xf32>
    %24 = vector.extract_strided_slice %9 {offsets = [0, 256], sizes = [2, 128], strides = [1, 1]} : vector<2x512xf32> to vector<2x128xf32>
    %25 = math.tanh %24 : vector<2x128xf32>
    %26 = vector.extract_strided_slice %9 {offsets = [0, 384], sizes = [2, 128], strides = [1, 1]} : vector<2x512xf32> to vector<2x128xf32>
    %27 = arith.negf %26 : vector<2x128xf32>
    %28 = math.exp %27 : vector<2x128xf32>
    %cst_13 = arith.constant 1.000000e+00 : f32
    %29 = vector.broadcast %cst_13 : f32 to vector<2x128xf32>
    %30 = arith.addf %29, %28 : vector<2x128xf32>
    %31 = arith.divf %29, %30 : vector<2x128xf32>
    %32 = arith.mulf %23, %11 : vector<2x128xf32>
    %33 = arith.mulf %17, %25 : vector<2x128xf32>
    %34 = arith.addf %32, %33 : vector<2x128xf32>
    %35 = math.tanh %34 : vector<2x128xf32>
    %36 = arith.mulf %31, %35 : vector<2x128xf32>
    %c0_14 = arith.constant 0 : index
    %c0_15 = arith.constant 0 : index
    %c0_16 = arith.constant 0 : index
    %37 = vector.load %arg6[%c0_14, %c0_15, %c0_16] : memref<4x2x128xf32, #tpu.memory_space<vmem>>, vector<1x2x128xf32>
    %38 = vector.shape_cast %37 : vector<1x2x128xf32> to vector<2x128xf32>
    %39 = vector.shape_cast %36 : vector<2x128xf32> to vector<1x2x128xf32>
    tpu.vector_store %arg6[%c0_14, %c0_15, %c0_16], %39 {strides = array<i32>} : memref<4x2x128xf32, #tpu.memory_space<vmem>>, vector<1x2x128xf32>,
    %c0_17 = arith.constant 0 : index
    %c0_18 = arith.constant 0 : index
    %c0_19 = arith.constant 0 : index
    %40 = vector.load %arg7[%c0_17, %c0_18, %c0_19] : memref<4x2x128xf32, #tpu.memory_space<vmem>>, vector<1x2x128xf32>
    %41 = vector.shape_cast %40 : vector<1x2x128xf32> to vector<2x128xf32>
    %42 = vector.shape_cast %34 : vector<2x128xf32> to vector<1x2x128xf32>
    tpu.vector_store %arg7[%c0_17, %c0_18, %c0_19], %42 {strides = array<i32>} : memref<4x2x128xf32, #tpu.memory_space<vmem>>, vector<1x2x128xf32>,
    %c1 = arith.constant 1 : index
    %c0_20 = arith.constant 0 : index
    %c0_21 = arith.constant 0 : index
    %43 = vector.load %arg6[%c1, %c0_20, %c0_21] : memref<4x2x128xf32, #tpu.memory_space<vmem>>, vector<1x2x128xf32>
    %44 = vector.shape_cast %43 : vector<1x2x128xf32> to vector<2x128xf32>
    %45 = tpu.concatenate %36, %44 in 1 : vector<2x128xf32>, vector<2x128xf32> -> vector<2x256xf32>
    %c0_22 = arith.constant 0 : index
    %c0_23 = arith.constant 0 : index
    %c0_24 = arith.constant 0 : index
    %46 = vector.load %arg3[%c0_22, %c0_23, %c0_24] : memref<3x256x512xf32, #tpu.memory_space<vmem>>, vector<1x256x512xf32>
    %47 = vector.shape_cast %46 : vector<1x256x512xf32> to vector<256x512xf32>
    %cst_25 = arith.constant dense<0.000000e+00> : vector<2x512xf32>
    %48 = tpu.matmul %45, %47, %cst_25 {dimension_numbers = #tpu.dot_dimension_numbers<[1], [0], [0], [1], [0, 0, 1, 1], [], []>} : vector<2x256xf32>, vector<256x512xf32>, vector<2x512xf32> -> vector<2x512xf32>
    %c0_26 = arith.constant 0 : index
    %c0_27 = arith.constant 0 : index
    %c0_28 = arith.constant 0 : index
    %49 = vector.load %arg4[%c0_26, %c0_27, %c0_28] : memref<3x1x512xf32, #tpu.memory_space<vmem>>, vector<1x1x512xf32>
    %50 = vector.shape_cast %49 : vector<1x1x512xf32> to vector<1x512xf32>
    %51 = vector.broadcast %50 : vector<1x512xf32> to vector<2x512xf32>
    %52 = arith.addf %48, %51 : vector<2x512xf32>
    %c1_29 = arith.constant 1 : index
    %c0_30 = arith.constant 0 : index
    %c0_31 = arith.constant 0 : index
    %53 = vector.load %arg7[%c1_29, %c0_30, %c0_31] : memref<4x2x128xf32, #tpu.memory_space<vmem>>, vector<1x2x128xf32>
    %54 = vector.shape_cast %53 : vector<1x2x128xf32> to vector<2x128xf32>
    %55 = vector.extract_strided_slice %52 {offsets = [0, 0], sizes = [2, 128], strides = [1, 1]} : vector<2x512xf32> to vector<2x128xf32>
    %56 = arith.negf %55 : vector<2x128xf32>
    %57 = math.exp %56 : vector<2x128xf32>
    %cst_32 = arith.constant 1.000000e+00 : f32
    %58 = vector.broadcast %cst_32 : f32 to vector<2x128xf32>
    %59 = arith.addf %58, %57 : vector<2x128xf32>
    %60 = arith.divf %58, %59 : vector<2x128xf32>
    %61 = vector.extract_strided_slice %52 {offsets = [0, 128], sizes = [2, 128], strides = [1, 1]} : vector<2x512xf32> to vector<2x128xf32>
    %62 = arith.negf %61 : vector<2x128xf32>
    %63 = math.exp %62 : vector<2x128xf32>
    %cst_33 = arith.constant 1.000000e+00 : f32
    %64 = vector.broadcast %cst_33 : f32 to vector<2x128xf32>
    %65 = arith.addf %64, %63 : vector<2x128xf32>
    %66 = arith.divf %64, %65 : vector<2x128xf32>
    %67 = vector.extract_strided_slice %52 {offsets = [0, 256], sizes = [2, 128], strides = [1, 1]} : vector<2x512xf32> to vector<2x128xf32>
    %68 = math.tanh %67 : vector<2x128xf32>
    %69 = vector.extract_strided_slice %52 {offsets = [0, 384], sizes = [2, 128], strides = [1, 1]} : vector<2x512xf32> to vector<2x128xf32>
    %70 = arith.negf %69 : vector<2x128xf32>
    %71 = math.exp %70 : vector<2x128xf32>
    %cst_34 = arith.constant 1.000000e+00 : f32
    %72 = vector.broadcast %cst_34 : f32 to vector<2x128xf32>
    %73 = arith.addf %72, %71 : vector<2x128xf32>
    %74 = arith.divf %72, %73 : vector<2x128xf32>
    %75 = arith.mulf %66, %54 : vector<2x128xf32>
    %76 = arith.mulf %60, %68 : vector<2x128xf32>
    %77 = arith.addf %75, %76 : vector<2x128xf32>
    %78 = math.tanh %77 : vector<2x128xf32>
    %79 = arith.mulf %74, %78 : vector<2x128xf32>
    %c1_35 = arith.constant 1 : index
    %c0_36 = arith.constant 0 : index
    %c0_37 = arith.constant 0 : index
    %80 = vector.load %arg6[%c1_35, %c0_36, %c0_37] : memref<4x2x128xf32, #tpu.memory_space<vmem>>, vector<1x2x128xf32>
    %81 = vector.shape_cast %80 : vector<1x2x128xf32> to vector<2x128xf32>
    %82 = vector.shape_cast %79 : vector<2x128xf32> to vector<1x2x128xf32>
    tpu.vector_store %arg6[%c1_35, %c0_36, %c0_37], %82 {strides = array<i32>} : memref<4x2x128xf32, #tpu.memory_space<vmem>>, vector<1x2x128xf32>,
    %c1_38 = arith.constant 1 : index
    %c0_39 = arith.constant 0 : index
    %c0_40 = arith.constant 0 : index
    %83 = vector.load %arg7[%c1_38, %c0_39, %c0_40] : memref<4x2x128xf32, #tpu.memory_space<vmem>>, vector<1x2x128xf32>
    %84 = vector.shape_cast %83 : vector<1x2x128xf32> to vector<2x128xf32>
    %85 = vector.shape_cast %77 : vector<2x128xf32> to vector<1x2x128xf32>
    tpu.vector_store %arg7[%c1_38, %c0_39, %c0_40], %85 {strides = array<i32>} : memref<4x2x128xf32, #tpu.memory_space<vmem>>, vector<1x2x128xf32>,
    %c2 = arith.constant 2 : index
    %c0_41 = arith.constant 0 : index
    %c0_42 = arith.constant 0 : index
    %86 = vector.load %arg6[%c2, %c0_41, %c0_42] : memref<4x2x128xf32, #tpu.memory_space<vmem>>, vector<1x2x128xf32>
    %87 = vector.shape_cast %86 : vector<1x2x128xf32> to vector<2x128xf32>
    %88 = tpu.concatenate %79, %87 in 1 : vector<2x128xf32>, vector<2x128xf32> -> vector<2x256xf32>
    %c1_43 = arith.constant 1 : index
    %c0_44 = arith.constant 0 : index
    %c0_45 = arith.constant 0 : index
    %89 = vector.load %arg3[%c1_43, %c0_44, %c0_45] : memref<3x256x512xf32, #tpu.memory_space<vmem>>, vector<1x256x512xf32>
    %90 = vector.shape_cast %89 : vector<1x256x512xf32> to vector<256x512xf32>
    %cst_46 = arith.constant dense<0.000000e+00> : vector<2x512xf32>
    %91 = tpu.matmul %88, %90, %cst_46 {dimension_numbers = #tpu.dot_dimension_numbers<[1], [0], [0], [1], [0, 0, 1, 1], [], []>} : vector<2x256xf32>, vector<256x512xf32>, vector<2x512xf32> -> vector<2x512xf32>
    %c1_47 = arith.constant 1 : index
    %c0_48 = arith.constant 0 : index
    %c0_49 = arith.constant 0 : index
    %92 = vector.load %arg4[%c1_47, %c0_48, %c0_49] : memref<3x1x512xf32, #tpu.memory_space<vmem>>, vector<1x1x512xf32>
    %93 = vector.shape_cast %92 : vector<1x1x512xf32> to vector<1x512xf32>
    %94 = vector.broadcast %93 : vector<1x512xf32> to vector<2x512xf32>
    %95 = arith.addf %91, %94 : vector<2x512xf32>
    %c2_50 = arith.constant 2 : index
    %c0_51 = arith.constant 0 : index
    %c0_52 = arith.constant 0 : index
    %96 = vector.load %arg7[%c2_50, %c0_51, %c0_52] : memref<4x2x128xf32, #tpu.memory_space<vmem>>, vector<1x2x128xf32>
    %97 = vector.shape_cast %96 : vector<1x2x128xf32> to vector<2x128xf32>
    %98 = vector.extract_strided_slice %95 {offsets = [0, 0], sizes = [2, 128], strides = [1, 1]} : vector<2x512xf32> to vector<2x128xf32>
    %99 = arith.negf %98 : vector<2x128xf32>
    %100 = math.exp %99 : vector<2x128xf32>
    %cst_53 = arith.constant 1.000000e+00 : f32
    %101 = vector.broadcast %cst_53 : f32 to vector<2x128xf32>
    %102 = arith.addf %101, %100 : vector<2x128xf32>
    %103 = arith.divf %101, %102 : vector<2x128xf32>
    %104 = vector.extract_strided_slice %95 {offsets = [0, 128], sizes = [2, 128], strides = [1, 1]} : vector<2x512xf32> to vector<2x128xf32>
    %105 = arith.negf %104 : vector<2x128xf32>
    %106 = math.exp %105 : vector<2x128xf32>
    %cst_54 = arith.constant 1.000000e+00 : f32
    %107 = vector.broadcast %cst_54 : f32 to vector<2x128xf32>
    %108 = arith.addf %107, %106 : vector<2x128xf32>
    %109 = arith.divf %107, %108 : vector<2x128xf32>
    %110 = vector.extract_strided_slice %95 {offsets = [0, 256], sizes = [2, 128], strides = [1, 1]} : vector<2x512xf32> to vector<2x128xf32>
    %111 = math.tanh %110 : vector<2x128xf32>
    %112 = vector.extract_strided_slice %95 {offsets = [0, 384], sizes = [2, 128], strides = [1, 1]} : vector<2x512xf32> to vector<2x128xf32>
    %113 = arith.negf %112 : vector<2x128xf32>
    %114 = math.exp %113 : vector<2x128xf32>
    %cst_55 = arith.constant 1.000000e+00 : f32
    %115 = vector.broadcast %cst_55 : f32 to vector<2x128xf32>
    %116 = arith.addf %115, %114 : vector<2x128xf32>
    %117 = arith.divf %115, %116 : vector<2x128xf32>
    %118 = arith.mulf %109, %97 : vector<2x128xf32>
    %119 = arith.mulf %103, %111 : vector<2x128xf32>
    %120 = arith.addf %118, %119 : vector<2x128xf32>
    %121 = math.tanh %120 : vector<2x128xf32>
    %122 = arith.mulf %117, %121 : vector<2x128xf32>
    %c2_56 = arith.constant 2 : index
    %c0_57 = arith.constant 0 : index
    %c0_58 = arith.constant 0 : index
    %123 = vector.load %arg6[%c2_56, %c0_57, %c0_58] : memref<4x2x128xf32, #tpu.memory_space<vmem>>, vector<1x2x128xf32>
    %124 = vector.shape_cast %123 : vector<1x2x128xf32> to vector<2x128xf32>
    %125 = vector.shape_cast %122 : vector<2x128xf32> to vector<1x2x128xf32>
    tpu.vector_store %arg6[%c2_56, %c0_57, %c0_58], %125 {strides = array<i32>} : memref<4x2x128xf32, #tpu.memory_space<vmem>>, vector<1x2x128xf32>,
    %c2_59 = arith.constant 2 : index
    %c0_60 = arith.constant 0 : index
    %c0_61 = arith.constant 0 : index
    %126 = vector.load %arg7[%c2_59, %c0_60, %c0_61] : memref<4x2x128xf32, #tpu.memory_space<vmem>>, vector<1x2x128xf32>
    %127 = vector.shape_cast %126 : vector<1x2x128xf32> to vector<2x128xf32>
    %128 = vector.shape_cast %120 : vector<2x128xf32> to vector<1x2x128xf32>
    tpu.vector_store %arg7[%c2_59, %c0_60, %c0_61], %128 {strides = array<i32>} : memref<4x2x128xf32, #tpu.memory_space<vmem>>, vector<1x2x128xf32>,
    %c3 = arith.constant 3 : index
    %c0_62 = arith.constant 0 : index
    %c0_63 = arith.constant 0 : index
    %129 = vector.load %arg6[%c3, %c0_62, %c0_63] : memref<4x2x128xf32, #tpu.memory_space<vmem>>, vector<1x2x128xf32>
    %130 = vector.shape_cast %129 : vector<1x2x128xf32> to vector<2x128xf32>
    %131 = tpu.concatenate %122, %130 in 1 : vector<2x128xf32>, vector<2x128xf32> -> vector<2x256xf32>
    %c2_64 = arith.constant 2 : index
    %c0_65 = arith.constant 0 : index
    %c0_66 = arith.constant 0 : index
    %132 = vector.load %arg3[%c2_64, %c0_65, %c0_66] : memref<3x256x512xf32, #tpu.memory_space<vmem>>, vector<1x256x512xf32>
    %133 = vector.shape_cast %132 : vector<1x256x512xf32> to vector<256x512xf32>
    %cst_67 = arith.constant dense<0.000000e+00> : vector<2x512xf32>
    %134 = tpu.matmul %131, %133, %cst_67 {dimension_numbers = #tpu.dot_dimension_numbers<[1], [0], [0], [1], [0, 0, 1, 1], [], []>} : vector<2x256xf32>, vector<256x512xf32>, vector<2x512xf32> -> vector<2x512xf32>
    %c2_68 = arith.constant 2 : index
    %c0_69 = arith.constant 0 : index
    %c0_70 = arith.constant 0 : index
    %135 = vector.load %arg4[%c2_68, %c0_69, %c0_70] : memref<3x1x512xf32, #tpu.memory_space<vmem>>, vector<1x1x512xf32>
    %136 = vector.shape_cast %135 : vector<1x1x512xf32> to vector<1x512xf32>
    %137 = vector.broadcast %136 : vector<1x512xf32> to vector<2x512xf32>
    %138 = arith.addf %134, %137 : vector<2x512xf32>
    %c3_71 = arith.constant 3 : index
    %c0_72 = arith.constant 0 : index
    %c0_73 = arith.constant 0 : index
    %139 = vector.load %arg7[%c3_71, %c0_72, %c0_73] : memref<4x2x128xf32, #tpu.memory_space<vmem>>, vector<1x2x128xf32>
    %140 = vector.shape_cast %139 : vector<1x2x128xf32> to vector<2x128xf32>
    %141 = vector.extract_strided_slice %138 {offsets = [0, 0], sizes = [2, 128], strides = [1, 1]} : vector<2x512xf32> to vector<2x128xf32>
    %142 = arith.negf %141 : vector<2x128xf32>
    %143 = math.exp %142 : vector<2x128xf32>
    %cst_74 = arith.constant 1.000000e+00 : f32
    %144 = vector.broadcast %cst_74 : f32 to vector<2x128xf32>
    %145 = arith.addf %144, %143 : vector<2x128xf32>
    %146 = arith.divf %144, %145 : vector<2x128xf32>
    %147 = vector.extract_strided_slice %138 {offsets = [0, 128], sizes = [2, 128], strides = [1, 1]} : vector<2x512xf32> to vector<2x128xf32>
    %148 = arith.negf %147 : vector<2x128xf32>
    %149 = math.exp %148 : vector<2x128xf32>
    %cst_75 = arith.constant 1.000000e+00 : f32
    %150 = vector.broadcast %cst_75 : f32 to vector<2x128xf32>
    %151 = arith.addf %150, %149 : vector<2x128xf32>
    %152 = arith.divf %150, %151 : vector<2x128xf32>
    %153 = vector.extract_strided_slice %138 {offsets = [0, 256], sizes = [2, 128], strides = [1, 1]} : vector<2x512xf32> to vector<2x128xf32>
    %154 = math.tanh %153 : vector<2x128xf32>
    %155 = vector.extract_strided_slice %138 {offsets = [0, 384], sizes = [2, 128], strides = [1, 1]} : vector<2x512xf32> to vector<2x128xf32>
    %156 = arith.negf %155 : vector<2x128xf32>
    %157 = math.exp %156 : vector<2x128xf32>
    %cst_76 = arith.constant 1.000000e+00 : f32
    %158 = vector.broadcast %cst_76 : f32 to vector<2x128xf32>
    %159 = arith.addf %158, %157 : vector<2x128xf32>
    %160 = arith.divf %158, %159 : vector<2x128xf32>
    %161 = arith.mulf %152, %140 : vector<2x128xf32>
    %162 = arith.mulf %146, %154 : vector<2x128xf32>
    %163 = arith.addf %161, %162 : vector<2x128xf32>
    %164 = math.tanh %163 : vector<2x128xf32>
    %165 = arith.mulf %160, %164 : vector<2x128xf32>
    %c3_77 = arith.constant 3 : index
    %c0_78 = arith.constant 0 : index
    %c0_79 = arith.constant 0 : index
    %166 = vector.load %arg6[%c3_77, %c0_78, %c0_79] : memref<4x2x128xf32, #tpu.memory_space<vmem>>, vector<1x2x128xf32>
    %167 = vector.shape_cast %166 : vector<1x2x128xf32> to vector<2x128xf32>
    %168 = vector.shape_cast %165 : vector<2x128xf32> to vector<1x2x128xf32>
    tpu.vector_store %arg6[%c3_77, %c0_78, %c0_79], %168 {strides = array<i32>} : memref<4x2x128xf32, #tpu.memory_space<vmem>>, vector<1x2x128xf32>,
    %c3_80 = arith.constant 3 : index
    %c0_81 = arith.constant 0 : index
    %c0_82 = arith.constant 0 : index
    %169 = vector.load %arg7[%c3_80, %c0_81, %c0_82] : memref<4x2x128xf32, #tpu.memory_space<vmem>>, vector<1x2x128xf32>
    %170 = vector.shape_cast %169 : vector<1x2x128xf32> to vector<2x128xf32>
    %171 = vector.shape_cast %163 : vector<2x128xf32> to vector<1x2x128xf32>
    tpu.vector_store %arg7[%c3_80, %c0_81, %c0_82], %171 {strides = array<i32>} : memref<4x2x128xf32, #tpu.memory_space<vmem>>, vector<1x2x128xf32>,
    %c0_83 = arith.constant 0 : index
    %c0_84 = arith.constant 0 : index
    %172 = vector.load %arg5[%c0_83, %c0_84] : memref<2x128xf32, #tpu.memory_space<vmem>>, vector<2x128xf32>
    tpu.vector_store %arg5[%c0_83, %c0_84], %165 {strides = array<i32>} : memref<2x128xf32, #tpu.memory_space<vmem>>, vector<2x128xf32>,
    return
  }
  func.func @transform_0(%arg0: i32) -> (i32, i32, i32) {
    %c0_i32 = arith.constant 0 : i32
    %c0_i32_0 = arith.constant 0 : i32
    %c0_i32_1 = arith.constant 0 : i32
    return %arg0, %c0_i32, %c0_i32_0 : i32, i32, i32
  }
  func.func @transform_1(%arg0: i32) -> (i32, i32) {
    %c0_i32 = arith.constant 0 : i32
    %c0_i32_0 = arith.constant 0 : i32
    %c0_i32_1 = arith.constant 0 : i32
    return %c0_i32, %c0_i32_0 : i32, i32
  }
  func.func @transform_2(%arg0: i32) -> (i32, i32, i32) {
    %c0_i32 = arith.constant 0 : i32
    %c0_i32_0 = arith.constant 0 : i32
    %c0_i32_1 = arith.constant 0 : i32
    %c0_i32_2 = arith.constant 0 : i32
    return %c0_i32, %c0_i32_0, %c0_i32_1 : i32, i32, i32
  }
  func.func @transform_3(%arg0: i32) -> (i32, i32, i32) {
    %c0_i32 = arith.constant 0 : i32
    %c0_i32_0 = arith.constant 0 : i32
    %c0_i32_1 = arith.constant 0 : i32
    %c0_i32_2 = arith.constant 0 : i32
    return %c0_i32, %c0_i32_0, %c0_i32_1 : i32, i32, i32
  }
  func.func @transform_4(%arg0: i32) -> (i32, i32) {
    %c0_i32 = arith.constant 0 : i32
    %c0_i32_0 = arith.constant 0 : i32
    %c0_i32_1 = arith.constant 0 : i32
    return %c0_i32, %c0_i32_0 : i32, i32
  }
}

module attributes {stable_mosaic.version = 11 : i64} {
  func.func @_mlp_head_kernel(%arg0: memref<2x128xf32, #tpu.memory_space<vmem>>, %arg1: memref<128x1024xf32, #tpu.memory_space<vmem>>, %arg2: memref<1x1024xf32, #tpu.memory_space<vmem>>, %arg3: memref<1024x512xf32, #tpu.memory_space<vmem>>, %arg4: memref<1x512xf32, #tpu.memory_space<vmem>>, %arg5: memref<512x256xf32, #tpu.memory_space<vmem>>, %arg6: memref<1x256xf32, #tpu.memory_space<vmem>>, %arg7: memref<256x128xf32, #tpu.memory_space<vmem>>, %arg8: memref<1x128xf32, #tpu.memory_space<vmem>>, %arg9: memref<128x1xf32, #tpu.memory_space<vmem>>, %arg10: memref<1x1xf32, #tpu.memory_space<vmem>>, %arg11: memref<2x1xf32, #tpu.memory_space<vmem>>) attributes {dimension_semantics = [], scalar_prefetch = 0 : i64, scratch_operands = 0 : i64, tpu.core_type = #tpu.core_type<tc>} {
    %c0 = arith.constant 0 : index
    %c0_0 = arith.constant 0 : index
    %0 = vector.load %arg0[%c0, %c0_0] : memref<2x128xf32, #tpu.memory_space<vmem>>, vector<2x128xf32>
    %c0_1 = arith.constant 0 : index
    %c0_2 = arith.constant 0 : index
    %1 = vector.load %arg1[%c0_1, %c0_2] : memref<128x1024xf32, #tpu.memory_space<vmem>>, vector<128x1024xf32>
    %cst = arith.constant dense<0.000000e+00> : vector<2x1024xf32>
    %2 = tpu.matmul %0, %1, %cst {dimension_numbers = #tpu.dot_dimension_numbers<[1], [0], [0], [1], [0, 0, 1, 1], [], []>} : vector<2x128xf32>, vector<128x1024xf32>, vector<2x1024xf32> -> vector<2x1024xf32>
    %c0_3 = arith.constant 0 : index
    %c0_4 = arith.constant 0 : index
    %3 = vector.load %arg2[%c0_3, %c0_4] : memref<1x1024xf32, #tpu.memory_space<vmem>>, vector<1x1024xf32>
    %4 = vector.broadcast %3 : vector<1x1024xf32> to vector<2x1024xf32>
    %5 = arith.addf %2, %4 : vector<2x1024xf32>
    %cst_5 = arith.constant 0.000000e+00 : f32
    %6 = vector.broadcast %cst_5 : f32 to vector<2x1024xf32>
    %7 = arith.maximumf %5, %6 : vector<2x1024xf32>
    %c0_6 = arith.constant 0 : index
    %c0_7 = arith.constant 0 : index
    %8 = vector.load %arg3[%c0_6, %c0_7] : memref<1024x512xf32, #tpu.memory_space<vmem>>, vector<1024x512xf32>
    %cst_8 = arith.constant dense<0.000000e+00> : vector<2x512xf32>
    %9 = tpu.matmul %7, %8, %cst_8 {dimension_numbers = #tpu.dot_dimension_numbers<[1], [0], [0], [1], [0, 0, 1, 1], [], []>} : vector<2x1024xf32>, vector<1024x512xf32>, vector<2x512xf32> -> vector<2x512xf32>
    %c0_9 = arith.constant 0 : index
    %c0_10 = arith.constant 0 : index
    %10 = vector.load %arg4[%c0_9, %c0_10] : memref<1x512xf32, #tpu.memory_space<vmem>>, vector<1x512xf32>
    %11 = vector.broadcast %10 : vector<1x512xf32> to vector<2x512xf32>
    %12 = arith.addf %9, %11 : vector<2x512xf32>
    %cst_11 = arith.constant 0.000000e+00 : f32
    %13 = vector.broadcast %cst_11 : f32 to vector<2x512xf32>
    %14 = arith.maximumf %12, %13 : vector<2x512xf32>
    %c0_12 = arith.constant 0 : index
    %c0_13 = arith.constant 0 : index
    %15 = vector.load %arg5[%c0_12, %c0_13] : memref<512x256xf32, #tpu.memory_space<vmem>>, vector<512x256xf32>
    %cst_14 = arith.constant dense<0.000000e+00> : vector<2x256xf32>
    %16 = tpu.matmul %14, %15, %cst_14 {dimension_numbers = #tpu.dot_dimension_numbers<[1], [0], [0], [1], [0, 0, 1, 1], [], []>} : vector<2x512xf32>, vector<512x256xf32>, vector<2x256xf32> -> vector<2x256xf32>
    %c0_15 = arith.constant 0 : index
    %c0_16 = arith.constant 0 : index
    %17 = vector.load %arg6[%c0_15, %c0_16] : memref<1x256xf32, #tpu.memory_space<vmem>>, vector<1x256xf32>
    %18 = vector.broadcast %17 : vector<1x256xf32> to vector<2x256xf32>
    %19 = arith.addf %16, %18 : vector<2x256xf32>
    %cst_17 = arith.constant 0.000000e+00 : f32
    %20 = vector.broadcast %cst_17 : f32 to vector<2x256xf32>
    %21 = arith.maximumf %19, %20 : vector<2x256xf32>
    %c0_18 = arith.constant 0 : index
    %c0_19 = arith.constant 0 : index
    %22 = vector.load %arg7[%c0_18, %c0_19] : memref<256x128xf32, #tpu.memory_space<vmem>>, vector<256x128xf32>
    %cst_20 = arith.constant dense<0.000000e+00> : vector<2x128xf32>
    %23 = tpu.matmul %21, %22, %cst_20 {dimension_numbers = #tpu.dot_dimension_numbers<[1], [0], [0], [1], [0, 0, 1, 1], [], []>} : vector<2x256xf32>, vector<256x128xf32>, vector<2x128xf32> -> vector<2x128xf32>
    %c0_21 = arith.constant 0 : index
    %c0_22 = arith.constant 0 : index
    %24 = vector.load %arg8[%c0_21, %c0_22] : memref<1x128xf32, #tpu.memory_space<vmem>>, vector<1x128xf32>
    %25 = vector.broadcast %24 : vector<1x128xf32> to vector<2x128xf32>
    %26 = arith.addf %23, %25 : vector<2x128xf32>
    %cst_23 = arith.constant 0.000000e+00 : f32
    %27 = vector.broadcast %cst_23 : f32 to vector<2x128xf32>
    %28 = arith.maximumf %26, %27 : vector<2x128xf32>
    %c0_24 = arith.constant 0 : index
    %c0_25 = arith.constant 0 : index
    %29 = vector.load %arg9[%c0_24, %c0_25] : memref<128x1xf32, #tpu.memory_space<vmem>>, vector<128x1xf32>
    %cst_26 = arith.constant dense<0.000000e+00> : vector<2x1xf32>
    %30 = tpu.matmul %28, %29, %cst_26 {dimension_numbers = #tpu.dot_dimension_numbers<[1], [0], [0], [1], [0, 0, 1, 1], [], []>} : vector<2x128xf32>, vector<128x1xf32>, vector<2x1xf32> -> vector<2x1xf32>
    %c0_27 = arith.constant 0 : index
    %c0_28 = arith.constant 0 : index
    %31 = vector.load %arg10[%c0_27, %c0_28] : memref<1x1xf32, #tpu.memory_space<vmem>>, vector<1x1xf32>
    %32 = vector.broadcast %31 : vector<1x1xf32> to vector<2x1xf32>
    %33 = arith.addf %30, %32 : vector<2x1xf32>
    %cst_29 = arith.constant 0.000000e+00 : f32
    %34 = vector.broadcast %cst_29 : f32 to vector<2x1xf32>
    %35 = arith.maximumf %33, %34 : vector<2x1xf32>
    %c0_30 = arith.constant 0 : index
    %c0_31 = arith.constant 0 : index
    %36 = vector.load %arg11[%c0_30, %c0_31] : memref<2x1xf32, #tpu.memory_space<vmem>>, vector<2x1xf32>
    tpu.vector_store %arg11[%c0_30, %c0_31], %35 {strides = array<i32>} : memref<2x1xf32, #tpu.memory_space<vmem>>, vector<2x1xf32>,
    return
  }
}

</mosaic_0001>

<bundles_post_ra>
// kernel: net_forward.4
= control target key start
LH: loop header
LB: loop body
LE: loop exit
PB: predicated region body
PF: predicated region fallthrough
CT: control target
= control target key end

     0   :  { %8 = vsyncpa [#allocation4], 0  ;;  %s491_s0 = inlined_call_operand.hbm [shape: f32[8,256], index: 0, kind: input, shape index: {}]   ;;  %s492_s1 = inlined_call_operand.hbm [shape: bf16[256,128], index: 1, kind: input, shape index: {}]   ;;  %s493_s2 = inlined_call_operand.hbm [shape: f32[1,128], index: 2, kind: input, shape index: {}]   ;;  %s494_s3 = inlined_call_operand.hbm [shape: f32[8,128], index: 3, kind: output, shape index: {}]  }
   0x1   :  { %9 = vsyncpa [#allocation7], 0 }
   0x2   :  { %10 = vsyncpa [#allocation5], 0  ;;  %s417_s12 = smov [#allocation6]   ;;  %s323_s16 = scalar_lea.hbm %s492_s1, 2048 }
   0x3   :  { %s26_s13 = sshll.u32 %s417_s12, 4  ;;  %p324_p0 = scmp.ne.s32.totalorder %s492_s1, %s323_s16  ;;  %s27_s13 = int_to_ptr.vmem [resolvable:$true] %s26_s13 }
   0x4   :  { %p327_p1 = scmp.lt.u32.totalorder %s323_s16, %s492_s1 }
   0x6   :  { %p329_p2 = pnand %p327_p1, %p324_p0 }
   0x8   :  { %332 = shalt.err (!%p329_p2)
}
   0x9   :  { %s333_s21 = scalar_lea.vmem %s27_s13, 2048  ;;  %p338_p4 = scmp.lt.s32.totalorder %s27_s13, %s27_s13 }
   0xa   :  { %p334_p3 = scmp.ne.s32.totalorder %s27_s13, %s333_s21  ;;  %p339_p5 = scmp.lt.s32.totalorder %s333_s21, %s333_s21 }
   0xc   :  { %p340_p6 = por %p339_p5, %p338_p4 }
   0xe   :  { %p341_p7 = pnand %p340_p6, %p334_p3 }
  0x10   :  { %344 = shalt.err (!%p341_p7)
}
  0x11   :  { %s418_s22 = smov 64   ;;  %s419_s23 = smov 4  }
  0x12   :  { %32 = dma.hbm_to_vmem [thread:$0]  %s492_s1, 2048, %s27_s13, [#allocation7], %s418_s22, %s418_s22, %s419_s23  }
  0x13   :  { %s420_s26 = smov [#allocation3]   ;;  %s421_s28 = smov [#allocation8]  }
  0x14   :  { %s17_s27 = sshll.u32 %s420_s26, 4  ;;  %s39_s29 = sshll.u32 %s421_s28, 4  ;;  %s18_s27 = int_to_ptr.vmem [resolvable:$true] %s17_s27  ;;  %s40_s29 = int_to_ptr.vmem [resolvable:$true] %s39_s29 }
  0x15   :  { %s345_s5 = scalar_lea.hbm %s491_s0, 256 }
  0x16   :  { %p346_p8 = scmp.ne.s32.totalorder %s491_s0, %s345_s5  ;;  %p349_p9 = scmp.lt.u32.totalorder %s345_s5, %s491_s0 }
  0x18   :  { %p351_p10 = pnand %p349_p9, %p346_p8 }
  0x1a   :  { %354 = shalt.err (!%p351_p10)
}
  0x1b   :  { %s355_s1 = scalar_lea.vmem %s18_s27, 256  ;;  %p360_p12 = scmp.lt.s32.totalorder %s18_s27, %s18_s27 }
  0x1c   :  { %p356_p11 = scmp.ne.s32.totalorder %s18_s27, %s355_s1  ;;  %p361_p13 = scmp.lt.s32.totalorder %s355_s1, %s355_s1 }
  0x1e   :  { %p362_p0 = por %p361_p13, %p360_p12 }
  0x20   :  { %p363_p1 = pnand %p362_p0, %p356_p11 }
  0x22   :  { %366 = shalt.err (!%p363_p1)
}
  0x23   :  { %20 = dma.hbm_to_vmem [thread:$0]  %s491_s0, 256, %s18_s27, [#allocation4]  }
  0x24   :  { %s367_s14 = scalar_lea.hbm %s493_s2, 16 }
  0x25   :  { %p368_p2 = scmp.ne.s32.totalorder %s493_s2, %s367_s14  ;;  %p371_p3 = scmp.lt.u32.totalorder %s367_s14, %s493_s2 }
  0x27   :  { %p373_p4 = pnand %p371_p3, %p368_p2 }
  0x29   :  { %376 = shalt.err (!%p373_p4)
}
  0x2a   :  { %s377_s19 = scalar_lea.vmem %s40_s29, 16  ;;  %s381_s20 = scalar_lea.vmem %s40_s29, 32 }
  0x2b   :  { %p378_p5 = scmp.ne.s32.totalorder %s40_s29, %s377_s19  ;;  %p382_p6 = scmp.lt.s32.totalorder %s40_s29, %s40_s29 }
  0x2c   :  { %p383_p7 = scmp.lt.s32.totalorder %s381_s20, %s377_s19 }
  0x2e   :  { %p384_p8 = por %p383_p7, %p382_p6 }
  0x30   :  { %p385_p9 = pnand %p384_p8, %p378_p5 }
  0x32   :  { %388 = shalt.err (!%p385_p9)
}
  0x33   :  { %42 = dma.hbm_to_vmem [thread:$0]  %s493_s2, 16, %s40_s29, [#allocation7]  }
  0x34   :  { %411 = dma.done.wait [#allocation4], 256  }
  0x35   :  { %412 = vsyncadd [#allocation4], 4294967040 }
  0x36   :  { %413 = dma.done.wait [#allocation7], 2064  }
  0x37   :  { %414 = vsyncadd [#allocation7], 4294965232  ;;  %v307_v0 = vld [vmem:[#allocation6 + $0x40] sm:$0xff]   ;;  %v309_v2 = vld [vmem:[#allocation6 + $0x48] sm:$0xff]   ;;  %s422_s2 = smov [#allocation9]  }
  0x38   :  { %v308_v1 = vld [vmem:[#allocation6] sm:$0xff]   ;;  %279 = vmatprep.subr.bf16.mxu0 %v307_v0  ;;  %v310_v3 = vld [vmem:[#allocation6 + $0x8] sm:$0xff]   ;;  %v311_v4 = vld [vmem:[#allocation6 + $0x50] sm:$0xff]   ;;  %s252_s22 = sshll.u32 %s422_s2, 4  ;;  %s253_s22 = int_to_ptr.vmem [resolvable:$true] %s252_s22 }
  0x39   :  { %280 = vmatpush3.bf16.msra.mxu0 %v308_v1  ;;  %v312_v5 = vld [vmem:[#allocation6 + $0x10] sm:$0xff]   ;;  %v313_v6 = vld [vmem:[#allocation6 + $0x58] sm:$0xff]   ;;  %v315_v8 = vld [vmem:[#allocation6 + $0x60] sm:$0xff]   ;;  %s389_s23 = scalar_lea.vmem %s253_s22, 128  ;;  %p394_p11 = scmp.lt.s32.totalorder %s253_s22, %s253_s22 }
  0x3a   :  { %281 = vmatprep.subr.bf16.mxu0 %v309_v2  ;;  %v314_v7 = vld [vmem:[#allocation6 + $0x18] sm:$0xff]   ;;  %v316_v9 = vld [vmem:[#allocation6 + $0x20] sm:$0xff]   ;;  %v317_v10 = vld [vmem:[#allocation6 + $0x68] sm:$0xff]   ;;  %p390_p10 = scmp.ne.s32.totalorder %s253_s22, %s389_s23  ;;  %p395_p12 = scmp.lt.s32.totalorder %s389_s23, %s389_s23 }
  0x3b   :  { %v60_v11 = vld [vmem:[#allocation3 + $0x8] sm:$0xff]  ;;  %v318_v13 = vld [vmem:[#allocation6 + $0x28] sm:$0xff]   ;;  %v319_v14 = vld [vmem:[#allocation6 + $0x70] sm:$0xff]  }
  0x3c   :  { %v62_v12 = vpack.c.bf16 %v60_v11, %v60_v11  ;;  %v320_v15 = vld [vmem:[#allocation6 + $0x30] sm:$0xff]   ;;  %v321_v16 = vld [vmem:[#allocation6 + $0x78] sm:$0xff]   ;;  %v278_v22 = vld [vmem:[#allocation8] ss:$0 sm:$0xff]  ;;  %p396_p13 = por %p395_p12, %p394_p11 }
  0x3d   :  { %282 = vmatpush3.bf16.msra.mxu0 %v310_v3  ;;  %v322_v17 = vld [vmem:[#allocation6 + $0x38] sm:$0xff]   ;;  %v59_v18 = vld [vmem:[#allocation3] sm:$0xff] }
  0x3e   :  { %283 = vmatprep.subr.bf16.mxu0 %v311_v4  ;;  %223 = vmatprep.mubr.bf16.mxu0 %v62_v12  ;;  %v61_v19 = vpack.c.bf16 %v59_v18, %v59_v18  ;;  %p397_p0 = pnand %p396_p13, %p390_p10 }
  0x41   :  { %284 = vmatpush3.bf16.msra.mxu0 %v312_v5 }
  0x42   :  { %285 = vmatprep.subr.bf16.mxu0 %v313_v6 }
  0x45   :  { %286 = vmatpush3.bf16.msra.mxu0 %v314_v7 }
  0x46   :  { %287 = vmatprep.subr.bf16.mxu0 %v315_v8 }
  0x49   :  { %288 = vmatpush3.bf16.msra.mxu0 %v316_v9 }
  0x4a   :  { %289 = vmatprep.subr.bf16.mxu0 %v317_v10 }
  0x4d   :  { %290 = vmatpush3.bf16.msra.mxu0 %v318_v13 }
  0x4e   :  { %291 = vmatprep.subr.bf16.mxu0 %v319_v14 }
  0x51   :  { %292 = vmatpush3.bf16.msra.mxu0 %v320_v15 }
  0x52   :  { %293 = vmatprep.subr.bf16.mxu0 %v321_v16 }
  0x55   :  { %294 = vmatpush3.bf16.msra.mxu0 %v322_v17 }
  0x58   :  { %224 = vmatmul.mubr.bf16.vlgmr.msra.gmra.mrb[0].mxu0 %v61_v19 }
 0x12b   :  { %v295_v20 = vpop.f32.mrb[0].mxu0 }
 0x12c   :  { %v296_v21 = vpop.f32.mrb[1].mxu0 }
 0x12d   :  { %v297_v23 = vadd.f32 %v296_v21, %v295_v20  ;;  %v298_v24 = vpop.f32.mrb[2].mxu0 }
 0x12e   :  { %v299_v25 = vpop.f32.mrb[3].mxu0 }
 0x12f   :  { %v244_v26 = vadd.f32 %v297_v23, %v278_v22 }
 0x131   :  { %245 = vst [vmem:[#allocation9] sm:$0xff] %v244_v26 }
 0x132   :  { %400 = shalt.err (!%p397_p0)
}
 0x133   :  { %s401_s26 = scalar_lea.hbm %s494_s3, 128 }
 0x134   :  { %p402_p1 = scmp.ne.s32.totalorder %s494_s3, %s401_s26  ;;  %p405_p2 = scmp.lt.u32.totalorder %s401_s26, %s494_s3 }
 0x136   :  { %p407_p3 = pnand %p405_p2, %p402_p1 }
 0x138   :  { %410 = shalt.err (!%p407_p3)
}
 0x139   :  { %255 = dma.vmem_to_hbm [thread:$0]  %s253_s22, 128, %s494_s3, [#allocation5]  }
 0x13a   :  { %415 = dma.done.wait [#allocation5], 128  }
 0x13b   :  { %416 = vsyncadd [#allocation5], 4294967168 }
 0x13c   :  { %259 = vsyncpa [#allocation4], 1 }
 0x13d   :  { %260 = vsyncpa [#allocation7], 1 }
 0x13e   :  { %261 = vsyncpa [#allocation5], 1 }

// kernel: net_forward.5
= control target key start
LH: loop header
LB: loop body
LE: loop exit
PB: predicated region body
PF: predicated region fallthrough
CT: control target
= control target key end

     0   :  { %8 = vsyncpa [#allocation4], 0  ;;  %s572_s0 = inlined_call_operand.hbm [shape: f32[8,128], index: 0, kind: input, shape index: {}]   ;;  %s573_s1 = inlined_call_operand.hbm [shape: f32[128,512], index: 1, kind: input, shape index: {}]   ;;  %s574_s2 = inlined_call_operand.hbm [shape: f32[1,512], index: 2, kind: input, shape index: {}]   ;;  %s575_s3 = inlined_call_operand.hbm [shape: f32[8,512], index: 3, kind: output, shape index: {}]  }
   0x1   :  { %9 = vsyncpa [#allocation7], 0 }
   0x2   :  { %10 = vsyncpa [#allocation5], 0  ;;  %s497_s12 = smov [#allocation6]   ;;  %s403_s16 = scalar_lea.hbm %s573_s1, 8192 }
   0x3   :  { %s26_s13 = sshll.u32 %s497_s12, 4  ;;  %p404_p0 = scmp.ne.s32.totalorder %s573_s1, %s403_s16  ;;  %s27_s13 = int_to_ptr.vmem [resolvable:$true] %s26_s13 }
   0x4   :  { %p407_p1 = scmp.lt.u32.totalorder %s403_s16, %s573_s1 }
   0x6   :  { %p409_p2 = pnand %p407_p1, %p404_p0 }
   0x8   :  { %412 = shalt.err (!%p409_p2)
}
   0x9   :  { %s413_s21 = scalar_lea.vmem %s27_s13, 8192  ;;  %p418_p4 = scmp.lt.s32.totalorder %s27_s13, %s27_s13 }
   0xa   :  { %p414_p3 = scmp.ne.s32.totalorder %s27_s13, %s413_s21  ;;  %p419_p5 = scmp.lt.s32.totalorder %s413_s21, %s413_s21 }
   0xc   :  { %p420_p6 = por %p419_p5, %p418_p4 }
   0xe   :  { %p421_p7 = pnand %p420_p6, %p414_p3 }
  0x10   :  { %424 = shalt.err (!%p421_p7)
}
  0x11   :  { %s498_s22 = smov 512   ;;  %s499_s23 = smov 32  }
  0x12   :  { %32 = dma.hbm_to_vmem [thread:$0]  %s573_s1, 8192, %s27_s13, [#allocation7], %s498_s22, %s498_s22, %s499_s23  }
  0x13   :  { %s500_s26 = smov [#allocation3]   ;;  %s501_s28 = smov [#allocation8]  }
  0x14   :  { %s17_s27 = sshll.u32 %s500_s26, 4  ;;  %s39_s29 = sshll.u32 %s501_s28, 4  ;;  %s18_s27 = int_to_ptr.vmem [resolvable:$true] %s17_s27  ;;  %s40_s29 = int_to_ptr.vmem [resolvable:$true] %s39_s29 }
  0x15   :  { %s425_s5 = scalar_lea.hbm %s572_s0, 128 }
  0x16   :  { %p426_p8 = scmp.ne.s32.totalorder %s572_s0, %s425_s5  ;;  %p429_p9 = scmp.lt.u32.totalorder %s425_s5, %s572_s0 }
  0x18   :  { %p431_p10 = pnand %p429_p9, %p426_p8 }
  0x1a   :  { %434 = shalt.err (!%p431_p10)
}
  0x1b   :  { %s435_s1 = scalar_lea.vmem %s18_s27, 128  ;;  %p440_p12 = scmp.lt.s32.totalorder %s18_s27, %s18_s27 }
  0x1c   :  { %p436_p11 = scmp.ne.s32.totalorder %s18_s27, %s435_s1  ;;  %p441_p13 = scmp.lt.s32.totalorder %s435_s1, %s435_s1 }
  0x1e   :  { %p442_p0 = por %p441_p13, %p440_p12 }
  0x20   :  { %p443_p1 = pnand %p442_p0, %p436_p11 }
  0x22   :  { %446 = shalt.err (!%p443_p1)
}
  0x23   :  { %20 = dma.hbm_to_vmem [thread:$0]  %s572_s0, 128, %s18_s27, [#allocation4]  }
  0x24   :  { %s447_s14 = scalar_lea.hbm %s574_s2, 64 }
  0x25   :  { %p448_p2 = scmp.ne.s32.totalorder %s574_s2, %s447_s14  ;;  %p451_p3 = scmp.lt.u32.totalorder %s447_s14, %s574_s2 }
  0x27   :  { %p453_p4 = pnand %p451_p3, %p448_p2 }
  0x29   :  { %456 = shalt.err (!%p453_p4)
}
  0x2a   :  { %s457_s19 = scalar_lea.vmem %s40_s29, 64  ;;  %p462_p6 = scmp.lt.s32.totalorder %s40_s29, %s40_s29 }
  0x2b   :  { %p458_p5 = scmp.ne.s32.totalorder %s40_s29, %s457_s19  ;;  %p463_p7 = scmp.lt.s32.totalorder %s457_s19, %s457_s19 }
  0x2d   :  { %p464_p8 = por %p463_p7, %p462_p6 }
  0x2f   :  { %p465_p9 = pnand %p464_p8, %p458_p5 }
  0x31   :  { %468 = shalt.err (!%p465_p9)
}
  0x32   :  { %42 = dma.hbm_to_vmem [thread:$0]  %s574_s2, 64, %s40_s29, [#allocation7]  }
  0x33   :  { %491 = dma.done.wait [#allocation4], 128  }
  0x34   :  { %492 = vsyncadd [#allocation4], 4294967168 }
  0x35   :  { %493 = dma.done.wait [#allocation7], 8256  }
  0x36   :  { %494 = vsyncadd [#allocation7], 4294959040  ;;  %v502_v0 = vmov 0.0   ;;  %v66_v1 = vld [vmem:[#allocation6 + $0x8] sm:$0xff]  ;;  %v68_v3 = vld [vmem:[#allocation6 + $0x18] sm:$0xff]  ;;  %s503_s2 = smov [#allocation9]  }
  0x37   :  { %193 = vmatprep.mubr.f32.mxu0 %v502_v0  ;;  %264 = vmatprep.mubr.f32.mxu1 %v502_v0  ;;  %v70_v2 = vld [vmem:[#allocation6 + $0x28] sm:$0xff]  ;;  %v72_v5 = vld [vmem:[#allocation6 + $0x38] sm:$0xff]  ;;  %v65_v6 = vld [vmem:[#allocation6] sm:$0xff]  ;;  %s322_s21 = sshll.u32 %s503_s2, 4  ;;  %s323_s21 = int_to_ptr.vmem [resolvable:$true] %s322_s21 }
  0x38   :  { %v332_v4 = vpack.c.bf16 %v70_v2, %v66_v1  ;;  %v69_v7 = vld [vmem:[#allocation6 + $0x20] sm:$0xff]  ;;  %v364_v8 = vpack.c.bf16 %v72_v5, %v68_v3  ;;  %v67_v10 = vld [vmem:[#allocation6 + $0x10] sm:$0xff]  ;;  %v74_v12 = vld [vmem:[#allocation6 + $0x48] sm:$0xff]  ;;  %s469_s22 = scalar_lea.vmem %s323_s21, 512  ;;  %p474_p11 = scmp.lt.s32.totalorder %s323_s21, %s323_s21 }
  0x39   :  { %v334_v9 = vpack.c.bf16 %v69_v7, %v65_v6  ;;  %v71_v11 = vld [vmem:[#allocation6 + $0x30] sm:$0xff]  ;;  %v78_v14 = vld [vmem:[#allocation6 + $0x68] sm:$0xff]  ;;  %v76_v15 = vld [vmem:[#allocation6 + $0x58] sm:$0xff]  ;;  %p470_p10 = scmp.ne.s32.totalorder %s323_s21, %s469_s22  ;;  %p475_p12 = scmp.lt.s32.totalorder %s469_s22, %s469_s22 }
  0x3a   :  { %333 = vmatprep.subr.bf16.mxu0 %v332_v4  ;;  %v366_v13 = vpack.c.bf16 %v71_v11, %v67_v10  ;;  %v80_v16 = vld [vmem:[#allocation6 + $0x78] sm:$0xff]  ;;  %365 = vmatprep.subr.bf16.mxu1 %v364_v8  ;;  %v336_v17 = vpack.c.bf16 %v78_v14, %v74_v12  ;;  %v73_v19 = vld [vmem:[#allocation6 + $0x40] sm:$0xff]  ;;  %v75_v21 = vld [vmem:[#allocation6 + $0x50] sm:$0xff] }
  0x3b   :  { %335 = vmatpush1.bf16.msra.mxu0 %v334_v9  ;;  %v368_v18 = vpack.c.bf16 %v80_v16, %v76_v15  ;;  %v77_v20 = vld [vmem:[#allocation6 + $0x60] sm:$0xff]  ;;  %v79_v23 = vld [vmem:[#allocation6 + $0x70] sm:$0xff]  ;;  %v82_v24 = vld [vmem:[#allocation6 + $0x88] sm:$0xff]  ;;  %p476_p13 = por %p475_p12, %p474_p11 }
  0x3c   :  { %367 = vmatpush1.bf16.msra.mxu1 %v366_v13  ;;  %v338_v22 = vpack.c.bf16 %v77_v20, %v73_v19  ;;  %v86_v25 = vld [vmem:[#allocation6 + $0xa8] sm:$0xff]  ;;  %337 = vmatprep.subr.bf16.mxu0 %v336_v17  ;;  %v370_v26 = vpack.c.bf16 %v79_v23, %v75_v21  ;;  %v84_v28 = vld [vmem:[#allocation6 + $0x98] sm:$0xff]  ;;  %v81_v30 = vld [vmem:[#allocation6 + $0x80] sm:$0xff] }
  0x3d   :  { %369 = vmatprep.subr.bf16.mxu1 %v368_v18  ;;  %v340_v27 = vpack.c.bf16 %v86_v25, %v82_v24  ;;  %v88_v29 = vld [vmem:[#allocation6 + $0xb8] sm:$0xff]  ;;  %v85_v32 = vld [vmem:[#allocation6 + $0xa0] sm:$0xff]  ;;  %v83_v33 = vld [vmem:[#allocation6 + $0x90] sm:$0xff]  ;;  %p477_p0 = pnand %p476_p13, %p470_p10 }
  0x3e   :  { %v372_v31 = vpack.c.bf16 %v88_v29, %v84_v28  ;;  %v87_v34 = vld [vmem:[#allocation6 + $0xb0] sm:$0xff]  ;;  %v342_v35 = vpack.c.bf16 %v85_v32, %v81_v30  ;;  %v90_v36 = vld [vmem:[#allocation6 + $0xc8] sm:$0xff]  ;;  %v92_v38 = vld [vmem:[#allocation6 + $0xd8] sm:$0xff] }
  0x3f   :  { %339 = vmatpush1.bf16.msra.mxu0 %v338_v22  ;;  %v94_v37 = vld [vmem:[#allocation6 + $0xe8] sm:$0xff]  ;;  %v374_v39 = vpack.c.bf16 %v87_v34, %v83_v33  ;;  %v96_v41 = vld [vmem:[#allocation6 + $0xf8] sm:$0xff]  ;;  %v89_v42 = vld [vmem:[#allocation6 + $0xc0] sm:$0xff]  ;;  %v288_v34 = vlaneseq }
  0x40   :  { %371 = vmatpush1.bf16.msra.mxu1 %v370_v26  ;;  %341 = vmatprep.subr.bf16.mxu0 %v340_v27  ;;  %v344_v40 = vpack.c.bf16 %v94_v37, %v90_v36  ;;  %v93_v43 = vld [vmem:[#allocation6 + $0xe0] sm:$0xff]  ;;  %v376_v44 = vpack.c.bf16 %v96_v41, %v92_v38  ;;  %v91_v45 = vld [vmem:[#allocation6 + $0xd0] sm:$0xff]  ;;  %v98_v47 = vld [vmem:[#allocation6 + $0x108] sm:$0xff] }
  0x41   :  { %373 = vmatprep.subr.bf16.mxu1 %v372_v31  ;;  %v95_v46 = vld [vmem:[#allocation6 + $0xf0] sm:$0xff]  ;;  %v102_v48 = vld [vmem:[#allocation6 + $0x128] sm:$0xff]  ;;  %v100_v49 = vld [vmem:[#allocation6 + $0x118] sm:$0xff]  ;;  %v346_v51 = vpack.c.bf16 %v93_v43, %v89_v42 }
  0x42   :  { %v104_v50 = vld [vmem:[#allocation6 + $0x138] sm:$0xff]  ;;  %v378_v52 = vpack.c.bf16 %v95_v46, %v91_v45  ;;  %v348_v53 = vpack.c.bf16 %v102_v48, %v98_v47  ;;  %v97_v54 = vld [vmem:[#allocation6 + $0x100] sm:$0xff]  ;;  %v99_v56 = vld [vmem:[#allocation6 + $0x110] sm:$0xff] }
  0x43   :  { %343 = vmatpush1.bf16.msra.mxu0 %v342_v35  ;;  %v101_v55 = vld [vmem:[#allocation6 + $0x120] sm:$0xff]  ;;  %v380_v57 = vpack.c.bf16 %v104_v50, %v100_v49  ;;  %v103_v58 = vld [vmem:[#allocation6 + $0x130] sm:$0xff]  ;;  %v106_v59 = vld [vmem:[#allocation6 + $0x148] sm:$0xff]  ;;  %v289_v35 = vshrl.u32 %v288_v34, 7 }
  0x44   :  { %375 = vmatpush1.bf16.msra.mxu1 %v374_v39  ;;  %345 = vmatprep.subr.bf16.mxu0 %v344_v40  ;;  %v110_v60 = vld [vmem:[#allocation6 + $0x168] sm:$0xff]  ;;  %v108_v61 = vld [vmem:[#allocation6 + $0x158] sm:$0xff]  ;;  %v350_v63 = vpack.c.bf16 %v101_v55, %v97_v54  ;;  %v382_v0 = vpack.c.bf16 %v103_v58, %v99_v56  ;;  %v105_v2 = vld [vmem:[#allocation6 + $0x140] sm:$0xff] }
  0x45   :  { %377 = vmatprep.subr.bf16.mxu1 %v376_v44  ;;  %v112_v62 = vld [vmem:[#allocation6 + $0x178] sm:$0xff]  ;;  %v352_v1 = vpack.c.bf16 %v110_v60, %v106_v59  ;;  %v109_v3 = vld [vmem:[#allocation6 + $0x160] sm:$0xff]  ;;  %v107_v4 = vld [vmem:[#allocation6 + $0x150] sm:$0xff]  ;;  %v290_v36 = vsub.s32 0, %v289_v35  ;;  %v298_v38 = vsub.s32 2, %v289_v35  ;;  %v294_v39 = vsub.s32 1, %v289_v35 }
  0x46   :  { %v384_v5 = vpack.c.bf16 %v112_v62, %v108_v61  ;;  %v111_v6 = vld [vmem:[#allocation6 + $0x170] sm:$0xff]  ;;  %v114_v7 = vld [vmem:[#allocation6 + $0x188] sm:$0xff]  ;;  %v116_v9 = vld [vmem:[#allocation6 + $0x198] sm:$0xff]  ;;  %v354_v11 = vpack.c.bf16 %v109_v3, %v105_v2  ;;  %v302_v40 = vsub.s32 3, %v289_v35 }
  0x47   :  { %347 = vmatpush1.bf16.msra.mxu0 %v346_v51  ;;  %v118_v8 = vld [vmem:[#allocation6 + $0x1a8] sm:$0xff]  ;;  %v120_v10 = vld [vmem:[#allocation6 + $0x1b8] sm:$0xff]  ;;  %v386_v12 = vpack.c.bf16 %v111_v6, %v107_v4  ;;  %v113_v14 = vld [vmem:[#allocation6 + $0x180] sm:$0xff] }
  0x48   :  { %379 = vmatpush1.bf16.msra.mxu1 %v378_v52  ;;  %349 = vmatprep.subr.bf16.mxu0 %v348_v53  ;;  %v356_v13 = vpack.c.bf16 %v118_v8, %v114_v7  ;;  %v117_v15 = vld [vmem:[#allocation6 + $0x1a0] sm:$0xff]  ;;  %v115_v16 = vld [vmem:[#allocation6 + $0x190] sm:$0xff]  ;;  %v388_v17 = vpack.c.bf16 %v120_v10, %v116_v9  ;;  %v122_v19 = vld [vmem:[#allocation6 + $0x1c8] sm:$0xff] }
  0x49   :  { %381 = vmatprep.subr.bf16.mxu1 %v380_v57  ;;  %v119_v18 = vld [vmem:[#allocation6 + $0x1b0] sm:$0xff]  ;;  %v126_v20 = vld [vmem:[#allocation6 + $0x1e8] sm:$0xff]  ;;  %v124_v21 = vld [vmem:[#allocation6 + $0x1d8] sm:$0xff]  ;;  %v358_v23 = vpack.c.bf16 %v117_v15, %v113_v14 }
  0x4a   :  { %v128_v22 = vld [vmem:[#allocation6 + $0x1f8] sm:$0xff]  ;;  %v390_v24 = vpack.c.bf16 %v119_v18, %v115_v16  ;;  %v360_v25 = vpack.c.bf16 %v126_v20, %v122_v19  ;;  %v121_v26 = vld [vmem:[#allocation6 + $0x1c0] sm:$0xff]  ;;  %v123_v29 = vld [vmem:[#allocation6 + $0x1d0] sm:$0xff] }
  0x4b   :  { %351 = vmatpush1.bf16.msra.mxu0 %v350_v63  ;;  %v125_v27 = vld [vmem:[#allocation6 + $0x1e0] sm:$0xff]  ;;  %v392_v28 = vpack.c.bf16 %v128_v22, %v124_v21  ;;  %v127_v30 = vld [vmem:[#allocation6 + $0x1f0] sm:$0xff]  ;;  %v64_v33 = vld [vmem:[#allocation3] sm:$0xff] }
  0x4c   :  { %383 = vmatpush1.bf16.msra.mxu1 %v382_v0  ;;  %353 = vmatprep.subr.bf16.mxu0 %v352_v1  ;;  %v362_v31 = vpack.c.bf16 %v125_v27, %v121_v26  ;;  %v394_v32 = vpack.c.bf16 %v127_v30, %v123_v29  ;;  %v286_v37 = vld [vmem:[#allocation8] sm:$0xf] }
  0x4d   :  { %385 = vmatprep.subr.bf16.mxu1 %v384_v5  ;;  %v291_v41 = vrot.slane %v286_v37, %v290_v36  ;;  %v299_v42 = vrot.slane %v286_v37, %v298_v38  ;;  %v295_v43 = vrot.slane %v286_v37, %v294_v39  ;;  %v303_v44 = vrot.slane %v286_v37, %v302_v40 }
  0x4f   :  { %355 = vmatpush1.bf16.msra.mxu0 %v354_v11 }
  0x50   :  { %387 = vmatpush1.bf16.msra.mxu1 %v386_v12  ;;  %357 = vmatprep.subr.bf16.mxu0 %v356_v13 }
  0x51   :  { %389 = vmatprep.subr.bf16.mxu1 %v388_v17 }
  0x53   :  { %359 = vmatpush1.bf16.msra.mxu0 %v358_v23 }
  0x54   :  { %391 = vmatpush1.bf16.msra.mxu1 %v390_v24  ;;  %361 = vmatprep.subr.bf16.mxu0 %v360_v25 }
  0x55   :  { %393 = vmatprep.subr.bf16.mxu1 %v392_v28 }
  0x57   :  { %363 = vmatpush1.bf16.msra.mxu0 %v362_v31 }
  0x58   :  { %395 = vmatpush1.bf16.msra.mxu1 %v394_v32 }
  0x5a   :  { %194 = vmatmul.mubr.f32.vlgmr.msra.gmra.mrb[0].mxu0 %v64_v33 }
  0x5b   :  { %265 = vmatmul.mubr.f32.vlgmr.msra.gmra.mrb[0].mxu1 %v64_v33 }
 0x12d   :  { %v195_v45 = vpop.f32.mrb[0].mxu0 }
 0x12e   :  { %v308_v46 = vadd.f32 %v291_v41, %v195_v45  ;;  %v266_v47 = vpop.f32.mrb[0].mxu1  ;;  %v197_v48 = vpop.f32.mrb[1].mxu0 }
 0x12f   :  { %v310_v49 = vadd.f32 %v299_v42, %v266_v47  ;;  %v309_v50 = vadd.f32 %v295_v43, %v197_v48  ;;  %v268_v51 = vpop.f32.mrb[1].mxu1 }
 0x130   :  { %312 = vst [vmem:[#allocation9] sm:$0xff] %v308_v46  ;;  %v311_v52 = vadd.f32 %v303_v44, %v268_v51 }
 0x131   :  { %314 = vst [vmem:[#allocation9 + $0x10] sm:$0xff] %v310_v49  ;;  %313 = vst [vmem:[#allocation9 + $0x8] sm:$0xff] %v309_v50 }
 0x132   :  { %315 = vst [vmem:[#allocation9 + $0x18] sm:$0xff] %v311_v52 }
 0x133   :  { %480 = shalt.err (!%p477_p0)
}
 0x134   :  { %s481_s25 = scalar_lea.hbm %s575_s3, 512 }
 0x135   :  { %p482_p1 = scmp.ne.s32.totalorder %s575_s3, %s481_s25  ;;  %p485_p2 = scmp.lt.u32.totalorder %s481_s25, %s575_s3 }
 0x137   :  { %p487_p3 = pnand %p485_p2, %p482_p1 }
 0x139   :  { %490 = shalt.err (!%p487_p3)
}
 0x13a   :  { %325 = dma.vmem_to_hbm [thread:$0]  %s323_s21, 512, %s575_s3, [#allocation5]  }
 0x13b   :  { %495 = dma.done.wait [#allocation5], 512  }
 0x13c   :  { %496 = vsyncadd [#allocation5], 4294966784 }
 0x13d   :  { %329 = vsyncpa [#allocation4], 1 }
 0x13e   :  { %330 = vsyncpa [#allocation7], 1 }
 0x13f   :  { %331 = vsyncpa [#allocation5], 1 }

// kernel: net_forward.6
= control target key start
LH: loop header
LB: loop body
LE: loop exit
PB: predicated region body
PF: predicated region fallthrough
CT: control target
= control target key end

     0   :  { %9 = vsyncpa [#allocation5], 0  ;;  %s2413_s0 = inlined_call_operand.vmem [shape: f32[4,2,512], index: 0, kind: input, shape index: {}]   ;;  %s2414_s1 = inlined_call_operand.hbm [shape: f32[128,512], index: 1, kind: input, shape index: {}]   ;;  %s2415_s2 = inlined_call_operand.hbm [shape: f32[3,256,512], index: 2, kind: input, shape index: {}]   ;;  %s2416_s3 = inlined_call_operand.hbm [shape: f32[3,1,512], index: 3, kind: input, shape index: {}]   ;;  %s2417_s4 = inlined_call_operand.vmem [shape: f32[2,128], index: 4, kind: output, shape index: {}]  }
   0x1   :  { %10 = vsyncpa [#allocation7], 0  ;;  %s2255_s15 = smov 0  }
   0x2 LB: > { %s2261_s16 = sadd.s32 4294967295, %s2218_s15   ;;  %p1535_p0 = scmp.ge.s32.totalorder %s2218_s15, 1  ;;  %s2218_s15 = sphi %s2255_s15, %s16_s15  }
   0x3   : > { %p131_p1 = scmp.lt.s32.totalorder %s2218_s15, 5  ;;  %p2032_p3 = scmp.eq.s32.totalorder %s2261_s16, 0 }
   0x4   : > { %s2220_s18 = smov [#allocation6]   ;;  %s2221_s20 = smov [#allocation4]  }
   0x5   : > { %p2267_p4 = pnand %p1535_p0, %p131_p1  ;;  %s156_s19 = sshll.u32 %s2220_s18, 4  ;;  %s2271_s19 = int_to_ptr.vmem [resolvable:$true] %s156_s19 }
   0x6   : > { %s143_s21 = sshll.u32 %s2221_s20, 4  ;;  %s2222_s23 = smov [#allocation8]   ;;  %s2275_s21 = int_to_ptr.vmem [resolvable:$true] %s143_s21 }
   0x7   : > { %p2022_p5 = pneg %p2267_p4  ;;  %s169_s24 = sshll.u32 %s2222_s23, 4  ;;  %s2283_s24 = int_to_ptr.vmem [resolvable:$true] %s169_s24 }
   0x8   : > { %s2120_s27 = scalar_lea.hbm %s2415_s2, 49152 }
   0x9   : > { %p2279_p6 = pnand %p2032_p3, %p2022_p5  ;;  %p2121_p7 = scmp.ne.s32.totalorder %s2415_s2, %s2120_s27 }
   0xa   : > { %p2127_p11 = scmp.lt.u32.totalorder %s2120_s27, %s2415_s2 }
   0xb   : > { %p2293_p8 = pneg %p2279_p6 }
   0xd   : > { %p2123_p9 = pnand %p2293_p8, %p2121_p7 }
   0xf   : > { %p2124_p10 = pneg %p2123_p9 }
  0x11   : > { %p2129_p12 = pnand %p2127_p11, %p2124_p10 }
  0x13   : > { %2132 = shalt.err (!%p2129_p12)
}
  0x14   : > { %s2133_s7 = scalar_lea.vmem %s2271_s19, 49152  ;;  %p2141_p5 = scmp.lt.s32.totalorder %s2271_s19, %s2271_s19 }
  0x15   : > { %p2134_p13 = scmp.ne.s32.totalorder %s2271_s19, %s2133_s7  ;;  %p2142_p2 = scmp.lt.s32.totalorder %s2133_s7, %s2133_s7 }
  0x17   : > { %p2136_p0 = pnand %p2134_p13, %p2293_p8  ;;  %p2143_p7 = por %p2142_p2, %p2141_p5 }
  0x19   : > { %p2137_p1 = pneg %p2136_p0 }
  0x1b   : > { %p2144_p9 = pnand %p2143_p7, %p2137_p1 }
  0x1d   : > { %2147 = shalt.err (!%p2144_p9)
}
  0x1e   : > { %s2223_s8 = smov 512   ;;  %s2224_s9 = smov 32  }
  0x1f   : > { %2028 = dma.hbm_to_vmem [thread:$0]  (!%p2279_p6), %s2415_s2, 49152, %s2271_s19, [#allocation7], %s2223_s8, %s2223_s8, %s2224_s9  }
  0x20   : > { %s2148_s14 = scalar_lea.hbm %s2414_s1, 8192 }
  0x21   : > { %p2149_p2 = scmp.ne.s32.totalorder %s2414_s1, %s2148_s14  ;;  %p2155_p12 = scmp.lt.u32.totalorder %s2148_s14, %s2414_s1 }
  0x23   : > { %p2151_p10 = pnand %p2149_p2, %p2293_p8 }
  0x25   : > { %p2152_p11 = pneg %p2151_p10 }
  0x27   : > { %p2157_p13 = pnand %p2155_p12, %p2152_p11 }
  0x29   : > { %2160 = shalt.err (!%p2157_p13)
}
  0x2a   : > { %s2161_s19 = scalar_lea.vmem %s2275_s21, 8192  ;;  %p2169_p7 = scmp.lt.s32.totalorder %s2275_s21, %s2275_s21 }
  0x2b   : > { %p2162_p0 = scmp.ne.s32.totalorder %s2275_s21, %s2161_s19  ;;  %p2170_p9 = scmp.lt.s32.totalorder %s2161_s19, %s2161_s19 }
  0x2d   : > { %p2164_p1 = pnand %p2162_p0, %p2293_p8  ;;  %p2171_p2 = por %p2170_p9, %p2169_p7 }
  0x2f   : > { %p2165_p5 = pneg %p2164_p1 }
  0x31   : > { %p2172_p10 = pnand %p2171_p2, %p2165_p5 }
  0x33   : > { %2175 = shalt.err (!%p2172_p10)
}
  0x34   : > { %2025 = dma.hbm_to_vmem [thread:$0]  (!%p2279_p6), %s2414_s1, 8192, %s2275_s21, [#allocation5], %s2223_s8, %s2223_s8, %s2224_s9  }
  0x35   : > { %s2176_s5 = scalar_lea.hbm %s2416_s3, 192 }
  0x36   : > { %p2177_p11 = scmp.ne.s32.totalorder %s2416_s3, %s2176_s5  ;;  %p2183_p0 = scmp.lt.u32.totalorder %s2176_s5, %s2416_s3 }
  0x38   : > { %p2179_p12 = pnand %p2177_p11, %p2293_p8 }
  0x3a   : > { %p2180_p13 = pneg %p2179_p12 }
  0x3c   : > { %p2185_p1 = pnand %p2183_p0, %p2180_p13 }
  0x3e   : > { %2188 = shalt.err (!%p2185_p1)
}
  0x3f   : > { %s2189_s21 = scalar_lea.vmem %s2283_s24, 192  ;;  %p2197_p2 = scmp.lt.s32.totalorder %s2283_s24, %s2283_s24 }
  0x40   : > { %p2190_p5 = scmp.ne.s32.totalorder %s2283_s24, %s2189_s21  ;;  %p2198_p10 = scmp.lt.s32.totalorder %s2189_s21, %s2189_s21 }
  0x42   : > { %p2192_p7 = pnand %p2190_p5, %p2293_p8  ;;  %p2199_p11 = por %p2198_p10, %p2197_p2 }
  0x44   : > { %p2193_p9 = pneg %p2192_p7 }
  0x46   : > { %p2200_p12 = pnand %p2199_p11, %p2193_p9 }
  0x48   : > { %2203 = shalt.err (!%p2200_p12)
}
  0x49   : > { %s2225_s8 = smov 64   ;;  %s2226_s9 = smov 4  }
  0x4a   : > { %2031 = dma.hbm_to_vmem [thread:$0]  (!%p2279_p6), %s2416_s3, 192, %s2283_s24, [#allocation7], %s2225_s8, %s2225_s8, %s2226_s9  }
  0x4b   : > { %193 = sbr.rel (%p2267_p4) target bundleno = 1173 (0x495), region = 36 }
  0x52   : > { %2209 = dma.done.wait (%p2032_p3), [#allocation5], 8192  }
  0x53   : > { %2211 = vsyncadd (%p2032_p3), [#allocation5], 4294959104 }
  0x54   : > { %2213 = dma.done.wait (%p2032_p3), [#allocation7], 49344  }
  0x55   : > { %2215 = vsyncadd (%p2032_p3), [#allocation7], 4294917952  ;;  %p222_p8 = scmp.lt.s32.totalorder %s2261_s16, 3  ;;  %p2421_p4 = scmp.ne.s32.totalorder %s2261_s16, 0 }
  0x56   : > { %v2227_v0 = vmov (!%p2421_p4), 0.0  }
  0x57   : > { %s223_s22 = scalar_select %p222_p8, %s2261_s16, 3 }
  0x58   : > { %230 = sbr.rel (%p2421_p4) target bundleno = 95 (0x5f), region = 52  ;;  %231 = vst [vmem:[#allocation2] sm:$0x3] (!%p2421_p4), %v2227_v0  ;;  %232 = vst [vmem:[#allocation2 + $0x2] sm:$0x3] (!%p2421_p4), %v2227_v0 }
  0x59   : > { %s1561_s24 = sshll.u32 %s223_s22, 3  ;;  %233 = vst [vmem:[#allocation2 + $0x4] sm:$0x3] (!%p2421_p4), %v2227_v0  ;;  %234 = vst [vmem:[#allocation2 + $0x6] sm:$0x3] (!%p2421_p4), %v2227_v0 }
  0x5a   : > { %s2375_s14 = scalar_lea.vmem %s2413_s0, %s1561_s24  ;;  %235 = vst [vmem:[#allocation3] sm:$0x3] (!%p2421_p4), %v2227_v0  ;;  %236 = vst [vmem:[#allocation3 + $0x2] sm:$0x3] (!%p2421_p4), %v2227_v0 }
  0x5b   : > { %237 = vst [vmem:[#allocation3 + $0x4] sm:$0x3] (!%p2421_p4), %v2227_v0  ;;  %238 = vst [vmem:[#allocation3 + $0x6] sm:$0x3] (!%p2421_p4), %v2227_v0 }
  0x5f PF: > { %v242_v1 = vld [vmem:[#allocation4 + $0x8] sm:$0xff]  ;;  %v244_v3 = vld [vmem:[#allocation4 + $0x18] sm:$0xff]  ;;  %v241_v6 = vld [vmem:[#allocation4] sm:$0xff]  ;;  %v2228_v8 = vmov 0.0  }
  0x60   : > { %v246_v2 = vld [vmem:[#allocation4 + $0x28] sm:$0xff]  ;;  %v248_v5 = vld [vmem:[#allocation4 + $0x38] sm:$0xff]  ;;  %v245_v7 = vld [vmem:[#allocation4 + $0x20] sm:$0xff]  ;;  %369 = vmatprep.mubr.f32.mxu0 %v2228_v8  ;;  %440 = vmatprep.mubr.f32.mxu1 %v2228_v8 }
  0x61   : > { %v1562_v4 = vpack.c.bf16 %v246_v2, %v242_v1  ;;  %v1594_v9 = vpack.c.bf16 %v248_v5, %v244_v3  ;;  %v1564_v10 = vpack.c.bf16 %v245_v7, %v241_v6  ;;  %v243_v11 = vld [vmem:[#allocation4 + $0x10] sm:$0xff]  ;;  %v250_v13 = vld [vmem:[#allocation4 + $0x48] sm:$0xff]  ;;  %v252_v16 = vld [vmem:[#allocation4 + $0x58] sm:$0xff] }
  0x62   : > { %v247_v12 = vld [vmem:[#allocation4 + $0x30] sm:$0xff]  ;;  %v254_v15 = vld [vmem:[#allocation4 + $0x68] sm:$0xff]  ;;  %v256_v17 = vld [vmem:[#allocation4 + $0x78] sm:$0xff] }
  0x63   : > { %1563 = vmatprep.subr.bf16.mxu0 %v1562_v4  ;;  %v1596_v14 = vpack.c.bf16 %v247_v12, %v243_v11  ;;  %1595 = vmatprep.subr.bf16.mxu1 %v1594_v9  ;;  %v1566_v18 = vpack.c.bf16 %v254_v15, %v250_v13  ;;  %v1598_v19 = vpack.c.bf16 %v256_v17, %v252_v16  ;;  %v249_v20 = vld [vmem:[#allocation4 + $0x40] sm:$0xff]  ;;  %v251_v22 = vld [vmem:[#allocation4 + $0x50] sm:$0xff]  ;;  %v258_v25 = vld [vmem:[#allocation4 + $0x88] sm:$0xff] }
  0x64   : > { %1565 = vmatpush1.bf16.msra.mxu0 %v1564_v10  ;;  %v253_v21 = vld [vmem:[#allocation4 + $0x60] sm:$0xff]  ;;  %v255_v24 = vld [vmem:[#allocation4 + $0x70] sm:$0xff]  ;;  %v262_v26 = vld [vmem:[#allocation4 + $0xa8] sm:$0xff] }
  0x65   : > { %1597 = vmatpush1.bf16.msra.mxu1 %v1596_v14  ;;  %v1568_v23 = vpack.c.bf16 %v253_v21, %v249_v20  ;;  %1567 = vmatprep.subr.bf16.mxu0 %v1566_v18  ;;  %v1600_v27 = vpack.c.bf16 %v255_v24, %v251_v22  ;;  %v1570_v28 = vpack.c.bf16 %v262_v26, %v258_v25  ;;  %v260_v29 = vld [vmem:[#allocation4 + $0x98] sm:$0xff]  ;;  %v257_v31 = vld [vmem:[#allocation4 + $0x80] sm:$0xff]  ;;  %v259_v34 = vld [vmem:[#allocation4 + $0x90] sm:$0xff] }
  0x66   : > { %1599 = vmatprep.subr.bf16.mxu1 %v1598_v19  ;;  %v264_v30 = vld [vmem:[#allocation4 + $0xb8] sm:$0xff]  ;;  %v261_v33 = vld [vmem:[#allocation4 + $0xa0] sm:$0xff]  ;;  %v263_v35 = vld [vmem:[#allocation4 + $0xb0] sm:$0xff] }
  0x67   : > { %v1602_v32 = vpack.c.bf16 %v264_v30, %v260_v29  ;;  %v1572_v36 = vpack.c.bf16 %v261_v33, %v257_v31  ;;  %v266_v37 = vld [vmem:[#allocation4 + $0xc8] sm:$0xff]  ;;  %v268_v39 = vld [vmem:[#allocation4 + $0xd8] sm:$0xff]  ;;  %v1604_v40 = vpack.c.bf16 %v263_v35, %v259_v34  ;;  %v265_v43 = vld [vmem:[#allocation4 + $0xc0] sm:$0xff] }
  0x68   : > { %1569 = vmatpush1.bf16.msra.mxu0 %v1568_v23  ;;  %v270_v38 = vld [vmem:[#allocation4 + $0xe8] sm:$0xff]  ;;  %v272_v42 = vld [vmem:[#allocation4 + $0xf8] sm:$0xff]  ;;  %v269_v44 = vld [vmem:[#allocation4 + $0xe0] sm:$0xff] }
  0x69   : > { %1601 = vmatpush1.bf16.msra.mxu1 %v1600_v27  ;;  %1571 = vmatprep.subr.bf16.mxu0 %v1570_v28  ;;  %v1574_v41 = vpack.c.bf16 %v270_v38, %v266_v37  ;;  %v1606_v45 = vpack.c.bf16 %v272_v42, %v268_v39  ;;  %v267_v46 = vld [vmem:[#allocation4 + $0xd0] sm:$0xff]  ;;  %v274_v48 = vld [vmem:[#allocation4 + $0x108] sm:$0xff]  ;;  %v276_v50 = vld [vmem:[#allocation4 + $0x118] sm:$0xff]  ;;  %v1576_v52 = vpack.c.bf16 %v269_v44, %v265_v43 }
  0x6a   : > { %1603 = vmatprep.subr.bf16.mxu1 %v1602_v32  ;;  %v271_v47 = vld [vmem:[#allocation4 + $0xf0] sm:$0xff]  ;;  %v278_v49 = vld [vmem:[#allocation4 + $0x128] sm:$0xff]  ;;  %v280_v51 = vld [vmem:[#allocation4 + $0x138] sm:$0xff] }
  0x6b   : > { %v1608_v53 = vpack.c.bf16 %v271_v47, %v267_v46  ;;  %v1578_v54 = vpack.c.bf16 %v278_v49, %v274_v48  ;;  %v273_v55 = vld [vmem:[#allocation4 + $0x100] sm:$0xff]  ;;  %v275_v57 = vld [vmem:[#allocation4 + $0x110] sm:$0xff]  ;;  %v1610_v58 = vpack.c.bf16 %v280_v51, %v276_v50  ;;  %v282_v60 = vld [vmem:[#allocation4 + $0x148] sm:$0xff] }
  0x6c   : > { %1573 = vmatpush1.bf16.msra.mxu0 %v1572_v36  ;;  %v277_v56 = vld [vmem:[#allocation4 + $0x120] sm:$0xff]  ;;  %v279_v59 = vld [vmem:[#allocation4 + $0x130] sm:$0xff]  ;;  %v286_v61 = vld [vmem:[#allocation4 + $0x168] sm:$0xff] }
  0x6d   : > { %1605 = vmatpush1.bf16.msra.mxu1 %v1604_v40  ;;  %1575 = vmatprep.subr.bf16.mxu0 %v1574_v41  ;;  %v284_v62 = vld [vmem:[#allocation4 + $0x158] sm:$0xff]  ;;  %v1580_v0 = vpack.c.bf16 %v277_v56, %v273_v55  ;;  %v1612_v1 = vpack.c.bf16 %v279_v59, %v275_v57  ;;  %v1582_v2 = vpack.c.bf16 %v286_v61, %v282_v60  ;;  %v281_v3 = vld [vmem:[#allocation4 + $0x140] sm:$0xff]  ;;  %v283_v5 = vld [vmem:[#allocation4 + $0x150] sm:$0xff] }
  0x6e   : > { %1607 = vmatprep.subr.bf16.mxu1 %v1606_v45  ;;  %v288_v63 = vld [vmem:[#allocation4 + $0x178] sm:$0xff]  ;;  %v285_v4 = vld [vmem:[#allocation4 + $0x160] sm:$0xff]  ;;  %v287_v7 = vld [vmem:[#allocation4 + $0x170] sm:$0xff] }
  0x6f   : > { %v1614_v6 = vpack.c.bf16 %v288_v63, %v284_v62  ;;  %v290_v8 = vld [vmem:[#allocation4 + $0x188] sm:$0xff]  ;;  %v292_v10 = vld [vmem:[#allocation4 + $0x198] sm:$0xff]  ;;  %v1584_v12 = vpack.c.bf16 %v285_v4, %v281_v3  ;;  %v1616_v13 = vpack.c.bf16 %v287_v7, %v283_v5  ;;  %v289_v15 = vld [vmem:[#allocation4 + $0x180] sm:$0xff] }
  0x70   : > { %1577 = vmatpush1.bf16.msra.mxu0 %v1576_v52  ;;  %v294_v9 = vld [vmem:[#allocation4 + $0x1a8] sm:$0xff]  ;;  %v296_v11 = vld [vmem:[#allocation4 + $0x1b8] sm:$0xff]  ;;  %v293_v16 = vld [vmem:[#allocation4 + $0x1a0] sm:$0xff] }
  0x71   : > { %1609 = vmatpush1.bf16.msra.mxu1 %v1608_v53  ;;  %1579 = vmatprep.subr.bf16.mxu0 %v1578_v54  ;;  %v1586_v14 = vpack.c.bf16 %v294_v9, %v290_v8  ;;  %v291_v17 = vld [vmem:[#allocation4 + $0x190] sm:$0xff]  ;;  %v1618_v18 = vpack.c.bf16 %v296_v11, %v292_v10  ;;  %v298_v20 = vld [vmem:[#allocation4 + $0x1c8] sm:$0xff]  ;;  %v300_v22 = vld [vmem:[#allocation4 + $0x1d8] sm:$0xff]  ;;  %v1588_v24 = vpack.c.bf16 %v293_v16, %v289_v15 }
  0x72   : > { %1611 = vmatprep.subr.bf16.mxu1 %v1610_v58  ;;  %v295_v19 = vld [vmem:[#allocation4 + $0x1b0] sm:$0xff]  ;;  %v302_v21 = vld [vmem:[#allocation4 + $0x1e8] sm:$0xff]  ;;  %v304_v23 = vld [vmem:[#allocation4 + $0x1f8] sm:$0xff] }
  0x73   : > { %v1620_v25 = vpack.c.bf16 %v295_v19, %v291_v17  ;;  %v1590_v26 = vpack.c.bf16 %v302_v21, %v298_v20  ;;  %v297_v27 = vld [vmem:[#allocation4 + $0x1c0] sm:$0xff]  ;;  %v299_v29 = vld [vmem:[#allocation4 + $0x1d0] sm:$0xff]  ;;  %v1622_v30 = vpack.c.bf16 %v304_v23, %v300_v22  ;;  %v507_v32 = vld [vmem:[#allocation6 + $0x8] sm:$0xff] }
  0x74   : > { %1581 = vmatpush1.bf16.msra.mxu0 %v1580_v0  ;;  %v301_v28 = vld [vmem:[#allocation4 + $0x1e0] sm:$0xff]  ;;  %v303_v31 = vld [vmem:[#allocation4 + $0x1f0] sm:$0xff]  ;;  %v511_v33 = vld [vmem:[#allocation6 + $0x28] sm:$0xff] }
  0x75   : > { %1613 = vmatpush1.bf16.msra.mxu1 %v1612_v1  ;;  %1583 = vmatprep.subr.bf16.mxu0 %v1582_v2  ;;  %v509_v34 = vld [vmem:[#allocation6 + $0x18] sm:$0xff]  ;;  %v1592_v36 = vpack.c.bf16 %v301_v28, %v297_v27  ;;  %v1624_v37 = vpack.c.bf16 %v303_v31, %v299_v29  ;;  %v1626_v38 = vpack.c.bf16 %v511_v33, %v507_v32  ;;  %v506_v39 = vld [vmem:[#allocation6] sm:$0xff]  ;;  %v508_v41 = vld [vmem:[#allocation6 + $0x10] sm:$0xff] }
  0x76   : > { %1615 = vmatprep.subr.bf16.mxu1 %v1614_v6  ;;  %v513_v35 = vld [vmem:[#allocation6 + $0x38] sm:$0xff]  ;;  %v510_v40 = vld [vmem:[#allocation6 + $0x20] sm:$0xff]  ;;  %v512_v43 = vld [vmem:[#allocation6 + $0x30] sm:$0xff] }
  0x77   : > { %v1690_v42 = vpack.c.bf16 %v513_v35, %v509_v34  ;;  %v515_v44 = vld [vmem:[#allocation6 + $0x48] sm:$0xff]  ;;  %v517_v46 = vld [vmem:[#allocation6 + $0x58] sm:$0xff]  ;;  %v240_v48 = vld [vmem:[#allocation2] sm:$0x3]  ;;  %v1628_v49 = vpack.c.bf16 %v510_v40, %v506_v39  ;;  %v1692_v50 = vpack.c.bf16 %v512_v43, %v508_v41 }
  0x78   : > { %1585 = vmatpush1.bf16.msra.mxu0 %v1584_v12  ;;  %v519_v45 = vld [vmem:[#allocation6 + $0x68] sm:$0xff]  ;;  %v521_v47 = vld [vmem:[#allocation6 + $0x78] sm:$0xff]  ;;  %v514_v52 = vld [vmem:[#allocation6 + $0x40] sm:$0xff] }
  0x79   : > { %1617 = vmatpush1.bf16.msra.mxu1 %v1616_v13  ;;  %1587 = vmatprep.subr.bf16.mxu0 %v1586_v14  ;;  %v1630_v51 = vpack.c.bf16 %v519_v45, %v515_v44  ;;  %v518_v53 = vld [vmem:[#allocation6 + $0x60] sm:$0xff]  ;;  %v516_v54 = vld [vmem:[#allocation6 + $0x50] sm:$0xff]  ;;  %v1694_v55 = vpack.c.bf16 %v521_v47, %v517_v46  ;;  %v523_v57 = vld [vmem:[#allocation6 + $0x88] sm:$0xff] }
  0x7a   : > { %1619 = vmatprep.subr.bf16.mxu1 %v1618_v18  ;;  %v520_v56 = vld [vmem:[#allocation6 + $0x70] sm:$0xff]  ;;  %v527_v58 = vld [vmem:[#allocation6 + $0xa8] sm:$0xff]  ;;  %v525_v59 = vld [vmem:[#allocation6 + $0x98] sm:$0xff]  ;;  %v1632_v61 = vpack.c.bf16 %v518_v53, %v514_v52 }
  0x7b   : > { %v529_v60 = vld [vmem:[#allocation6 + $0xb8] sm:$0xff]  ;;  %v1696_v62 = vpack.c.bf16 %v520_v56, %v516_v54  ;;  %v1634_v63 = vpack.c.bf16 %v527_v58, %v523_v57  ;;  %v522_v1 = vld [vmem:[#allocation6 + $0x80] sm:$0xff]  ;;  %v524_v3 = vld [vmem:[#allocation6 + $0x90] sm:$0xff] }
  0x7c   : > { %1589 = vmatpush1.bf16.msra.mxu0 %v1588_v24  ;;  %v1698_v0 = vpack.c.bf16 %v529_v60, %v525_v59  ;;  %v526_v2 = vld [vmem:[#allocation6 + $0xa0] sm:$0xff]  ;;  %v528_v5 = vld [vmem:[#allocation6 + $0xb0] sm:$0xff]  ;;  %v531_v7 = vld [vmem:[#allocation6 + $0xc8] sm:$0xff] }
  0x7d   : > { %1621 = vmatpush1.bf16.msra.mxu1 %v1620_v25  ;;  %1591 = vmatprep.subr.bf16.mxu0 %v1590_v26  ;;  %v1636_v4 = vpack.c.bf16 %v526_v2, %v522_v1  ;;  %v1700_v6 = vpack.c.bf16 %v528_v5, %v524_v3  ;;  %v535_v8 = vld [vmem:[#allocation6 + $0xe8] sm:$0xff]  ;;  %v533_v9 = vld [vmem:[#allocation6 + $0xd8] sm:$0xff]  ;;  %v530_v12 = vld [vmem:[#allocation6 + $0xc0] sm:$0xff] }
  0x7e   : > { %1623 = vmatprep.subr.bf16.mxu1 %v1622_v30  ;;  %v1638_v10 = vpack.c.bf16 %v535_v8, %v531_v7  ;;  %v537_v11 = vld [vmem:[#allocation6 + $0xf8] sm:$0xff]  ;;  %v534_v13 = vld [vmem:[#allocation6 + $0xe0] sm:$0xff]  ;;  %v532_v16 = vld [vmem:[#allocation6 + $0xd0] sm:$0xff] }
  0x7f   : > { %v1702_v14 = vpack.c.bf16 %v537_v11, %v533_v9  ;;  %v1640_v15 = vpack.c.bf16 %v534_v13, %v530_v12  ;;  %v536_v17 = vld [vmem:[#allocation6 + $0xf0] sm:$0xff]  ;;  %v539_v19 = vld [vmem:[#allocation6 + $0x108] sm:$0xff]  ;;  %v541_v21 = vld [vmem:[#allocation6 + $0x118] sm:$0xff] }
  0x80   : > { %1593 = vmatpush1.bf16.msra.mxu0 %v1592_v36  ;;  %v1704_v18 = vpack.c.bf16 %v536_v17, %v532_v16  ;;  %v543_v20 = vld [vmem:[#allocation6 + $0x128] sm:$0xff]  ;;  %v545_v23 = vld [vmem:[#allocation6 + $0x138] sm:$0xff]  ;;  %v538_v24 = vld [vmem:[#allocation6 + $0x100] sm:$0xff] }
  0x81   : > { %1625 = vmatpush1.bf16.msra.mxu1 %v1624_v37  ;;  %1627 = vmatprep.subr.bf16.mxu0 %v1626_v38  ;;  %v1642_v22 = vpack.c.bf16 %v543_v20, %v539_v19  ;;  %v542_v25 = vld [vmem:[#allocation6 + $0x120] sm:$0xff]  ;;  %v1706_v26 = vpack.c.bf16 %v545_v23, %v541_v21  ;;  %v540_v28 = vld [vmem:[#allocation6 + $0x110] sm:$0xff]  ;;  %v547_v31 = vld [vmem:[#allocation6 + $0x148] sm:$0xff] }
  0x82   : > { %1691 = vmatprep.subr.bf16.mxu1 %v1690_v42  ;;  %v1644_v27 = vpack.c.bf16 %v542_v25, %v538_v24  ;;  %v544_v29 = vld [vmem:[#allocation6 + $0x130] sm:$0xff]  ;;  %v551_v32 = vld [vmem:[#allocation6 + $0x168] sm:$0xff]  ;;  %v549_v33 = vld [vmem:[#allocation6 + $0x158] sm:$0xff] }
  0x83   : > { %370 = vmatmul.mubr.f32.vlgmr.msra.gmra.mrb[0].mxu0 %v240_v48  ;;  %v1708_v30 = vpack.c.bf16 %v544_v29, %v540_v28  ;;  %v1646_v34 = vpack.c.bf16 %v551_v32, %v547_v31  ;;  %v553_v35 = vld [vmem:[#allocation6 + $0x178] sm:$0xff]  ;;  %v546_v36 = vld [vmem:[#allocation6 + $0x140] sm:$0xff]  ;;  %v548_v40 = vld [vmem:[#allocation6 + $0x150] sm:$0xff] }
  0x84   : > { %441 = vmatmul.mubr.f32.vlgmr.msra.gmra.mrb[0].mxu1 %v240_v48  ;;  %1629 = vmatpush1.bf16.msra.mxu0 %v1628_v49  ;;  %v550_v37 = vld [vmem:[#allocation6 + $0x160] sm:$0xff]  ;;  %v1710_v38 = vpack.c.bf16 %v553_v35, %v549_v33  ;;  %v552_v41 = vld [vmem:[#allocation6 + $0x170] sm:$0xff]  ;;  %v555_v43 = vld [vmem:[#allocation6 + $0x188] sm:$0xff] }
  0x85   : > { %1693 = vmatpush1.bf16.msra.mxu1 %v1692_v50  ;;  %1631 = vmatprep.subr.bf16.mxu0 %v1630_v51  ;;  %v1648_v39 = vpack.c.bf16 %v550_v37, %v546_v36  ;;  %v1712_v42 = vpack.c.bf16 %v552_v41, %v548_v40  ;;  %v559_v44 = vld [vmem:[#allocation6 + $0x1a8] sm:$0xff]  ;;  %v557_v45 = vld [vmem:[#allocation6 + $0x198] sm:$0xff]  ;;  %v554_v48 = vld [vmem:[#allocation6 + $0x180] sm:$0xff] }
  0x86   : > { %1695 = vmatprep.subr.bf16.mxu1 %v1694_v55  ;;  %v1650_v46 = vpack.c.bf16 %v559_v44, %v555_v43  ;;  %v561_v47 = vld [vmem:[#allocation6 + $0x1b8] sm:$0xff]  ;;  %v558_v49 = vld [vmem:[#allocation6 + $0x1a0] sm:$0xff]  ;;  %v556_v52 = vld [vmem:[#allocation6 + $0x190] sm:$0xff] }
  0x87   : > { %v1714_v50 = vpack.c.bf16 %v561_v47, %v557_v45  ;;  %v1652_v51 = vpack.c.bf16 %v558_v49, %v554_v48  ;;  %v560_v53 = vld [vmem:[#allocation6 + $0x1b0] sm:$0xff]  ;;  %v563_v55 = vld [vmem:[#allocation6 + $0x1c8] sm:$0xff]  ;;  %v565_v57 = vld [vmem:[#allocation6 + $0x1d8] sm:$0xff] }
  0x88   : > { %1633 = vmatpush1.bf16.msra.mxu0 %v1632_v61  ;;  %v1716_v54 = vpack.c.bf16 %v560_v53, %v556_v52  ;;  %v567_v56 = vld [vmem:[#allocation6 + $0x1e8] sm:$0xff]  ;;  %v569_v59 = vld [vmem:[#allocation6 + $0x1f8] sm:$0xff]  ;;  %v562_v60 = vld [vmem:[#allocation6 + $0x1c0] sm:$0xff] }
  0x89   : > { %1697 = vmatpush1.bf16.msra.mxu1 %v1696_v62  ;;  %1635 = vmatprep.subr.bf16.mxu0 %v1634_v63  ;;  %v1654_v58 = vpack.c.bf16 %v567_v56, %v563_v55  ;;  %v566_v61 = vld [vmem:[#allocation6 + $0x1e0] sm:$0xff]  ;;  %v1718_v62 = vpack.c.bf16 %v569_v59, %v565_v57  ;;  %v568_v1 = vld [vmem:[#allocation6 + $0x1f0] sm:$0xff]  ;;  %v571_v3 = vld [vmem:[#allocation6 + $0x208] sm:$0xff] }
  0x8a   : > { %1699 = vmatprep.subr.bf16.mxu1 %v1698_v0  ;;  %v1656_v63 = vpack.c.bf16 %v566_v61, %v562_v60  ;;  %v564_v0 = vld [vmem:[#allocation6 + $0x1d0] sm:$0xff]  ;;  %v573_v5 = vld [vmem:[#allocation6 + $0x218] sm:$0xff]  ;;  %v570_v8 = vld [vmem:[#allocation6 + $0x200] sm:$0xff] }
  0x8b   : > { %v1720_v2 = vpack.c.bf16 %v568_v1, %v564_v0  ;;  %v577_v7 = vld [vmem:[#allocation6 + $0x238] sm:$0xff]  ;;  %v574_v9 = vld [vmem:[#allocation6 + $0x220] sm:$0xff]  ;;  %v572_v12 = vld [vmem:[#allocation6 + $0x210] sm:$0xff] }
  0x8c   : > { %1637 = vmatpush1.bf16.msra.mxu0 %v1636_v4  ;;  %v575_v4 = vld [vmem:[#allocation6 + $0x228] sm:$0xff]  ;;  %v1660_v11 = vpack.c.bf16 %v574_v9, %v570_v8  ;;  %v576_v13 = vld [vmem:[#allocation6 + $0x230] sm:$0xff]  ;;  %v581_v17 = vld [vmem:[#allocation6 + $0x258] sm:$0xff] }
  0x8d   : > { %1701 = vmatpush1.bf16.msra.mxu1 %v1700_v6  ;;  %1639 = vmatprep.subr.bf16.mxu0 %v1638_v10  ;;  %v1658_v6 = vpack.c.bf16 %v575_v4, %v571_v3  ;;  %v1722_v10 = vpack.c.bf16 %v577_v7, %v573_v5  ;;  %v583_v16 = vld [vmem:[#allocation6 + $0x268] sm:$0xff]  ;;  %v585_v19 = vld [vmem:[#allocation6 + $0x278] sm:$0xff]  ;;  %v578_v20 = vld [vmem:[#allocation6 + $0x240] sm:$0xff] }
  0x8e   : > { %1703 = vmatprep.subr.bf16.mxu1 %v1702_v14  ;;  %v1724_v14 = vpack.c.bf16 %v576_v13, %v572_v12  ;;  %v582_v21 = vld [vmem:[#allocation6 + $0x260] sm:$0xff]  ;;  %v580_v24 = vld [vmem:[#allocation6 + $0x250] sm:$0xff]  ;;  %v591_v28 = vld [vmem:[#allocation6 + $0x2a8] sm:$0xff] }
  0x8f   : > { %v1664_v23 = vpack.c.bf16 %v582_v21, %v578_v20  ;;  %v584_v25 = vld [vmem:[#allocation6 + $0x270] sm:$0xff]  ;;  %v589_v29 = vld [vmem:[#allocation6 + $0x298] sm:$0xff]  ;;  %v586_v33 = vld [vmem:[#allocation6 + $0x280] sm:$0xff] }
  0x90   : > { %1641 = vmatpush1.bf16.msra.mxu0 %v1640_v15  ;;  %v579_v15 = vld [vmem:[#allocation6 + $0x248] sm:$0xff]  ;;  %v588_v35 = vld [vmem:[#allocation6 + $0x290] sm:$0xff]  ;;  %v601_v43 = vld [vmem:[#allocation6 + $0x2f8] sm:$0xff] }
  0x91   : > { %1705 = vmatpush1.bf16.msra.mxu1 %v1704_v18  ;;  %1643 = vmatprep.subr.bf16.mxu0 %v1642_v22  ;;  %v1662_v18 = vpack.c.bf16 %v583_v16, %v579_v15  ;;  %v1726_v22 = vpack.c.bf16 %v585_v19, %v581_v17  ;;  %v592_v37 = vld [vmem:[#allocation6 + $0x2b0] sm:$0xff]  ;;  %v594_v44 = vld [vmem:[#allocation6 + $0x2c0] sm:$0xff]  ;;  %v605_v52 = vld [vmem:[#allocation6 + $0x318] sm:$0xff] }
  0x92   : > { %1707 = vmatprep.subr.bf16.mxu1 %v1706_v26  ;;  %v587_v26 = vld [vmem:[#allocation6 + $0x288] sm:$0xff]  ;;  %v1732_v40 = vpack.c.bf16 %v592_v37, %v588_v35  ;;  %v596_v47 = vld [vmem:[#allocation6 + $0x2d0] sm:$0xff]  ;;  %v609_v55 = vld [vmem:[#allocation6 + $0x338] sm:$0xff] }
  0x93   : > { %v1666_v31 = vpack.c.bf16 %v591_v28, %v587_v26  ;;  %v600_v48 = vld [vmem:[#allocation6 + $0x2f0] sm:$0xff]  ;;  %v602_v56 = vld [vmem:[#allocation6 + $0x300] sm:$0xff]  ;;  %v611_v61 = vld [vmem:[#allocation6 + $0x348] sm:$0xff] }
  0x94   : > { %1645 = vmatpush1.bf16.msra.mxu0 %v1644_v27  ;;  %v1728_v27 = vpack.c.bf16 %v584_v25, %v580_v24  ;;  %v1736_v53 = vpack.c.bf16 %v600_v48, %v596_v47  ;;  %v606_v57 = vld [vmem:[#allocation6 + $0x320] sm:$0xff]  ;;  %v604_v59 = vld [vmem:[#allocation6 + $0x310] sm:$0xff]  ;;  %v617_v0 = vld [vmem:[#allocation6 + $0x378] sm:$0xff] }
  0x95   : > { %1709 = vmatpush1.bf16.msra.mxu1 %v1708_v30  ;;  %1647 = vmatprep.subr.bf16.mxu0 %v1646_v34  ;;  %v593_v30 = vld [vmem:[#allocation6 + $0x2b8] sm:$0xff]  ;;  %v590_v34 = vld [vmem:[#allocation6 + $0x2a0] sm:$0xff]  ;;  %v608_v60 = vld [vmem:[#allocation6 + $0x330] sm:$0xff]  ;;  %v1676_v1 = vpack.c.bf16 %v606_v57, %v602_v56 }
  0x96   : > { %1711 = vmatprep.subr.bf16.mxu1 %v1710_v38  ;;  %v1730_v32 = vpack.c.bf16 %v593_v30, %v589_v29  ;;  %v1668_v36 = vpack.c.bf16 %v590_v34, %v586_v33  ;;  %v595_v38 = vld [vmem:[#allocation6 + $0x2c8] sm:$0xff]  ;;  %v610_v4 = vld [vmem:[#allocation6 + $0x340] sm:$0xff]  ;;  %v616_v8 = vld [vmem:[#allocation6 + $0x370] sm:$0xff] }
  0x97   : > { %v614_v5 = vld [vmem:[#allocation6 + $0x360] sm:$0xff]  ;;  %v619_v9 = vld [vmem:[#allocation6 + $0x388] sm:$0xff]  ;;  %v625_v12 = vld [vmem:[#allocation6 + $0x3b8] sm:$0xff] }
  0x98   : > { %1649 = vmatpush1.bf16.msra.mxu0 %v1648_v39  ;;  %v599_v39 = vld [vmem:[#allocation6 + $0x2e8] sm:$0xff]  ;;  %v1680_v13 = vpack.c.bf16 %v614_v5, %v610_v4  ;;  %v622_v17 = vld [vmem:[#allocation6 + $0x3a0] sm:$0xff]  ;;  %v624_v19 = vld [vmem:[#allocation6 + $0x3b0] sm:$0xff] }
  0x99   : > { %1713 = vmatpush1.bf16.msra.mxu1 %v1712_v42  ;;  %1651 = vmatprep.subr.bf16.mxu0 %v1650_v46  ;;  %v1670_v41 = vpack.c.bf16 %v599_v39, %v595_v38  ;;  %v597_v42 = vld [vmem:[#allocation6 + $0x2d8] sm:$0xff]  ;;  %v598_v46 = vld [vmem:[#allocation6 + $0x2e0] sm:$0xff]  ;;  %v627_v21 = vld [vmem:[#allocation6 + $0x3c8] sm:$0xff] }
  0x9a   : > { %1715 = vmatprep.subr.bf16.mxu1 %v1714_v50  ;;  %v1734_v45 = vpack.c.bf16 %v601_v43, %v597_v42  ;;  %v1672_v49 = vpack.c.bf16 %v598_v46, %v594_v44  ;;  %v603_v50 = vld [vmem:[#allocation6 + $0x308] sm:$0xff]  ;;  %v629_v24 = vld [vmem:[#allocation6 + $0x3d8] sm:$0xff]  ;;  %v626_v29 = vld [vmem:[#allocation6 + $0x3c0] sm:$0xff]  ;;  %v2229_v42 = vmov 1983009808   ;;  %v456_v44 = vlaneseq }
  0x9b   : > { %v633_v25 = vld [vmem:[#allocation6 + $0x3f8] sm:$0xff]  ;;  %v630_v30 = vld [vmem:[#allocation6 + $0x3e0] sm:$0xff]  ;;  %v632_v33 = vld [vmem:[#allocation6 + $0x3f0] sm:$0xff]  ;;  %v454_v43 = vunpack.c.l.s4 %v2229_v42 }
  0x9c   : > { %1653 = vmatpush1.bf16.msra.mxu0 %v1652_v51  ;;  %v607_v51 = vld [vmem:[#allocation6 + $0x328] sm:$0xff]  ;;  %v1688_v34 = vpack.c.bf16 %v630_v30, %v626_v29  ;;  %v832_v38 = vld [vmem:[#allocation6 + $0x418] sm:$0xff]  ;;  %v2379_v46 = vshrl.u32 %v456_v44, 7  ;;  %v239_v56 = vld [vmem:[%s2375_s14] sm:$0xff] }
  0x9d   : > { %1717 = vmatpush1.bf16.msra.mxu1 %v1716_v54  ;;  %1655 = vmatprep.subr.bf16.mxu0 %v1654_v58  ;;  %v1674_v54 = vpack.c.bf16 %v607_v51, %v603_v50  ;;  %v1738_v58 = vpack.c.bf16 %v609_v55, %v605_v52  ;;  %v834_v37 = vld [vmem:[#allocation6 + $0x428] sm:$0xff]  ;;  %v851_v44 = vld [vmem:[#allocation6 + $0x4b0] sm:$0xff] }
  0x9e   : > { %1719 = vmatprep.subr.bf16.mxu1 %v1718_v62  ;;  %v615_v62 = vld [vmem:[#allocation6 + $0x368] sm:$0xff] }
  0x9f   : > { %v1678_v3 = vpack.c.bf16 %v615_v62, %v611_v61 }
  0xa0   : > { %1657 = vmatpush1.bf16.msra.mxu0 %v1656_v63  ;;  %v613_v63 = vld [vmem:[#allocation6 + $0x358] sm:$0xff] }
  0xa1   : > { %1721 = vmatpush1.bf16.msra.mxu1 %v1720_v2  ;;  %1659 = vmatprep.subr.bf16.mxu0 %v1658_v6  ;;  %v1740_v2 = vpack.c.bf16 %v608_v60, %v604_v59  ;;  %v612_v6 = vld [vmem:[#allocation6 + $0x350] sm:$0xff]  ;;  %v1742_v7 = vpack.c.bf16 %v617_v0, %v613_v63 }
  0xa2   : > { %1723 = vmatprep.subr.bf16.mxu1 %v1722_v10  ;;  %v623_v10 = vld [vmem:[#allocation6 + $0x3a8] sm:$0xff]  ;;  %v1744_v15 = vpack.c.bf16 %v616_v8, %v612_v6 }
  0xa3   : > { %v1682_v16 = vpack.c.bf16 %v623_v10, %v619_v9 }
  0xa4   : > { %1661 = vmatpush1.bf16.msra.mxu0 %v1660_v11  ;;  %v621_v11 = vld [vmem:[#allocation6 + $0x398] sm:$0xff] }
  0xa5   : > { %1725 = vmatpush1.bf16.msra.mxu1 %v1724_v14  ;;  %1663 = vmatprep.subr.bf16.mxu0 %v1662_v18  ;;  %v618_v14 = vld [vmem:[#allocation6 + $0x380] sm:$0xff]  ;;  %v620_v18 = vld [vmem:[#allocation6 + $0x390] sm:$0xff]  ;;  %v1746_v20 = vpack.c.bf16 %v625_v12, %v621_v11 }
  0xa6   : > { %1727 = vmatprep.subr.bf16.mxu1 %v1726_v22  ;;  %v631_v22 = vld [vmem:[#allocation6 + $0x3e8] sm:$0xff]  ;;  %v1684_v26 = vpack.c.bf16 %v622_v17, %v618_v14  ;;  %v829_v14 = vld [vmem:[#allocation6 + $0x400] sm:$0xff]  ;;  %v835_v17 = vld [vmem:[#allocation6 + $0x430] sm:$0xff] }
  0xa7   : > { %v1686_v28 = vpack.c.bf16 %v631_v22, %v627_v21  ;;  %v844_v21 = vld [vmem:[#allocation6 + $0x478] sm:$0xff] }
  0xa8   : > { %1665 = vmatpush1.bf16.msra.mxu0 %v1664_v23  ;;  %v505_v23 = vld [vmem:[#allocation2 + $0x2] sm:$0x3] }
  0xa9   : > { %1729 = vmatpush1.bf16.msra.mxu1 %v1728_v27  ;;  %1667 = vmatprep.subr.bf16.mxu0 %v1666_v31  ;;  %v1748_v27 = vpack.c.bf16 %v624_v19, %v620_v18  ;;  %v1750_v31 = vpack.c.bf16 %v633_v25, %v629_v24  ;;  %v838_v18 = vld [vmem:[#allocation6 + $0x448] sm:$0xff] }
  0xaa   : > { %1731 = vmatprep.subr.bf16.mxu1 %v1730_v32  ;;  %720 = vmatprep.mubr.f32.mxu0 %v505_v23  ;;  %v628_v32 = vld [vmem:[#allocation6 + $0x3d0] sm:$0xff]  ;;  %v842_v19 = vld [vmem:[#allocation6 + $0x468] sm:$0xff] }
  0xab   : > { %791 = vmatprep.mubr.f32.mxu1 %v505_v23  ;;  %v1752_v35 = vpack.c.bf16 %v632_v33, %v628_v32  ;;  %v1758_v29 = vpack.c.bf16 %v842_v19, %v838_v18  ;;  %v843_v32 = vld [vmem:[#allocation6 + $0x470] sm:$0xff]  ;;  %v846_v33 = vld [vmem:[#allocation6 + $0x488] sm:$0xff] }
  0xac   : > { %1669 = vmatpush1.bf16.msra.mxu0 %v1668_v36  ;;  %v830_v36 = vld [vmem:[#allocation6 + $0x408] sm:$0xff]  ;;  %v875_v18 = vld [vmem:[#allocation6 + $0x570] sm:$0xff] }
  0xad   : > { %1733 = vmatpush1.bf16.msra.mxu1 %v1732_v40  ;;  %1671 = vmatprep.subr.bf16.mxu0 %v1670_v41  ;;  %v1754_v39 = vpack.c.bf16 %v834_v37, %v830_v36  ;;  %v836_v40 = vld [vmem:[#allocation6 + $0x438] sm:$0xff] }
  0xae   : > { %1735 = vmatprep.subr.bf16.mxu1 %v1734_v45  ;;  %v1818_v41 = vpack.c.bf16 %v836_v40, %v832_v38  ;;  %v455_v45 = vunpack.c.0.s8 %v454_v43  ;;  %v852_v36 = vld [vmem:[#allocation6 + $0x4b8] sm:$0xff]  ;;  %v849_v40 = vld [vmem:[#allocation6 + $0x4a0] sm:$0xff]  ;;  %v847_v43 = vld [vmem:[#allocation6 + $0x490] sm:$0xff] }
  0xb0   : > { %1673 = vmatpush1.bf16.msra.mxu0 %v1672_v49  ;;  %v458_v48 = vsub.s32 %v455_v45, %v2379_v46  ;;  %v854_v45 = vld [vmem:[#allocation6 + $0x4c8] sm:$0xff] }
  0xb1   : > { %1737 = vmatpush1.bf16.msra.mxu1 %v1736_v53  ;;  %1675 = vmatprep.subr.bf16.mxu0 %v1674_v54 }
  0xb2   : > { %1739 = vmatprep.subr.bf16.mxu1 %v1738_v58 }
  0xb4   : > { %1677 = vmatpush1.bf16.msra.mxu0 %v1676_v1 }
  0xb5   : > { %1741 = vmatpush1.bf16.msra.mxu1 %v1740_v2  ;;  %1679 = vmatprep.subr.bf16.mxu0 %v1678_v3 }
  0xb6   : > { %1743 = vmatprep.subr.bf16.mxu1 %v1742_v7  ;;  %v470_v7 = vld [vmem:[#allocation3] sm:$0x3] }
  0xb8   : > { %1681 = vmatpush1.bf16.msra.mxu0 %v1680_v13 }
  0xb9   : > { %1745 = vmatpush1.bf16.msra.mxu1 %v1744_v15  ;;  %1683 = vmatprep.subr.bf16.mxu0 %v1682_v16  ;;  %v833_v15 = vld [vmem:[#allocation6 + $0x420] sm:$0xff]  ;;  %v831_v16 = vld [vmem:[#allocation6 + $0x410] sm:$0xff] }
  0xba   : > { %1747 = vmatprep.subr.bf16.mxu1 %v1746_v20  ;;  %v840_v20 = vld [vmem:[#allocation6 + $0x458] sm:$0xff]  ;;  %v1756_v24 = vpack.c.bf16 %v833_v15, %v829_v14  ;;  %v1820_v25 = vpack.c.bf16 %v835_v17, %v831_v16  ;;  %v873_v14 = vld [vmem:[#allocation6 + $0x560] sm:$0xff]  ;;  %v871_v17 = vld [vmem:[#allocation6 + $0x550] sm:$0xff] }
  0xbb   : > { %v1822_v30 = vpack.c.bf16 %v844_v21, %v840_v20  ;;  %v1840_v19 = vpack.c.bf16 %v875_v18, %v871_v17  ;;  %v878_v20 = vld [vmem:[#allocation6 + $0x588] sm:$0xff] }
  0xbc   : > { %1685 = vmatpush1.bf16.msra.mxu0 %v1684_v26  ;;  %v837_v26 = vld [vmem:[#allocation6 + $0x440] sm:$0xff]  ;;  %v882_v21 = vld [vmem:[#allocation6 + $0x5a8] sm:$0xff] }
  0xbd   : > { %1749 = vmatpush1.bf16.msra.mxu1 %v1748_v27  ;;  %1687 = vmatprep.subr.bf16.mxu0 %v1686_v28  ;;  %v841_v27 = vld [vmem:[#allocation6 + $0x460] sm:$0xff]  ;;  %v918_v17 = vld [vmem:[#allocation6 + $0x6c8] sm:$0xff] }
  0xbe   : > { %1751 = vmatprep.subr.bf16.mxu1 %v1750_v31  ;;  %v839_v31 = vld [vmem:[#allocation6 + $0x450] sm:$0xff]  ;;  %v1760_v37 = vpack.c.bf16 %v841_v27, %v837_v26  ;;  %v881_v26 = vld [vmem:[#allocation6 + $0x5a0] sm:$0xff]  ;;  %v922_v18 = vld [vmem:[#allocation6 + $0x6e8] sm:$0xff] }
  0xbf   : > { %v1824_v38 = vpack.c.bf16 %v843_v32, %v839_v31  ;;  %v886_v32 = vld [vmem:[#allocation6 + $0x5c8] sm:$0xff] }
  0xc0   : > { %1689 = vmatpush1.bf16.msra.mxu0 %v1688_v34  ;;  %v850_v34 = vld [vmem:[#allocation6 + $0x4a8] sm:$0xff] }
  0xc1   : > { %1753 = vmatpush1.bf16.msra.mxu1 %v1752_v35  ;;  %1755 = vmatprep.subr.bf16.mxu0 %v1754_v39  ;;  %v848_v35 = vld [vmem:[#allocation6 + $0x498] sm:$0xff]  ;;  %v845_v39 = vld [vmem:[#allocation6 + $0x480] sm:$0xff] }
  0xc2   : > { %1819 = vmatprep.subr.bf16.mxu1 %v1818_v41  ;;  %v1762_v41 = vpack.c.bf16 %v850_v34, %v846_v33  ;;  %v1826_v42 = vpack.c.bf16 %v852_v36, %v848_v35  ;;  %v890_v33 = vld [vmem:[#allocation6 + $0x5e8] sm:$0xff]  ;;  %v888_v34 = vld [vmem:[#allocation6 + $0x5d8] sm:$0xff] }
  0xc3   : > { %v1782_v35 = vpack.c.bf16 %v890_v33, %v886_v32  ;;  %v892_v36 = vld [vmem:[#allocation6 + $0x5f8] sm:$0xff] }
  0xc4   : > { %v928_v32 = vld [vmem:[#allocation6 + $0x718] sm:$0xff] }
  0xc5   : > { %v932_v33 = vld [vmem:[#allocation6 + $0x738] sm:$0xff] }
 0x156   : > { %v371_v47 = vpop.f32.mrb[0].mxu0 }
 0x157   : > { %v442_v49 = vpop.f32.mrb[0].mxu1  ;;  %v373_v50 = vpop.f32.mrb[1].mxu0 }
 0x158   : > { %v451_v51 = vcombine.low %v371_v47, %v373_v50  ;;  %v444_v52 = vpop.f32.mrb[1].mxu1  ;;  %v858_v47 = vld [vmem:[#allocation6 + $0x4e8] sm:$0xff]  ;;  %v1764_v50 = vpack.c.bf16 %v849_v40, %v845_v39  ;;  %v1846_v39 = vpack.c.bf16 %v892_v36, %v888_v34  ;;  %v925_v34 = vld [vmem:[#allocation6 + $0x700] sm:$0xff] }
 0x159   : > { %v452_v53 = vcombine.low %v442_v49, %v444_v52  ;;  %v860_v49 = vld [vmem:[#allocation6 + $0x4f8] sm:$0xff]  ;;  %v853_v52 = vld [vmem:[#allocation6 + $0x4c0] sm:$0xff] }
 0x15a   : > { %v459_v54 = vrot.slane %v451_v51, %v458_v48  ;;  %v1828_v51 = vpack.c.bf16 %v851_v44, %v847_v43  ;;  %v894_v44 = vld [vmem:[#allocation6 + $0x608] sm:$0xff]  ;;  %v929_v36 = vld [vmem:[#allocation6 + $0x720] sm:$0xff] }
 0x15b   : > { %v466_v55 = vrot.slane %v452_v53, %v458_v48  ;;  %v856_v48 = vld [vmem:[#allocation6 + $0x4d8] sm:$0xff]  ;;  %v857_v53 = vld [vmem:[#allocation6 + $0x4e0] sm:$0xff] }
 0x15d   : > { %v467_v57 = vcombine.low %v459_v54, %v466_v55  ;;  %v1766_v54 = vpack.c.bf16 %v858_v47, %v854_v45  ;;  %v1830_v55 = vpack.c.bf16 %v860_v49, %v856_v48  ;;  %v898_v45 = vld [vmem:[#allocation6 + $0x628] sm:$0xff]  ;;  %v896_v47 = vld [vmem:[#allocation6 + $0x618] sm:$0xff] }
 0x15e   : > { %v1786_v48 = vpack.c.bf16 %v898_v45, %v894_v44  ;;  %v900_v49 = vld [vmem:[#allocation6 + $0x638] sm:$0xff] }
 0x15f   : > { %v469_v58 = vadd.f32 %v467_v57, %v239_v56  ;;  %v855_v56 = vld [vmem:[#allocation6 + $0x4d0] sm:$0xff]  ;;  %v940_v45 = vld [vmem:[#allocation6 + $0x778] sm:$0xff] }
 0x160   : > { %v859_v57 = vld [vmem:[#allocation6 + $0x4f0] sm:$0xff] }
 0x161   : > { %v1547_v59 = vmul.f32 -1.442695, %v469_v58  ;;  %v478_v60 = vrot.slane %v469_v58, 2  ;;  %v489_v62 = vrot.slane %v469_v58, 6  ;;  %v486_v1 = vrot.slane %v469_v58, 4  ;;  %v862_v58 = vld [vmem:[#allocation6 + $0x508] sm:$0xff] }
 0x163   : > { %2056 = vpow2.f32 %v1547_v59  ;;  %v1548_v61 = vmul.f32 -1.442695, %v478_v60  ;;  %v1549_v63 = vmul.f32 -1.442695, %v489_v62  ;;  %v866_v59 = vld [vmem:[#allocation6 + $0x528] sm:$0xff]  ;;  %v864_v60 = vld [vmem:[#allocation6 + $0x518] sm:$0xff]  ;;  %v1768_v62 = vpack.c.bf16 %v857_v53, %v853_v52 }
 0x164   : > { %v1850_v52 = vpack.c.bf16 %v900_v49, %v896_v47  ;;  %v933_v47 = vld [vmem:[#allocation6 + $0x740] sm:$0xff] }
 0x165   : > { %2058 = vpow2.f32 %v1548_v61  ;;  %v868_v61 = vld [vmem:[#allocation6 + $0x538] sm:$0xff] }
 0x166   : > { %2060 = vpow2.f32 %v1549_v63  ;;  %v1832_v63 = vpack.c.bf16 %v859_v57, %v855_v56  ;;  %v902_v57 = vld [vmem:[#allocation6 + $0x648] sm:$0xff] }
 0x16d   : > { %v2057_v0 = vpop.eup %2056 }
 0x16e   : > { %v474_v2 = vadd.f32 1.0, %v2057_v0  ;;  %v1770_v0 = vpack.c.bf16 %v866_v59, %v862_v58  ;;  %v906_v58 = vld [vmem:[#allocation6 + $0x668] sm:$0xff]  ;;  %v904_v59 = vld [vmem:[#allocation6 + $0x658] sm:$0xff] }
 0x16f   : > { %v2059_v3 = vpop.eup %2058 }
 0x170   : > { %2062 = vrcp.f32 %v474_v2  ;;  %v483_v4 = vadd.f32 1.0, %v2059_v3  ;;  %v2061_v5 = vpop.eup %2060  ;;  %v861_v2 = vld [vmem:[#allocation6 + $0x500] sm:$0xff] }
 0x171   : > { %2064 = vtanh.f32 %v486_v1  ;;  %v494_v10 = vadd.f32 1.0, %v2061_v5  ;;  %v1834_v1 = vpack.c.bf16 %v868_v61, %v864_v60  ;;  %v865_v3 = vld [vmem:[#allocation6 + $0x520] sm:$0xff]  ;;  %v1790_v60 = vpack.c.bf16 %v906_v58, %v902_v57  ;;  %v908_v61 = vld [vmem:[#allocation6 + $0x678] sm:$0xff] }
 0x172   : > { %2066 = vrcp.f32 %v483_v4  ;;  %v863_v4 = vld [vmem:[#allocation6 + $0x510] sm:$0xff]  ;;  %v1772_v5 = vpack.c.bf16 %v865_v3, %v861_v2  ;;  %v948_v57 = vld [vmem:[#allocation6 + $0x7b8] sm:$0xff] }
 0x173   : > { %2068 = vrcp.f32 %v494_v10  ;;  %v872_v10 = vld [vmem:[#allocation6 + $0x558] sm:$0xff]  ;;  %v903_v2 = vld [vmem:[#allocation6 + $0x650] sm:$0xff] }
 0x174   : > { %v907_v3 = vld [vmem:[#allocation6 + $0x670] sm:$0xff] }
 0x17a   : > { %v2063_v6 = vpop.eup %2062 }
 0x17b   : > { %v2065_v8 = vpop.eup %2064 }
 0x17c   : > { %v2067_v9 = vpop.eup %2066  ;;  %v498_v12 = vmul.f32 %v2065_v8, %v2063_v6  ;;  %v867_v6 = vld [vmem:[#allocation6 + $0x530] sm:$0xff]  ;;  %v870_v8 = vld [vmem:[#allocation6 + $0x548] sm:$0xff] }
 0x17d   : > { %v497_v11 = vmul.f32 %v2067_v9, %v470_v7  ;;  %v2069_v22 = vpop.eup %2068  ;;  %v1836_v7 = vpack.c.bf16 %v867_v6, %v863_v4  ;;  %v874_v9 = vld [vmem:[#allocation6 + $0x568] sm:$0xff]  ;;  %v1856_v4 = vpack.c.bf16 %v907_v3, %v903_v2 }
 0x17e   : > { %v914_v6 = vld [vmem:[#allocation6 + $0x6a8] sm:$0xff] }
 0x17f   : > { %v499_v13 = vadd.f32 %v498_v12, %v497_v11  ;;  %v1774_v11 = vpack.c.bf16 %v874_v9, %v870_v8  ;;  %v876_v12 = vld [vmem:[#allocation6 + $0x578] sm:$0xff]  ;;  %v954_v2 = vld [vmem:[#allocation6 + $0x7e8] sm:$0xff] }
 0x180   : > { %v1838_v15 = vpack.c.bf16 %v876_v12, %v872_v10  ;;  %v916_v9 = vld [vmem:[#allocation6 + $0x6b8] sm:$0xff]  ;;  %v909_v10 = vld [vmem:[#allocation6 + $0x680] sm:$0xff] }
 0x181   : > { %2070 = vtanh.f32 %v499_v13  ;;  %503 = vst [vmem:[#allocation3] sm:$0x3] %v499_v13  ;;  %v869_v13 = vld [vmem:[#allocation6 + $0x540] sm:$0xff] }
 0x182   : > { %v1776_v16 = vpack.c.bf16 %v873_v14, %v869_v13  ;;  %v911_v14 = vld [vmem:[#allocation6 + $0x690] sm:$0xff] }
 0x18b   : > { %v2071_v23 = vpop.eup %2070 }
 0x18c   : > { %v501_v28 = vmul.f32 %v2071_v23, %v2069_v22  ;;  %v880_v22 = vld [vmem:[#allocation6 + $0x598] sm:$0xff]  ;;  %v1778_v23 = vpack.c.bf16 %v882_v21, %v878_v20  ;;  %v1798_v20 = vpack.c.bf16 %v922_v18, %v918_v17 }
 0x18d   : > { %v924_v21 = vld [vmem:[#allocation6 + $0x6f8] sm:$0xff] }
 0x18e   : > { %502 = vst [vmem:[#allocation2] sm:$0x3] %v501_v28  ;;  %721 = vmatmul.mubr.f32.vlgmr.msra.gmra.mrb[2].mxu0 %v501_v28  ;;  %792 = vmatmul.mubr.f32.vlgmr.msra.gmra.mrb[2].mxu1 %v501_v28  ;;  %v1156_v17 = vld [vmem:[#allocation6 + $0x818] sm:$0xff] }
 0x18f   : > { %1757 = vmatpush1.bf16.msra.mxu0 %v1756_v24  ;;  %1821 = vmatpush1.bf16.msra.mxu1 %v1820_v25  ;;  %v884_v24 = vld [vmem:[#allocation6 + $0x5b8] sm:$0xff]  ;;  %v877_v25 = vld [vmem:[#allocation6 + $0x580] sm:$0xff] }
 0x190   : > { %1759 = vmatprep.subr.bf16.mxu0 %v1758_v29  ;;  %1823 = vmatprep.subr.bf16.mxu1 %v1822_v30  ;;  %v1842_v27 = vpack.c.bf16 %v884_v24, %v880_v22  ;;  %v1780_v28 = vpack.c.bf16 %v881_v26, %v877_v25  ;;  %v879_v29 = vld [vmem:[#allocation6 + $0x590] sm:$0xff]  ;;  %v917_v22 = vld [vmem:[#allocation6 + $0x6c0] sm:$0xff] }
 0x191   : > { %v883_v30 = vld [vmem:[#allocation6 + $0x5b0] sm:$0xff] }
 0x192   : > { %v1844_v31 = vpack.c.bf16 %v883_v30, %v879_v29  ;;  %v919_v26 = vld [vmem:[#allocation6 + $0x6d0] sm:$0xff]  ;;  %v926_v29 = vld [vmem:[#allocation6 + $0x708] sm:$0xff] }
 0x193   : > { %1761 = vmatpush1.bf16.msra.mxu0 %v1760_v37  ;;  %1825 = vmatpush1.bf16.msra.mxu1 %v1824_v38  ;;  %v885_v37 = vld [vmem:[#allocation6 + $0x5c0] sm:$0xff]  ;;  %v930_v30 = vld [vmem:[#allocation6 + $0x728] sm:$0xff] }
 0x194   : > { %1763 = vmatprep.subr.bf16.mxu0 %v1762_v41  ;;  %1827 = vmatprep.subr.bf16.mxu1 %v1826_v42  ;;  %v889_v38 = vld [vmem:[#allocation6 + $0x5e0] sm:$0xff]  ;;  %v887_v41 = vld [vmem:[#allocation6 + $0x5d0] sm:$0xff] }
 0x195   : > { %v1784_v40 = vpack.c.bf16 %v889_v38, %v885_v37  ;;  %v891_v42 = vld [vmem:[#allocation6 + $0x5f0] sm:$0xff] }
 0x196   : > { %v1848_v43 = vpack.c.bf16 %v891_v42, %v887_v41  ;;  %v927_v37 = vld [vmem:[#allocation6 + $0x710] sm:$0xff]  ;;  %v934_v41 = vld [vmem:[#allocation6 + $0x748] sm:$0xff] }
 0x197   : > { %1765 = vmatpush1.bf16.msra.mxu0 %v1764_v50  ;;  %1829 = vmatpush1.bf16.msra.mxu1 %v1828_v51  ;;  %v893_v50 = vld [vmem:[#allocation6 + $0x600] sm:$0xff]  ;;  %v931_v38 = vld [vmem:[#allocation6 + $0x730] sm:$0xff]  ;;  %v938_v42 = vld [vmem:[#allocation6 + $0x768] sm:$0xff] }
 0x198   : > { %1767 = vmatprep.subr.bf16.mxu0 %v1766_v54  ;;  %1831 = vmatprep.subr.bf16.mxu1 %v1830_v55  ;;  %v897_v51 = vld [vmem:[#allocation6 + $0x620] sm:$0xff]  ;;  %v895_v54 = vld [vmem:[#allocation6 + $0x610] sm:$0xff]  ;;  %v1806_v44 = vpack.c.bf16 %v938_v42, %v934_v41 }
 0x199   : > { %v1788_v53 = vpack.c.bf16 %v897_v51, %v893_v50  ;;  %v899_v55 = vld [vmem:[#allocation6 + $0x630] sm:$0xff] }
 0x19a   : > { %v1852_v56 = vpack.c.bf16 %v899_v55, %v895_v54  ;;  %v935_v51 = vld [vmem:[#allocation6 + $0x750] sm:$0xff]  ;;  %v946_v55 = vld [vmem:[#allocation6 + $0x7a8] sm:$0xff] }
 0x19b   : > { %1769 = vmatpush1.bf16.msra.mxu0 %v1768_v62  ;;  %1833 = vmatpush1.bf16.msra.mxu1 %v1832_v63  ;;  %v901_v62 = vld [vmem:[#allocation6 + $0x640] sm:$0xff] }
 0x19c   : > { %1771 = vmatprep.subr.bf16.mxu0 %v1770_v0  ;;  %1835 = vmatprep.subr.bf16.mxu1 %v1834_v1  ;;  %v905_v63 = vld [vmem:[#allocation6 + $0x660] sm:$0xff]  ;;  %v1854_v0 = vpack.c.bf16 %v908_v61, %v904_v59 }
 0x19d   : > { %v1792_v1 = vpack.c.bf16 %v905_v63, %v901_v62  ;;  %v945_v61 = vld [vmem:[#allocation6 + $0x7a0] sm:$0xff]  ;;  %v943_v62 = vld [vmem:[#allocation6 + $0x790] sm:$0xff] }
 0x19f   : > { %1773 = vmatpush1.bf16.msra.mxu0 %v1772_v5  ;;  %1837 = vmatpush1.bf16.msra.mxu1 %v1836_v7  ;;  %v910_v5 = vld [vmem:[#allocation6 + $0x688] sm:$0xff]  ;;  %v912_v7 = vld [vmem:[#allocation6 + $0x698] sm:$0xff] }
 0x1a0   : > { %1775 = vmatprep.subr.bf16.mxu0 %v1774_v11  ;;  %1839 = vmatprep.subr.bf16.mxu1 %v1838_v15  ;;  %v1794_v8 = vpack.c.bf16 %v914_v6, %v910_v5  ;;  %v913_v11 = vld [vmem:[#allocation6 + $0x6a0] sm:$0xff]  ;;  %v1858_v12 = vpack.c.bf16 %v916_v9, %v912_v7  ;;  %v915_v15 = vld [vmem:[#allocation6 + $0x6b0] sm:$0xff]  ;;  %v952_v5 = vld [vmem:[#allocation6 + $0x7d8] sm:$0xff] }
 0x1a1   : > { %v1796_v13 = vpack.c.bf16 %v913_v11, %v909_v10  ;;  %v956_v6 = vld [vmem:[#allocation6 + $0x7f8] sm:$0xff]  ;;  %v949_v7 = vld [vmem:[#allocation6 + $0x7c0] sm:$0xff]  ;;  %v951_v10 = vld [vmem:[#allocation6 + $0x7d0] sm:$0xff] }
 0x1a2   : > { %v953_v9 = vld [vmem:[#allocation6 + $0x7e0] sm:$0xff]  ;;  %v955_v11 = vld [vmem:[#allocation6 + $0x7f0] sm:$0xff] }
 0x1a3   : > { %1777 = vmatpush1.bf16.msra.mxu0 %v1776_v16  ;;  %1841 = vmatpush1.bf16.msra.mxu1 %v1840_v19  ;;  %v1860_v16 = vpack.c.bf16 %v915_v15, %v911_v14  ;;  %v920_v19 = vld [vmem:[#allocation6 + $0x6d8] sm:$0xff]  ;;  %v1880_v14 = vpack.c.bf16 %v955_v11, %v951_v10  ;;  %v1154_v15 = vld [vmem:[#allocation6 + $0x808] sm:$0xff] }
 0x1a4   : > { %1779 = vmatprep.subr.bf16.mxu0 %v1778_v23  ;;  %1843 = vmatprep.subr.bf16.mxu1 %v1842_v27  ;;  %v921_v23 = vld [vmem:[#allocation6 + $0x6e0] sm:$0xff]  ;;  %v1862_v24 = vpack.c.bf16 %v924_v21, %v920_v19  ;;  %v923_v27 = vld [vmem:[#allocation6 + $0x6f0] sm:$0xff]  ;;  %v1160_v19 = vld [vmem:[#allocation6 + $0x838] sm:$0xff]  ;;  %v2384_v21 = vsub.s32 0, %v2379_v46 }
 0x1a5   : > { %v1800_v25 = vpack.c.bf16 %v921_v23, %v917_v22  ;;  %v634_v22 = vld [vmem:[#allocation8] sm:$0xf]  ;;  %v2387_v23 = vsub.s32 1, %v2379_v46  ;;  %v1174_v10 = vld [vmem:[#allocation6 + $0x8a8] sm:$0xff]  ;;  %v1172_v11 = vld [vmem:[#allocation6 + $0x898] sm:$0xff] }
 0x1a7   : > { %1781 = vmatpush1.bf16.msra.mxu0 %v1780_v28  ;;  %1845 = vmatpush1.bf16.msra.mxu1 %v1844_v31  ;;  %v1864_v28 = vpack.c.bf16 %v923_v27, %v919_v26  ;;  %v1802_v31 = vpack.c.bf16 %v930_v30, %v926_v29 }
 0x1a8   : > { %1783 = vmatprep.subr.bf16.mxu0 %v1782_v35  ;;  %1847 = vmatprep.subr.bf16.mxu1 %v1846_v39  ;;  %v1866_v35 = vpack.c.bf16 %v932_v33, %v928_v32  ;;  %v1804_v39 = vpack.c.bf16 %v929_v36, %v925_v34  ;;  %v2396_v36 = vsub.s32 2, %v2379_v46 }
 0x1ab   : > { %1785 = vmatpush1.bf16.msra.mxu0 %v1784_v40  ;;  %1849 = vmatpush1.bf16.msra.mxu1 %v1848_v43  ;;  %v1868_v40 = vpack.c.bf16 %v931_v38, %v927_v37  ;;  %v936_v43 = vld [vmem:[#allocation6 + $0x758] sm:$0xff]  ;;  %v647_v38 = vrot.slane %v634_v22, %v2396_v36 }
 0x1ac   : > { %1787 = vmatprep.subr.bf16.mxu0 %v1786_v48  ;;  %1851 = vmatprep.subr.bf16.mxu1 %v1850_v52  ;;  %v937_v48 = vld [vmem:[#allocation6 + $0x760] sm:$0xff]  ;;  %v1870_v49 = vpack.c.bf16 %v940_v45, %v936_v43  ;;  %v939_v52 = vld [vmem:[#allocation6 + $0x770] sm:$0xff] }
 0x1ad   : > { %v1808_v50 = vpack.c.bf16 %v937_v48, %v933_v47  ;;  %v1872_v54 = vpack.c.bf16 %v939_v52, %v935_v51  ;;  %v799_v48 = vld [vmem:[#allocation3 + $0x2] sm:$0x3] }
 0x1af   : > { %1789 = vmatpush1.bf16.msra.mxu0 %v1788_v53  ;;  %1853 = vmatpush1.bf16.msra.mxu1 %v1852_v56  ;;  %v942_v53 = vld [vmem:[#allocation6 + $0x788] sm:$0xff]  ;;  %v944_v56 = vld [vmem:[#allocation6 + $0x798] sm:$0xff] }
 0x1b0   : > { %1791 = vmatprep.subr.bf16.mxu0 %v1790_v60  ;;  %1855 = vmatprep.subr.bf16.mxu1 %v1854_v0  ;;  %v1810_v58 = vpack.c.bf16 %v946_v55, %v942_v53  ;;  %v1874_v59 = vpack.c.bf16 %v948_v57, %v944_v56  ;;  %v941_v60 = vld [vmem:[#allocation6 + $0x780] sm:$0xff]  ;;  %v947_v0 = vld [vmem:[#allocation6 + $0x7b0] sm:$0xff] }
 0x1b1   : > { %v1812_v63 = vpack.c.bf16 %v945_v61, %v941_v60  ;;  %v1876_v3 = vpack.c.bf16 %v947_v0, %v943_v62  ;;  %v1157_v55 = vld [vmem:[#allocation6 + $0x820] sm:$0xff]  ;;  %v1155_v56 = vld [vmem:[#allocation6 + $0x810] sm:$0xff]  ;;  %v1164_v60 = vld [vmem:[#allocation6 + $0x858] sm:$0xff] }
 0x1b2   : > { %v1159_v57 = vld [vmem:[#allocation6 + $0x830] sm:$0xff]  ;;  %v1168_v61 = vld [vmem:[#allocation6 + $0x878] sm:$0xff] }
 0x1b3   : > { %1793 = vmatpush1.bf16.msra.mxu0 %v1792_v1  ;;  %1857 = vmatpush1.bf16.msra.mxu1 %v1856_v4  ;;  %v950_v1 = vld [vmem:[#allocation6 + $0x7c8] sm:$0xff] }
 0x1b4   : > { %1795 = vmatprep.subr.bf16.mxu0 %v1794_v8  ;;  %1859 = vmatprep.subr.bf16.mxu1 %v1858_v12  ;;  %v1814_v4 = vpack.c.bf16 %v954_v2, %v950_v1  ;;  %v1878_v8 = vpack.c.bf16 %v956_v6, %v952_v5  ;;  %v827_v12 = vld [vmem:[#allocation2 + $0x4] sm:$0x3]  ;;  %v1948_v1 = vpack.c.bf16 %v1159_v57, %v1155_v56  ;;  %v1161_v2 = vld [vmem:[#allocation6 + $0x840] sm:$0xff] }
 0x1b5   : > { %1044 = vmatprep.mubr.f32.mxu0 %v827_v12  ;;  %1115 = vmatprep.mubr.f32.mxu1 %v827_v12  ;;  %v1950_v6 = vpack.c.bf16 %v1168_v61, %v1164_v60  ;;  %v1176_v12 = vld [vmem:[#allocation6 + $0x8b8] sm:$0xff]  ;;  %v1193_v56 = vld [vmem:[#allocation6 + $0x940] sm:$0xff]  ;;  %v1195_v60 = vld [vmem:[#allocation6 + $0x950] sm:$0xff] }
 0x1b6   : > { %v1197_v57 = vld [vmem:[#allocation6 + $0x960] sm:$0xff]  ;;  %v1199_v61 = vld [vmem:[#allocation6 + $0x970] sm:$0xff] }
 0x1b7   : > { %1797 = vmatpush1.bf16.msra.mxu0 %v1796_v13  ;;  %1861 = vmatpush1.bf16.msra.mxu1 %v1860_v16  ;;  %v1816_v13 = vpack.c.bf16 %v953_v9, %v949_v7  ;;  %v1158_v16 = vld [vmem:[#allocation6 + $0x828] sm:$0xff]  ;;  %v1163_v7 = vld [vmem:[#allocation6 + $0x850] sm:$0xff] }
 0x1b8   : > { %1799 = vmatprep.subr.bf16.mxu0 %v1798_v20  ;;  %1863 = vmatprep.subr.bf16.mxu1 %v1862_v24  ;;  %v1882_v18 = vpack.c.bf16 %v1158_v16, %v1154_v15  ;;  %v1946_v20 = vpack.c.bf16 %v1160_v19, %v1156_v17  ;;  %v639_v24 = vrot.slane %v634_v22, %v2384_v21  ;;  %v1170_v9 = vld [vmem:[#allocation6 + $0x888] sm:$0xff]  ;;  %v1169_v15 = vld [vmem:[#allocation6 + $0x880] sm:$0xff]  ;;  %v1171_v19 = vld [vmem:[#allocation6 + $0x890] sm:$0xff] }
 0x1b9   : > { %v1173_v16 = vld [vmem:[#allocation6 + $0x8a0] sm:$0xff]  ;;  %v1890_v17 = vpack.c.bf16 %v1174_v10, %v1170_v9  ;;  %v1207_v9 = vld [vmem:[#allocation6 + $0x9b0] sm:$0xff] }
 0x1bb   : > { %1801 = vmatpush1.bf16.msra.mxu0 %v1800_v25  ;;  %1865 = vmatpush1.bf16.msra.mxu1 %v1864_v28  ;;  %v643_v25 = vrot.slane %v634_v22, %v2387_v23  ;;  %v2392_v28 = vsub.s32 3, %v2379_v46 }
 0x1bc   : > { %1803 = vmatprep.subr.bf16.mxu0 %v1802_v31  ;;  %1867 = vmatprep.subr.bf16.mxu1 %v1866_v35 }
 0x1bd   : > { %v651_v35 = vrot.slane %v634_v22, %v2392_v28  ;;  %v1178_v22 = vld [vmem:[#allocation6 + $0x8c8] sm:$0xff] }
 0x1bf   : > { %1805 = vmatpush1.bf16.msra.mxu0 %v1804_v39  ;;  %1869 = vmatpush1.bf16.msra.mxu1 %v1868_v40 }
 0x1c0   : > { %1807 = vmatprep.subr.bf16.mxu0 %v1806_v44  ;;  %1871 = vmatprep.subr.bf16.mxu1 %v1870_v49 }
 0x1c3   : > { %1809 = vmatpush1.bf16.msra.mxu0 %v1808_v50  ;;  %1873 = vmatpush1.bf16.msra.mxu1 %v1872_v54  ;;  %v1153_v54 = vld [vmem:[#allocation6 + $0x800] sm:$0xff] }
 0x1c4   : > { %1811 = vmatprep.subr.bf16.mxu0 %v1810_v58  ;;  %1875 = vmatprep.subr.bf16.mxu1 %v1874_v59  ;;  %v1162_v58 = vld [vmem:[#allocation6 + $0x848] sm:$0xff]  ;;  %v1884_v0 = vpack.c.bf16 %v1157_v55, %v1153_v54  ;;  %v1200_v55 = vld [vmem:[#allocation6 + $0x978] sm:$0xff] }
 0x1c5   : > { %v1166_v59 = vld [vmem:[#allocation6 + $0x868] sm:$0xff] }
 0x1c6   : > { %v1886_v5 = vpack.c.bf16 %v1166_v59, %v1162_v58  ;;  %v1904_v59 = vpack.c.bf16 %v1197_v57, %v1193_v56  ;;  %v1233_v56 = vld [vmem:[#allocation6 + $0xa80] sm:$0xff] }
 0x1c7   : > { %1813 = vmatpush1.bf16.msra.mxu0 %v1812_v63  ;;  %1877 = vmatpush1.bf16.msra.mxu1 %v1876_v3  ;;  %v1165_v3 = vld [vmem:[#allocation6 + $0x860] sm:$0xff] }
 0x1c8   : > { %1815 = vmatprep.subr.bf16.mxu0 %v1814_v4  ;;  %1879 = vmatprep.subr.bf16.mxu1 %v1878_v8  ;;  %v1167_v8 = vld [vmem:[#allocation6 + $0x870] sm:$0xff]  ;;  %v1237_v57 = vld [vmem:[#allocation6 + $0xaa0] sm:$0xff] }
 0x1cb   : > { %1817 = vmatpush1.bf16.msra.mxu0 %v1816_v13  ;;  %1881 = vmatpush1.bf16.msra.mxu1 %v1880_v14  ;;  %v1888_v13 = vpack.c.bf16 %v1165_v3, %v1161_v2  ;;  %v1952_v14 = vpack.c.bf16 %v1167_v8, %v1163_v7  ;;  %v1208_v3 = vld [vmem:[#allocation6 + $0x9b8] sm:$0xff]  ;;  %v1203_v8 = vld [vmem:[#allocation6 + $0x990] sm:$0xff] }
 0x1cc   : > { %1883 = vmatprep.subr.bf16.mxu0 %v1882_v18  ;;  %1947 = vmatprep.subr.bf16.mxu1 %v1946_v20  ;;  %v1954_v18 = vpack.c.bf16 %v1176_v12, %v1172_v11  ;;  %v1175_v20 = vld [vmem:[#allocation6 + $0x8b0] sm:$0xff]  ;;  %v1972_v10 = vpack.c.bf16 %v1207_v9, %v1203_v8  ;;  %v1210_v11 = vld [vmem:[#allocation6 + $0x9c8] sm:$0xff] }
 0x1cd   : > { %v1214_v12 = vld [vmem:[#allocation6 + $0x9e8] sm:$0xff]  ;;  %v1243_v8 = vld [vmem:[#allocation6 + $0xad0] sm:$0xff] }
 0x1ce   : > { %v1247_v9 = vld [vmem:[#allocation6 + $0xaf0] sm:$0xff] }
 0x261   : > { %v722_v26 = vpop.f32.mrb[2].mxu0  ;;  %v793_v27 = vpop.f32.mrb[2].mxu1 }
 0x262   : > { %v723_v29 = vadd.f32 %v722_v26, %v639_v24  ;;  %v724_v30 = vpop.f32.mrb[3].mxu0  ;;  %v795_v31 = vpop.f32.mrb[3].mxu1  ;;  %v794_v40 = vadd.f32 %v793_v27, %v647_v38  ;;  %v1182_v24 = vld [vmem:[#allocation6 + $0x8e8] sm:$0xff]  ;;  %v1184_v26 = vld [vmem:[#allocation6 + $0x8f8] sm:$0xff]  ;;  %v1892_v27 = vpack.c.bf16 %v1173_v16, %v1169_v15  ;;  %v1209_v16 = vld [vmem:[#allocation6 + $0x9c0] sm:$0xff] }
 0x263   : > { %v725_v32 = vadd.f32 %v724_v30, %v643_v25  ;;  %v796_v37 = vadd.f32 %v795_v31, %v651_v35  ;;  %v1180_v25 = vld [vmem:[#allocation6 + $0x8d8] sm:$0xff]  ;;  %v1177_v30 = vld [vmem:[#allocation6 + $0x8c0] sm:$0xff]  ;;  %v1183_v35 = vld [vmem:[#allocation6 + $0x8f0] sm:$0xff] }
 0x264   : > { %v1550_v33 = vmul.f32 -1.442695, %v723_v29  ;;  %v1956_v29 = vpack.c.bf16 %v1175_v20, %v1171_v19  ;;  %v1181_v31 = vld [vmem:[#allocation6 + $0x8e0] sm:$0xff]  ;;  %v1190_v38 = vld [vmem:[#allocation6 + $0x928] sm:$0xff]  ;;  %v1216_v15 = vld [vmem:[#allocation6 + $0x9f8] sm:$0xff] }
 0x265   : > { %v1551_v34 = vmul.f32 -1.442695, %v725_v32  ;;  %v1552_v39 = vmul.f32 -1.442695, %v796_v37  ;;  %v1894_v32 = vpack.c.bf16 %v1182_v24, %v1178_v22  ;;  %v1186_v37 = vld [vmem:[#allocation6 + $0x908] sm:$0xff]  ;;  %v1211_v20 = vld [vmem:[#allocation6 + $0x9d0] sm:$0xff] }
 0x266   : > { %2072 = vpow2.f32 %v1550_v33  ;;  %v1958_v33 = vpack.c.bf16 %v1184_v26, %v1180_v25  ;;  %v1215_v22 = vld [vmem:[#allocation6 + $0x9f0] sm:$0xff]  ;;  %v1218_v25 = vld [vmem:[#allocation6 + $0xa08] sm:$0xff] }
 0x267   : > { %2074 = vpow2.f32 %v1551_v34  ;;  %v1179_v34 = vld [vmem:[#allocation6 + $0x8d0] sm:$0xff]  ;;  %v1976_v24 = vpack.c.bf16 %v1215_v22, %v1211_v20  ;;  %v1222_v26 = vld [vmem:[#allocation6 + $0xa28] sm:$0xff] }
 0x268   : > { %2076 = vpow2.f32 %v1552_v39  ;;  %v1188_v39 = vld [vmem:[#allocation6 + $0x918] sm:$0xff]  ;;  %v1255_v20 = vld [vmem:[#allocation6 + $0xb30] sm:$0xff] }
 0x269   : > { %2078 = vtanh.f32 %v794_v40  ;;  %v1192_v40 = vld [vmem:[#allocation6 + $0x938] sm:$0xff] }
 0x270   : > { %v2073_v41 = vpop.eup %2072 }
 0x271   : > { %v2075_v42 = vpop.eup %2074  ;;  %v803_v43 = vadd.f32 1.0, %v2073_v41  ;;  %v1896_v41 = vpack.c.bf16 %v1181_v31, %v1177_v30  ;;  %v1224_v30 = vld [vmem:[#allocation6 + $0xa38] sm:$0xff]  ;;  %v1217_v31 = vld [vmem:[#allocation6 + $0xa00] sm:$0xff] }
 0x272   : > { %v809_v44 = vadd.f32 1.0, %v2075_v42  ;;  %v2077_v45 = vpop.eup %2076  ;;  %v1960_v42 = vpack.c.bf16 %v1183_v35, %v1179_v34  ;;  %v1219_v35 = vld [vmem:[#allocation6 + $0xa10] sm:$0xff] }
 0x273   : > { %2080 = vrcp.f32 %v803_v43  ;;  %v2079_v47 = vpop.eup %2078  ;;  %v816_v51 = vadd.f32 1.0, %v2077_v45  ;;  %v1898_v43 = vpack.c.bf16 %v1190_v38, %v1186_v37  ;;  %v1185_v45 = vld [vmem:[#allocation6 + $0x900] sm:$0xff]  ;;  %v1223_v37 = vld [vmem:[#allocation6 + $0xa30] sm:$0xff] }
 0x274   : > { %2082 = vrcp.f32 %v809_v44  ;;  %v1962_v44 = vpack.c.bf16 %v1192_v40, %v1188_v39  ;;  %v1980_v38 = vpack.c.bf16 %v1223_v37, %v1219_v35  ;;  %v1226_v39 = vld [vmem:[#allocation6 + $0xa48] sm:$0xff]  ;;  %v1259_v35 = vld [vmem:[#allocation6 + $0xb50] sm:$0xff] }
 0x275   : > { %2084 = vrcp.f32 %v816_v51  ;;  %v1194_v51 = vld [vmem:[#allocation6 + $0x948] sm:$0xff]  ;;  %v1263_v37 = vld [vmem:[#allocation6 + $0xb70] sm:$0xff] }
 0x276   : > { %v1230_v40 = vld [vmem:[#allocation6 + $0xa68] sm:$0xff] }
 0x27d   : > { %v2081_v49 = vpop.eup %2080 }
 0x27e   : > { %v2083_v46 = vpop.eup %2082  ;;  %v820_v50 = vmul.f32 %v2081_v49, %v2079_v47  ;;  %v1189_v47 = vld [vmem:[#allocation6 + $0x920] sm:$0xff] }
 0x27f   : > { %v819_v52 = vmul.f32 %v2083_v46, %v799_v48  ;;  %v2085_v62 = vpop.eup %2084  ;;  %v1187_v48 = vld [vmem:[#allocation6 + $0x910] sm:$0xff]  ;;  %v1900_v49 = vpack.c.bf16 %v1189_v47, %v1185_v45  ;;  %v1229_v45 = vld [vmem:[#allocation6 + $0xa60] sm:$0xff] }
 0x280   : > { %v1191_v46 = vld [vmem:[#allocation6 + $0x930] sm:$0xff] }
 0x281   : > { %v821_v53 = vadd.f32 %v820_v50, %v819_v52  ;;  %v1964_v50 = vpack.c.bf16 %v1191_v46, %v1187_v48  ;;  %v1198_v52 = vld [vmem:[#allocation6 + $0x968] sm:$0xff]  ;;  %v1231_v46 = vld [vmem:[#allocation6 + $0xa70] sm:$0xff] }
 0x282   : > { %v1902_v54 = vpack.c.bf16 %v1198_v52, %v1194_v51  ;;  %v1234_v51 = vld [vmem:[#allocation6 + $0xa88] sm:$0xff] }
 0x283   : > { %825 = vst [vmem:[#allocation3 + $0x2] sm:$0x3] %v821_v53  ;;  %2086 = vtanh.f32 %v821_v53  ;;  %v1196_v53 = vld [vmem:[#allocation6 + $0x958] sm:$0xff]  ;;  %v1238_v52 = vld [vmem:[#allocation6 + $0xaa8] sm:$0xff] }
 0x284   : > { %v1966_v58 = vpack.c.bf16 %v1200_v55, %v1196_v53  ;;  %v1236_v53 = vld [vmem:[#allocation6 + $0xa98] sm:$0xff] }
 0x285   : > { %v1240_v55 = vld [vmem:[#allocation6 + $0xab8] sm:$0xff] }
 0x28d   : > { %v2087_v63 = vpop.eup %2086 }
 0x28e   : > { %v823_v4 = vmul.f32 %v2087_v63, %v2085_v62  ;;  %v1968_v62 = vpack.c.bf16 %v1199_v61, %v1195_v60  ;;  %v1202_v63 = vld [vmem:[#allocation6 + $0x988] sm:$0xff]  ;;  %v1235_v60 = vld [vmem:[#allocation6 + $0xa90] sm:$0xff] }
 0x28f   : > { %v1239_v61 = vld [vmem:[#allocation6 + $0xab0] sm:$0xff] }
 0x290   : > { %824 = vst [vmem:[#allocation2 + $0x2] sm:$0x3] %v823_v4  ;;  %1045 = vmatmul.mubr.f32.vlgmr.msra.gmra.mrb[4].mxu0 %v823_v4  ;;  %1116 = vmatmul.mubr.f32.vlgmr.msra.gmra.mrb[4].mxu1 %v823_v4  ;;  %v1201_v4 = vld [vmem:[#allocation6 + $0x980] sm:$0xff] }
 0x291   : > { %1885 = vmatpush1.bf16.msra.mxu0 %v1884_v0  ;;  %1949 = vmatpush1.bf16.msra.mxu1 %v1948_v1  ;;  %v1206_v0 = vld [vmem:[#allocation6 + $0x9a8] sm:$0xff]  ;;  %v1204_v1 = vld [vmem:[#allocation6 + $0x998] sm:$0xff] }
 0x292   : > { %1887 = vmatprep.subr.bf16.mxu0 %v1886_v5  ;;  %1951 = vmatprep.subr.bf16.mxu1 %v1950_v6  ;;  %v1906_v2 = vpack.c.bf16 %v1206_v0, %v1202_v63  ;;  %v1205_v5 = vld [vmem:[#allocation6 + $0x9a0] sm:$0xff]  ;;  %v1970_v6 = vpack.c.bf16 %v1208_v3, %v1204_v1  ;;  %v1242_v63 = vld [vmem:[#allocation6 + $0xac8] sm:$0xff]  ;;  %v1244_v1 = vld [vmem:[#allocation6 + $0xad8] sm:$0xff] }
 0x293   : > { %v1908_v7 = vpack.c.bf16 %v1205_v5, %v1201_v4  ;;  %v1246_v0 = vld [vmem:[#allocation6 + $0xae8] sm:$0xff]  ;;  %v1248_v3 = vld [vmem:[#allocation6 + $0xaf8] sm:$0xff]  ;;  %v1241_v4 = vld [vmem:[#allocation6 + $0xac0] sm:$0xff] }
 0x294   : > { %v1245_v5 = vld [vmem:[#allocation6 + $0xae0] sm:$0xff] }
 0x295   : > { %1889 = vmatpush1.bf16.msra.mxu0 %v1888_v13  ;;  %1953 = vmatpush1.bf16.msra.mxu1 %v1952_v14  ;;  %v1212_v13 = vld [vmem:[#allocation6 + $0x9d8] sm:$0xff]  ;;  %v1910_v14 = vpack.c.bf16 %v1214_v12, %v1210_v11  ;;  %v1250_v11 = vld [vmem:[#allocation6 + $0xb08] sm:$0xff] }
 0x296   : > { %1891 = vmatprep.subr.bf16.mxu0 %v1890_v17  ;;  %1955 = vmatprep.subr.bf16.mxu1 %v1954_v18  ;;  %v1213_v17 = vld [vmem:[#allocation6 + $0x9e0] sm:$0xff]  ;;  %v1974_v18 = vpack.c.bf16 %v1216_v15, %v1212_v13  ;;  %v1254_v12 = vld [vmem:[#allocation6 + $0xb28] sm:$0xff]  ;;  %v1256_v15 = vld [vmem:[#allocation6 + $0xb38] sm:$0xff] }
 0x297   : > { %v1912_v19 = vpack.c.bf16 %v1213_v17, %v1209_v16  ;;  %v1930_v13 = vpack.c.bf16 %v1254_v12, %v1250_v11  ;;  %v1249_v16 = vld [vmem:[#allocation6 + $0xb00] sm:$0xff] }
 0x299   : > { %1893 = vmatpush1.bf16.msra.mxu0 %v1892_v27  ;;  %1957 = vmatpush1.bf16.msra.mxu1 %v1956_v29  ;;  %v1220_v27 = vld [vmem:[#allocation6 + $0xa18] sm:$0xff]  ;;  %v1914_v29 = vpack.c.bf16 %v1222_v26, %v1218_v25  ;;  %v1258_v25 = vld [vmem:[#allocation6 + $0xb48] sm:$0xff] }
 0x29a   : > { %1895 = vmatprep.subr.bf16.mxu0 %v1894_v32  ;;  %1959 = vmatprep.subr.bf16.mxu1 %v1958_v33  ;;  %v1221_v32 = vld [vmem:[#allocation6 + $0xa20] sm:$0xff]  ;;  %v1978_v33 = vpack.c.bf16 %v1224_v30, %v1220_v27  ;;  %v1262_v26 = vld [vmem:[#allocation6 + $0xb68] sm:$0xff]  ;;  %v1260_v27 = vld [vmem:[#allocation6 + $0xb58] sm:$0xff] }
 0x29b   : > { %v1916_v34 = vpack.c.bf16 %v1221_v32, %v1217_v31  ;;  %v1264_v30 = vld [vmem:[#allocation6 + $0xb78] sm:$0xff]  ;;  %v1257_v31 = vld [vmem:[#allocation6 + $0xb40] sm:$0xff] }
 0x29c   : > { %v1261_v32 = vld [vmem:[#allocation6 + $0xb60] sm:$0xff] }
 0x29d   : > { %1897 = vmatpush1.bf16.msra.mxu0 %v1896_v41  ;;  %1961 = vmatpush1.bf16.msra.mxu1 %v1960_v42  ;;  %v1228_v41 = vld [vmem:[#allocation6 + $0xa58] sm:$0xff]  ;;  %v1918_v42 = vpack.c.bf16 %v1230_v40, %v1226_v39  ;;  %v2000_v39 = vpack.c.bf16 %v1263_v37, %v1259_v35  ;;  %v1270_v40 = vld [vmem:[#allocation6 + $0xba8] sm:$0xff] }
 0x29e   : > { %1899 = vmatprep.subr.bf16.mxu0 %v1898_v43  ;;  %1963 = vmatprep.subr.bf16.mxu1 %v1962_v44  ;;  %v1232_v43 = vld [vmem:[#allocation6 + $0xa78] sm:$0xff]  ;;  %v1225_v44 = vld [vmem:[#allocation6 + $0xa40] sm:$0xff]  ;;  %v1282_v35 = vld [vmem:[#allocation8 + $0x8] sm:$0xf] }
 0x29f   : > { %v1982_v47 = vpack.c.bf16 %v1232_v43, %v1228_v41  ;;  %v1920_v48 = vpack.c.bf16 %v1229_v45, %v1225_v44  ;;  %v1268_v41 = vld [vmem:[#allocation6 + $0xb98] sm:$0xff]  ;;  %v1265_v45 = vld [vmem:[#allocation6 + $0xb80] sm:$0xff]  ;;  %v1287_v37 = vrot.slane %v1282_v35, %v2384_v21 }
 0x2a1   : > { %1901 = vmatpush1.bf16.msra.mxu0 %v1900_v49  ;;  %1965 = vmatpush1.bf16.msra.mxu1 %v1964_v50  ;;  %v1227_v49 = vld [vmem:[#allocation6 + $0xa50] sm:$0xff] }
 0x2a2   : > { %1903 = vmatprep.subr.bf16.mxu0 %v1902_v54  ;;  %1967 = vmatprep.subr.bf16.mxu1 %v1966_v58  ;;  %v1984_v50 = vpack.c.bf16 %v1231_v46, %v1227_v49  ;;  %v1922_v54 = vpack.c.bf16 %v1238_v52, %v1234_v51  ;;  %v1986_v58 = vpack.c.bf16 %v1240_v55, %v1236_v53  ;;  %v1271_v46 = vld [vmem:[#allocation6 + $0xbb0] sm:$0xff]  ;;  %v1278_v51 = vld [vmem:[#allocation6 + $0xbe8] sm:$0xff]  ;;  %v1280_v55 = vld [vmem:[#allocation6 + $0xbf8] sm:$0xff] }
 0x2a5   : > { %1905 = vmatpush1.bf16.msra.mxu0 %v1904_v59  ;;  %1969 = vmatpush1.bf16.msra.mxu1 %v1968_v62  ;;  %v1924_v59 = vpack.c.bf16 %v1237_v57, %v1233_v56  ;;  %v1988_v62 = vpack.c.bf16 %v1239_v61, %v1235_v60  ;;  %v1273_v56 = vld [vmem:[#allocation6 + $0xbc0] sm:$0xff]  ;;  %v1279_v60 = vld [vmem:[#allocation6 + $0xbf0] sm:$0xff] }
 0x2a6   : > { %1907 = vmatprep.subr.bf16.mxu0 %v1906_v2  ;;  %1971 = vmatprep.subr.bf16.mxu1 %v1970_v6  ;;  %v1926_v2 = vpack.c.bf16 %v1246_v0, %v1242_v63  ;;  %v1990_v6 = vpack.c.bf16 %v1248_v3, %v1244_v1  ;;  %v1151_v61 = vld [vmem:[#allocation2 + $0x6] sm:$0x3]  ;;  %v958_v0 = vld [vmem:[#allocation8 + $0x4] sm:$0xf] }
 0x2a7   : > { %1368 = vmatprep.mubr.f32.mxu0 %v1151_v61  ;;  %1439 = vmatprep.mubr.f32.mxu1 %v1151_v61  ;;  %v963_v1 = vrot.slane %v958_v0, %v2384_v21  ;;  %v975_v11 = vrot.slane %v958_v0, %v2392_v28 }
 0x2a9   : > { %1909 = vmatpush1.bf16.msra.mxu0 %v1908_v7  ;;  %1973 = vmatpush1.bf16.msra.mxu1 %v1972_v10  ;;  %v1928_v7 = vpack.c.bf16 %v1245_v5, %v1241_v4  ;;  %v1992_v10 = vpack.c.bf16 %v1247_v9, %v1243_v8 }
 0x2aa   : > { %1911 = vmatprep.subr.bf16.mxu0 %v1910_v14  ;;  %1975 = vmatprep.subr.bf16.mxu1 %v1974_v18  ;;  %v1252_v14 = vld [vmem:[#allocation6 + $0xb18] sm:$0xff]  ;;  %v1253_v18 = vld [vmem:[#allocation6 + $0xb20] sm:$0xff] }
 0x2ab   : > { %v1994_v17 = vpack.c.bf16 %v1256_v15, %v1252_v14  ;;  %v1932_v22 = vpack.c.bf16 %v1253_v18, %v1249_v16 }
 0x2ad   : > { %1913 = vmatpush1.bf16.msra.mxu0 %v1912_v19  ;;  %1977 = vmatpush1.bf16.msra.mxu1 %v1976_v24  ;;  %v1251_v19 = vld [vmem:[#allocation6 + $0xb10] sm:$0xff] }
 0x2ae   : > { %1915 = vmatprep.subr.bf16.mxu0 %v1914_v29  ;;  %1979 = vmatprep.subr.bf16.mxu1 %v1978_v33  ;;  %v1996_v24 = vpack.c.bf16 %v1255_v20, %v1251_v19  ;;  %v1934_v29 = vpack.c.bf16 %v1262_v26, %v1258_v25  ;;  %v1998_v33 = vpack.c.bf16 %v1264_v30, %v1260_v27 }
 0x2b1   : > { %1917 = vmatpush1.bf16.msra.mxu0 %v1916_v34  ;;  %1981 = vmatpush1.bf16.msra.mxu1 %v1980_v38  ;;  %v1936_v34 = vpack.c.bf16 %v1261_v32, %v1257_v31  ;;  %v1266_v38 = vld [vmem:[#allocation6 + $0xb88] sm:$0xff] }
 0x2b2   : > { %1919 = vmatprep.subr.bf16.mxu0 %v1918_v42  ;;  %1983 = vmatprep.subr.bf16.mxu1 %v1982_v47  ;;  %v1272_v42 = vld [vmem:[#allocation6 + $0xbb8] sm:$0xff]  ;;  %v1938_v43 = vpack.c.bf16 %v1270_v40, %v1266_v38  ;;  %v1269_v47 = vld [vmem:[#allocation6 + $0xba0] sm:$0xff]  ;;  %v1291_v38 = vrot.slane %v1282_v35, %v2387_v23 }
 0x2b3   : > { %v2002_v44 = vpack.c.bf16 %v1272_v42, %v1268_v41  ;;  %v1940_v49 = vpack.c.bf16 %v1269_v47, %v1265_v45 }
 0x2b5   : > { %1921 = vmatpush1.bf16.msra.mxu0 %v1920_v48  ;;  %1985 = vmatpush1.bf16.msra.mxu1 %v1984_v50  ;;  %v1267_v48 = vld [vmem:[#allocation6 + $0xb90] sm:$0xff]  ;;  %v1274_v50 = vld [vmem:[#allocation6 + $0xbc8] sm:$0xff] }
 0x2b6   : > { %1923 = vmatprep.subr.bf16.mxu0 %v1922_v54  ;;  %1987 = vmatprep.subr.bf16.mxu1 %v1986_v58  ;;  %v2004_v52 = vpack.c.bf16 %v1271_v46, %v1267_v48  ;;  %v1942_v53 = vpack.c.bf16 %v1278_v51, %v1274_v50  ;;  %v1276_v54 = vld [vmem:[#allocation6 + $0xbd8] sm:$0xff]  ;;  %v1277_v58 = vld [vmem:[#allocation6 + $0xbe0] sm:$0xff]  ;;  %v1299_v48 = vrot.slane %v1282_v35, %v2392_v28 }
 0x2b7   : > { %v2006_v57 = vpack.c.bf16 %v1280_v55, %v1276_v54  ;;  %v1295_v46 = vrot.slane %v1282_v35, %v2396_v36 }
 0x2b9   : > { %1925 = vmatpush1.bf16.msra.mxu0 %v1924_v59  ;;  %1989 = vmatpush1.bf16.msra.mxu1 %v1988_v62  ;;  %v1275_v59 = vld [vmem:[#allocation6 + $0xbd0] sm:$0xff]  ;;  %v1944_v62 = vpack.c.bf16 %v1277_v58, %v1273_v56  ;;  %v1447_v56 = vld [vmem:[#allocation3 + $0x6] sm:$0x3] }
 0x2ba   : > { %1927 = vmatprep.subr.bf16.mxu0 %v1926_v2  ;;  %1991 = vmatprep.subr.bf16.mxu1 %v1990_v6  ;;  %v2008_v63 = vpack.c.bf16 %v1279_v60, %v1275_v59  ;;  %v967_v2 = vrot.slane %v958_v0, %v2387_v23 }
 0x2bd   : > { %1929 = vmatpush1.bf16.msra.mxu0 %v1928_v7  ;;  %1993 = vmatpush1.bf16.msra.mxu1 %v1992_v10 }
 0x2be   : > { %1931 = vmatprep.subr.bf16.mxu0 %v1930_v13  ;;  %1995 = vmatprep.subr.bf16.mxu1 %v1994_v17  ;;  %v971_v13 = vrot.slane %v958_v0, %v2396_v36 }
 0x2c1   : > { %1933 = vmatpush1.bf16.msra.mxu0 %v1932_v22  ;;  %1997 = vmatpush1.bf16.msra.mxu1 %v1996_v24  ;;  %v1123_v24 = vld [vmem:[#allocation3 + $0x4] sm:$0x3] }
 0x2c2   : > { %1935 = vmatprep.subr.bf16.mxu0 %v1934_v29  ;;  %1999 = vmatprep.subr.bf16.mxu1 %v1998_v33 }
 0x2c5   : > { %1937 = vmatpush1.bf16.msra.mxu0 %v1936_v34  ;;  %2001 = vmatpush1.bf16.msra.mxu1 %v2000_v39 }
 0x2c6   : > { %1939 = vmatprep.subr.bf16.mxu0 %v1938_v43  ;;  %2003 = vmatprep.subr.bf16.mxu1 %v2002_v44 }
 0x2c9   : > { %1941 = vmatpush1.bf16.msra.mxu0 %v1940_v49  ;;  %2005 = vmatpush1.bf16.msra.mxu1 %v2004_v52 }
 0x2ca   : > { %1943 = vmatprep.subr.bf16.mxu0 %v1942_v53  ;;  %2007 = vmatprep.subr.bf16.mxu1 %v2006_v57 }
 0x2cd   : > { %1945 = vmatpush1.bf16.msra.mxu0 %v1944_v62  ;;  %2009 = vmatpush1.bf16.msra.mxu1 %v2008_v63 }
 0x363   : > { %v1046_v3 = vpop.f32.mrb[4].mxu0  ;;  %v1117_v4 = vpop.f32.mrb[4].mxu1 }
 0x364   : > { %v1047_v5 = vadd.f32 %v1046_v3, %v963_v1  ;;  %v1048_v6 = vpop.f32.mrb[5].mxu0  ;;  %v1119_v7 = vpop.f32.mrb[5].mxu1  ;;  %v1118_v15 = vadd.f32 %v1117_v4, %v971_v13 }
 0x365   : > { %v1049_v8 = vadd.f32 %v1048_v6, %v967_v2  ;;  %v1120_v12 = vadd.f32 %v1119_v7, %v975_v11 }
 0x366   : > { %v1553_v9 = vmul.f32 -1.442695, %v1047_v5 }
 0x367   : > { %v1554_v10 = vmul.f32 -1.442695, %v1049_v8  ;;  %v1555_v14 = vmul.f32 -1.442695, %v1120_v12 }
 0x368   : > { %2088 = vpow2.f32 %v1553_v9 }
 0x369   : > { %2090 = vpow2.f32 %v1554_v10 }
 0x36a   : > { %2092 = vpow2.f32 %v1555_v14 }
 0x36b   : > { %2094 = vtanh.f32 %v1118_v15 }
 0x372   : > { %v2089_v16 = vpop.eup %2088 }
 0x373   : > { %v2091_v17 = vpop.eup %2090  ;;  %v1127_v18 = vadd.f32 1.0, %v2089_v16 }
 0x374   : > { %v1133_v19 = vadd.f32 1.0, %v2091_v17  ;;  %v2093_v20 = vpop.eup %2092 }
 0x375   : > { %2096 = vrcp.f32 %v1127_v18  ;;  %v2095_v22 = vpop.eup %2094  ;;  %v1140_v29 = vadd.f32 1.0, %v2093_v20 }
 0x376   : > { %2098 = vrcp.f32 %v1133_v19 }
 0x377   : > { %2100 = vrcp.f32 %v1140_v29 }
 0x37f   : > { %v2097_v25 = vpop.eup %2096 }
 0x380   : > { %v2099_v26 = vpop.eup %2098  ;;  %v1144_v27 = vmul.f32 %v2097_v25, %v2095_v22 }
 0x381   : > { %v1143_v30 = vmul.f32 %v2099_v26, %v1123_v24  ;;  %v2101_v32 = vpop.eup %2100 }
 0x383   : > { %v1145_v31 = vadd.f32 %v1144_v27, %v1143_v30 }
 0x385   : > { %1149 = vst [vmem:[#allocation3 + $0x4] sm:$0x3] %v1145_v31  ;;  %2102 = vtanh.f32 %v1145_v31 }
 0x38f   : > { %v2103_v33 = vpop.eup %2102 }
 0x390   : > { %v1147_v34 = vmul.f32 %v2103_v33, %v2101_v32 }
 0x392   : > { %1148 = vst [vmem:[#allocation2 + $0x4] sm:$0x3] %v1147_v34  ;;  %1369 = vmatmul.mubr.f32.vlgmr.msra.gmra.mrb[6].mxu0 %v1147_v34  ;;  %1440 = vmatmul.mubr.f32.vlgmr.msra.gmra.mrb[6].mxu1 %v1147_v34 }
 0x465   : > { %v1370_v39 = vpop.f32.mrb[6].mxu0  ;;  %v1441_v40 = vpop.f32.mrb[6].mxu1 }
 0x466   : > { %v1371_v41 = vadd.f32 %v1370_v39, %v1287_v37  ;;  %v1372_v42 = vpop.f32.mrb[7].mxu0  ;;  %v1443_v43 = vpop.f32.mrb[7].mxu1  ;;  %v1442_v51 = vadd.f32 %v1441_v40, %v1295_v46 }
 0x467   : > { %v1373_v44 = vadd.f32 %v1372_v42, %v1291_v38  ;;  %v1444_v49 = vadd.f32 %v1443_v43, %v1299_v48 }
 0x468   : > { %v1556_v45 = vmul.f32 -1.442695, %v1371_v41 }
 0x469   : > { %v1557_v47 = vmul.f32 -1.442695, %v1373_v44  ;;  %v1558_v50 = vmul.f32 -1.442695, %v1444_v49 }
 0x46a   : > { %2104 = vpow2.f32 %v1556_v45 }
 0x46b   : > { %2106 = vpow2.f32 %v1557_v47 }
 0x46c   : > { %2108 = vpow2.f32 %v1558_v50 }
 0x46d   : > { %2110 = vtanh.f32 %v1442_v51 }
 0x474   : > { %v2105_v21 = vpop.eup %2104 }
 0x475   : > { %v2107_v52 = vpop.eup %2106  ;;  %v1451_v23 = vadd.f32 1.0, %v2105_v21 }
 0x476   : > { %v1457_v53 = vadd.f32 1.0, %v2107_v52  ;;  %v2109_v54 = vpop.eup %2108 }
 0x477   : > { %2112 = vrcp.f32 %v1451_v23  ;;  %v2111_v55 = vpop.eup %2110  ;;  %v1464_v59 = vadd.f32 1.0, %v2109_v54 }
 0x478   : > { %2114 = vrcp.f32 %v1457_v53 }
 0x479   : > { %2116 = vrcp.f32 %v1464_v59 }
 0x481   : > { %v2113_v57 = vpop.eup %2112 }
 0x482   : > { %v2115_v28 = vpop.eup %2114  ;;  %v1468_v58 = vmul.f32 %v2113_v57, %v2111_v55 }
 0x483   : > { %v1467_v60 = vmul.f32 %v2115_v28, %v1447_v56  ;;  %v2117_v36 = vpop.eup %2116 }
 0x485   : > { %v1469_v61 = vadd.f32 %v1468_v58, %v1467_v60 }
 0x487   : > { %2118 = vtanh.f32 %v1469_v61  ;;  %1473 = vst [vmem:[#allocation3 + $0x6] sm:$0x3] %v1469_v61 }
 0x491   : > { %v2119_v62 = vpop.eup %2118 }
 0x492   : > { %v1471_v63 = vmul.f32 %v2119_v62, %v2117_v36 }
 0x494   : > { %1472 = vst [vmem:[#allocation2 + $0x6] sm:$0x3] %v1471_v63  ;;  %1474 = vst [vmem:[%s2417_s4] sm:$0x3] %v1471_v63 }
 0x495 PF: > { %s16_s15 = sadd.s32 1, %s2218_s15  }
 0x496   : > { %p13_p3 = scmp.ge.s32.totalorder %s16_s15, 6  }
 0x498   :  { %15 = sbr.rel (!%p13_p3) target bundleno = 2 (0x2), region = 89 }
 0x49f   :  { %1486 = vsyncpa [#allocation5], 1 }
 0x4a0   :  { %1488 = vsyncpa [#allocation5 + $0x1], 1 }
 0x4a1   :  { %1489 = vsyncpa [#allocation7], 1 }

// kernel: net_forward.7
= control target key start
LH: loop header
LB: loop body
LE: loop exit
PB: predicated region body
PF: predicated region fallthrough
CT: control target
= control target key end

     0   :  { %s4313_s0 = inlined_call_operand.vmem [shape: f32[2,128], index: 0, kind: input, shape index: {}]   ;;  %s4314_s1 = inlined_call_operand.vmem [shape: f32[128,1024], index: 1, kind: input, shape index: {}]   ;;  %s4315_s2 = inlined_call_operand.hbm [shape: f32[1,1024], index: 2, kind: input, shape index: {}]   ;;  %s4316_s3 = inlined_call_operand.hbm [shape: f32[1024,512], index: 3, kind: input, shape index: {}]   ;;  %s4317_s4 = inlined_call_operand.hbm [shape: f32[1,512], index: 4, kind: input, shape index: {}]   ;;  %s4318_s5 = inlined_call_operand.vmem [shape: f32[512,256], index: 5, kind: input, shape index: {}]   ;;  %s4319_s6 = inlined_call_operand.hbm [shape: f32[1,256], index: 6, kind: input, shape index: {}]   ;;  %s4320_s7 = inlined_call_operand.hbm [shape: f32[256,128], index: 7, kind: input, shape index: {}]   ;;  %s4321_s8 = inlined_call_operand.hbm [shape: f32[1,128], index: 8, kind: input, shape index: {}]   ;;  %s4322_s9 = inlined_call_operand.vmem [shape: f32[128,1], index: 9, kind: input, shape index: {}]   ;;  %s4323_s10 = inlined_call_operand.<no memory space> [shape: f32[1,1], index: 10, kind: input, shape index: {}]   ;;  %s4324_s11 = inlined_call_operand.vmem [shape: f32[2,1], index: 11, kind: output, shape index: {}]  }
   0x1   :  { %v16_v0 = vstv %s4323_s10 }
   0x2   :  { %17 = vst [vmem:[#allocation2] sm:$0x1] %v16_v0 }
   0x3   :  { %18 = vsyncpa [#allocation4], 0 }
   0x4   :  { %19 = vsyncpa [#allocation6], 0 }
   0x5   :  { %20 = vsyncpa [#allocation9], 0 }
   0x6   :  { %21 = vsyncpa [#allocation12], 0  ;;  %s3268_s19 = smov [#allocation5]   ;;  %s3128_s23 = scalar_lea.hbm %s4316_s3, 65536 }
   0x7   :  { %s41_s20 = sshll.u32 %s3268_s19, 4  ;;  %p3129_p0 = scmp.ne.s32.totalorder %s4316_s3, %s3128_s23  ;;  %s42_s20 = int_to_ptr.vmem [resolvable:$true] %s41_s20 }
   0x8   :  { %p3132_p1 = scmp.lt.u32.totalorder %s3128_s23, %s4316_s3 }
   0xa   :  { %p3134_p2 = pnand %p3132_p1, %p3129_p0 }
   0xc   :  { %3137 = shalt.err (!%p3134_p2)
}
   0xd   :  { %s3138_s10 = scalar_lea.vmem %s42_s20, 65536  ;;  %p3143_p4 = scmp.lt.s32.totalorder %s42_s20, %s42_s20 }
   0xe   :  { %p3139_p3 = scmp.ne.s32.totalorder %s42_s20, %s3138_s10  ;;  %p3144_p5 = scmp.lt.s32.totalorder %s3138_s10, %s3138_s10 }
  0x10   :  { %p3145_p6 = por %p3144_p5, %p3143_p4 }
  0x12   :  { %p3146_p7 = pnand %p3145_p6, %p3139_p3 }
  0x14   :  { %3149 = shalt.err (!%p3146_p7)
}
  0x15   :  { %s3269_s28 = smov 512   ;;  %s3270_s29 = smov 32  }
  0x16   :  { %47 = dma.hbm_to_vmem [thread:$0]  %s4316_s3, 65536, %s42_s20, [#allocation6], %s3269_s28, %s3269_s28, %s3270_s29  }
  0x17   :  { %s3271_s13 = smov [#allocation8]   ;;  %s3272_s15 = smov [#allocation3]  }
  0x18   :  { %s66_s14 = sshll.u32 %s3271_s13, 4  ;;  %s32_s16 = sshll.u32 %s3272_s15, 4  ;;  %s67_s14 = int_to_ptr.vmem [resolvable:$true] %s66_s14  ;;  %s33_s16 = int_to_ptr.vmem [resolvable:$true] %s32_s16 }
  0x19   :  { %s3150_s19 = scalar_lea.hbm %s4319_s6, 32 }
  0x1a   :  { %p3151_p8 = scmp.ne.s32.totalorder %s4319_s6, %s3150_s19  ;;  %p3154_p9 = scmp.lt.u32.totalorder %s3150_s19, %s4319_s6 }
  0x1c   :  { %p3156_p10 = pnand %p3154_p9, %p3151_p8 }
  0x1e   :  { %3159 = shalt.err (!%p3156_p10)
}
  0x1f   :  { %s3160_s3 = scalar_lea.vmem %s67_s14, 32  ;;  %p3165_p12 = scmp.lt.s32.totalorder %s67_s14, %s67_s14 }
  0x20   :  { %p3161_p11 = scmp.ne.s32.totalorder %s67_s14, %s3160_s3  ;;  %p3166_p13 = scmp.lt.s32.totalorder %s3160_s3, %s3160_s3 }
  0x22   :  { %p3167_p0 = por %p3166_p13, %p3165_p12 }
  0x24   :  { %p3168_p1 = pnand %p3167_p0, %p3161_p11 }
  0x26   :  { %3171 = shalt.err (!%p3168_p1)
}
  0x27   :  { %69 = dma.hbm_to_vmem [thread:$0]  %s4319_s6, 32, %s67_s14, [#allocation9]  }
  0x28   :  { %s3172_s10 = scalar_lea.hbm %s4315_s2, 128 }
  0x29   :  { %p3173_p2 = scmp.ne.s32.totalorder %s4315_s2, %s3172_s10  ;;  %p3176_p3 = scmp.lt.u32.totalorder %s3172_s10, %s4315_s2 }
  0x2b   :  { %p3178_p4 = pnand %p3176_p3, %p3173_p2 }
  0x2d   :  { %3181 = shalt.err (!%p3178_p4)
}
  0x2e   :  { %s3182_s13 = scalar_lea.vmem %s33_s16, 128  ;;  %p3187_p6 = scmp.lt.s32.totalorder %s33_s16, %s33_s16 }
  0x2f   :  { %p3183_p5 = scmp.ne.s32.totalorder %s33_s16, %s3182_s13  ;;  %p3188_p7 = scmp.lt.s32.totalorder %s3182_s13, %s3182_s13 }
  0x31   :  { %p3189_p8 = por %p3188_p7, %p3187_p6 }
  0x33   :  { %p3190_p9 = pnand %p3189_p8, %p3183_p5 }
  0x35   :  { %3193 = shalt.err (!%p3190_p9)
}
  0x36   :  { %35 = dma.hbm_to_vmem [thread:$0]  %s4315_s2, 128, %s33_s16, [#allocation4]  }
  0x37   :  { %s3273_s15 = smov [#allocation7]   ;;  %s3274_s18 = smov [#allocation10]  }
  0x38   :  { %s54_s17 = sshll.u32 %s3273_s15, 4  ;;  %s75_s19 = sshll.u32 %s3274_s18, 4  ;;  %s55_s17 = int_to_ptr.vmem [resolvable:$true] %s54_s17  ;;  %s76_s19 = int_to_ptr.vmem [resolvable:$true] %s75_s19 }
  0x39   :  { %s3194_s23 = scalar_lea.hbm %s4317_s4, 64 }
  0x3a   :  { %p3195_p10 = scmp.ne.s32.totalorder %s4317_s4, %s3194_s23  ;;  %p3198_p11 = scmp.lt.u32.totalorder %s3194_s23, %s4317_s4 }
  0x3c   :  { %p3200_p12 = pnand %p3198_p11, %p3195_p10 }
  0x3e   :  { %3203 = shalt.err (!%p3200_p12)
}
  0x3f   :  { %s3204_s2 = scalar_lea.vmem %s55_s17, 64  ;;  %p3209_p0 = scmp.lt.s32.totalorder %s55_s17, %s55_s17 }
  0x40   :  { %p3205_p13 = scmp.ne.s32.totalorder %s55_s17, %s3204_s2  ;;  %p3210_p1 = scmp.lt.s32.totalorder %s3204_s2, %s3204_s2 }
  0x42   :  { %p3211_p2 = por %p3210_p1, %p3209_p0 }
  0x44   :  { %p3212_p3 = pnand %p3211_p2, %p3205_p13 }
  0x46   :  { %3215 = shalt.err (!%p3212_p3)
}
  0x47   :  { %57 = dma.hbm_to_vmem [thread:$0]  %s4317_s4, 64, %s55_s17, [#allocation6]  }
  0x48   :  { %s3216_s28 = scalar_lea.hbm %s4320_s7, 4096 }
  0x49   :  { %p3217_p4 = scmp.ne.s32.totalorder %s4320_s7, %s3216_s28  ;;  %p3220_p5 = scmp.lt.u32.totalorder %s3216_s28, %s4320_s7 }
  0x4b   :  { %p3222_p6 = pnand %p3220_p5, %p3217_p4 }
  0x4d   :  { %3225 = shalt.err (!%p3222_p6)
}
  0x4e   :  { %s3226_s6 = scalar_lea.vmem %s76_s19, 4096  ;;  %p3231_p8 = scmp.lt.s32.totalorder %s76_s19, %s76_s19 }
  0x4f   :  { %p3227_p7 = scmp.ne.s32.totalorder %s76_s19, %s3226_s6  ;;  %p3232_p9 = scmp.lt.s32.totalorder %s3226_s6, %s3226_s6 }
  0x51   :  { %p3233_p10 = por %p3232_p9, %p3231_p8 }
  0x53   :  { %p3234_p11 = pnand %p3233_p10, %p3227_p7 }
  0x55   :  { %3237 = shalt.err (!%p3234_p11)
}
  0x56   :  { %s3275_s4 = smov 128   ;;  %s3276_s14 = smov 8  }
  0x57   :  { %81 = dma.hbm_to_vmem [thread:$0]  %s4320_s7, 4096, %s76_s19, [#allocation9], %s3275_s4, %s3275_s4, %s3276_s14  }
  0x58   :  { %s3277_s18 = smov [#allocation11]   ;;  %s3238_s24 = scalar_lea.hbm %s4321_s8, 16 }
  0x59   :  { %s88_s21 = sshll.u32 %s3277_s18, 4  ;;  %p3239_p12 = scmp.ne.s32.totalorder %s4321_s8, %s3238_s24  ;;  %s89_s21 = int_to_ptr.vmem [resolvable:$true] %s88_s21 }
  0x5a   :  { %p3242_p13 = scmp.lt.u32.totalorder %s3238_s24, %s4321_s8 }
  0x5c   :  { %p3244_p0 = pnand %p3242_p13, %p3239_p12 }
  0x5e   :  { %3247 = shalt.err (!%p3244_p0)
}
  0x5f   :  { %s3248_s16 = scalar_lea.vmem %s89_s21, 16  ;;  %s3252_s7 = scalar_lea.vmem %s89_s21, 32 }
  0x60   :  { %p3249_p1 = scmp.ne.s32.totalorder %s89_s21, %s3248_s16  ;;  %p3253_p2 = scmp.lt.s32.totalorder %s89_s21, %s89_s21 }
  0x61   :  { %p3254_p3 = scmp.lt.s32.totalorder %s3252_s7, %s3248_s16 }
  0x63   :  { %p3255_p4 = por %p3254_p3, %p3253_p2 }
  0x65   :  { %p3256_p5 = pnand %p3255_p4, %p3249_p1 }
  0x67   :  { %3259 = shalt.err (!%p3256_p5)
}
  0x68   :  { %91 = dma.hbm_to_vmem [thread:$0]  %s4321_s8, 16, %s89_s21, [#allocation12]  }
  0x69   :  { %3260 = dma.done.wait [#allocation4], 128  }
  0x6a   :  { %3261 = vsyncadd [#allocation4], 4294967168 }
  0x6b   :  { %3262 = dma.done.wait [#allocation6], 65600  }
  0x6c   :  { %3263 = vsyncadd [#allocation6], 4294901696 }
  0x6d   :  { %3264 = dma.done.wait [#allocation9], 4128  }
  0x6e   :  { %3265 = vsyncadd [#allocation9], 4294963168 }
  0x6f   :  { %3266 = dma.done.wait [#allocation12], 16  }
  0x70   :  { %3267 = vsyncadd [#allocation12], 4294967280  ;;  %v3278_v1 = vmov 0.0   ;;  %v116_v2 = vld [vmem:[%s4314_s1 + $0x8] sm:$0xff]  ;;  %v115_v4 = vld [vmem:[%s4314_s1] sm:$0xff]  ;;  %vm3280_vm0 = vmmov 0  }
  0x71   :  { %349 = vmatprep.mubr.f32.mxu1 %v3278_v1  ;;  %491 = vmatprep.mubr.f32.mxu0 %v3278_v1  ;;  %v124_v3 = vld [vmem:[%s4314_s1 + $0x48] sm:$0xff]  ;;  %v123_v6 = vld [vmem:[%s4314_s1 + $0x40] sm:$0xff]  ;;  %v118_v62 = vld [vmem:[%s4314_s1 + $0x18] sm:$0xff]  ;;  %vm2171_vm1 = vcmask 1024  }
  0x72   :  { %v2270_v5 = vpack.c.bf16 %v124_v3, %v116_v2  ;;  %v132_v7 = vld [vmem:[%s4314_s1 + $0x88] sm:$0xff]  ;;  %v2272_v9 = vpack.c.bf16 %v123_v6, %v115_v4  ;;  %v131_v11 = vld [vmem:[%s4314_s1 + $0x80] sm:$0xff]  ;;  %v126_v63 = vld [vmem:[%s4314_s1 + $0x58] sm:$0xff] }
  0x73   :  { %v140_v8 = vld [vmem:[%s4314_s1 + $0xc8] sm:$0xff]  ;;  %v139_v12 = vld [vmem:[%s4314_s1 + $0xc0] sm:$0xff] }
  0x74   :  { %v2274_v10 = vpack.c.bf16 %v140_v8, %v132_v7  ;;  %v148_v13 = vld [vmem:[%s4314_s1 + $0x108] sm:$0xff]  ;;  %2271 = vmatprep.subr.bf16.mxu1 %v2270_v5  ;;  %v2276_v15 = vpack.c.bf16 %v139_v12, %v131_v11  ;;  %v147_v17 = vld [vmem:[%s4314_s1 + $0x100] sm:$0xff]  ;;  %v2302_v8 = vpack.c.bf16 %v126_v63, %v118_v62  ;;  %v134_v11 = vld [vmem:[%s4314_s1 + $0x98] sm:$0xff] }
  0x75   :  { %v156_v14 = vld [vmem:[%s4314_s1 + $0x148] sm:$0xff]  ;;  %2273 = vmatpush1.bf16.msra.mxu1 %v2272_v9  ;;  %v155_v18 = vld [vmem:[%s4314_s1 + $0x140] sm:$0xff]  ;;  %v117_v9 = vld [vmem:[%s4314_s1 + $0x10] sm:$0xff] }
  0x76   :  { %2275 = vmatprep.subr.bf16.mxu1 %v2274_v10  ;;  %v2278_v16 = vpack.c.bf16 %v156_v14, %v148_v13  ;;  %v164_v19 = vld [vmem:[%s4314_s1 + $0x188] sm:$0xff]  ;;  %v2280_v21 = vpack.c.bf16 %v155_v18, %v147_v17  ;;  %v163_v23 = vld [vmem:[%s4314_s1 + $0x180] sm:$0xff]  ;;  %v125_v10 = vld [vmem:[%s4314_s1 + $0x50] sm:$0xff] }
  0x77   :  { %v172_v20 = vld [vmem:[%s4314_s1 + $0x1c8] sm:$0xff]  ;;  %v171_v24 = vld [vmem:[%s4314_s1 + $0x1c0] sm:$0xff]  ;;  %v142_v12 = vld [vmem:[%s4314_s1 + $0xd8] sm:$0xff]  ;;  %v2304_v18 = vpack.c.bf16 %v125_v10, %v117_v9 }
  0x78   :  { %v2282_v22 = vpack.c.bf16 %v172_v20, %v164_v19  ;;  %v180_v25 = vld [vmem:[%s4314_s1 + $0x208] sm:$0xff]  ;;  %v2284_v27 = vpack.c.bf16 %v171_v24, %v163_v23  ;;  %v179_v29 = vld [vmem:[%s4314_s1 + $0x200] sm:$0xff]  ;;  %v141_v23 = vld [vmem:[%s4314_s1 + $0xd0] sm:$0xff] }
  0x79   :  { %2277 = vmatpush1.bf16.msra.mxu1 %v2276_v15  ;;  %v188_v26 = vld [vmem:[%s4314_s1 + $0x248] sm:$0xff]  ;;  %v187_v30 = vld [vmem:[%s4314_s1 + $0x240] sm:$0xff]  ;;  %v150_v24 = vld [vmem:[%s4314_s1 + $0x118] sm:$0xff] }
  0x7a   :  { %2279 = vmatprep.subr.bf16.mxu1 %v2278_v16  ;;  %v2286_v28 = vpack.c.bf16 %v188_v26, %v180_v25  ;;  %v196_v31 = vld [vmem:[%s4314_s1 + $0x288] sm:$0xff]  ;;  %v2288_v33 = vpack.c.bf16 %v187_v30, %v179_v29  ;;  %v195_v35 = vld [vmem:[%s4314_s1 + $0x280] sm:$0xff]  ;;  %v158_v25 = vld [vmem:[%s4314_s1 + $0x158] sm:$0xff] }
  0x7b   :  { %v204_v32 = vld [vmem:[%s4314_s1 + $0x2c8] sm:$0xff]  ;;  %v203_v36 = vld [vmem:[%s4314_s1 + $0x2c0] sm:$0xff]  ;;  %v214_v9 = vld [vmem:[%s4314_s1 + $0x318] sm:$0xff] }
  0x7c   :  { %v2290_v34 = vpack.c.bf16 %v204_v32, %v196_v31  ;;  %v212_v37 = vld [vmem:[%s4314_s1 + $0x308] sm:$0xff]  ;;  %v2292_v39 = vpack.c.bf16 %v203_v36, %v195_v35  ;;  %v211_v40 = vld [vmem:[%s4314_s1 + $0x300] sm:$0xff]  ;;  %v157_v35 = vld [vmem:[%s4314_s1 + $0x150] sm:$0xff] }
  0x7d   :  { %2281 = vmatpush1.bf16.msra.mxu1 %v2280_v21  ;;  %v220_v38 = vld [vmem:[%s4314_s1 + $0x348] sm:$0xff]  ;;  %v219_v41 = vld [vmem:[%s4314_s1 + $0x340] sm:$0xff]  ;;  %v2306_v21 = vpack.c.bf16 %v142_v12, %v134_v11  ;;  %v166_v36 = vld [vmem:[%s4314_s1 + $0x198] sm:$0xff] }
  0x7e   :  { %2283 = vmatprep.subr.bf16.mxu1 %v2282_v22  ;;  %v2294_v42 = vpack.c.bf16 %v220_v38, %v212_v37  ;;  %v228_v43 = vld [vmem:[%s4314_s1 + $0x388] sm:$0xff]  ;;  %v119_v47 = vld [vmem:[%s4314_s1 + $0x20] sm:$0xff]  ;;  %v2296_v54 = vpack.c.bf16 %v219_v41, %v211_v40  ;;  %v133_v22 = vld [vmem:[%s4314_s1 + $0x90] sm:$0xff] }
  0x7f   :  { %v236_v44 = vld [vmem:[%s4314_s1 + $0x3c8] sm:$0xff]  ;;  %v127_v48 = vld [vmem:[%s4314_s1 + $0x60] sm:$0xff]  ;;  %v2308_v30 = vpack.c.bf16 %v141_v23, %v133_v22  ;;  %v174_v37 = vld [vmem:[%s4314_s1 + $0x1d8] sm:$0xff] }
  0x80   :  { %v120_v45 = vld [vmem:[%s4314_s1 + $0x28] sm:$0xff]  ;;  %v2336_v50 = vpack.c.bf16 %v127_v48, %v119_v47  ;;  %v135_v53 = vld [vmem:[%s4314_s1 + $0xa0] sm:$0xff]  ;;  %v2298_v59 = vpack.c.bf16 %v236_v44, %v228_v43  ;;  %v173_v47 = vld [vmem:[%s4314_s1 + $0x1d0] sm:$0xff] }
  0x81   :  { %2285 = vmatpush1.bf16.msra.mxu1 %v2284_v27  ;;  %v128_v46 = vld [vmem:[%s4314_s1 + $0x68] sm:$0xff]  ;;  %v143_v56 = vld [vmem:[%s4314_s1 + $0xe0] sm:$0xff]  ;;  %v182_v48 = vld [vmem:[%s4314_s1 + $0x218] sm:$0xff] }
  0x82   :  { %2287 = vmatprep.subr.bf16.mxu1 %v2286_v28  ;;  %v2334_v49 = vpack.c.bf16 %v128_v46, %v120_v45  ;;  %v136_v51 = vld [vmem:[%s4314_s1 + $0xa8] sm:$0xff]  ;;  %v227_v60 = vld [vmem:[%s4314_s1 + $0x380] sm:$0xff]  ;;  %v2340_v0 = vpack.c.bf16 %v143_v56, %v135_v53  ;;  %v2314_v45 = vpack.c.bf16 %v174_v37, %v166_v36  ;;  %v165_v46 = vld [vmem:[%s4314_s1 + $0x190] sm:$0xff] }
  0x83   :  { %v144_v52 = vld [vmem:[%s4314_s1 + $0xe8] sm:$0xff]  ;;  %v235_v61 = vld [vmem:[%s4314_s1 + $0x3c0] sm:$0xff]  ;;  %v222_v10 = vld [vmem:[%s4314_s1 + $0x358] sm:$0xff] }
  0x84   :  { %v2338_v55 = vpack.c.bf16 %v144_v52, %v136_v51  ;;  %v152_v57 = vld [vmem:[%s4314_s1 + $0x128] sm:$0xff]  ;;  %2335 = vmatprep.subr.bf16.mxu0 %v2334_v49  ;;  %v151_v3 = vld [vmem:[%s4314_s1 + $0x120] sm:$0xff]  ;;  %v2300_v5 = vpack.c.bf16 %v235_v61, %v227_v60  ;;  %v190_v49 = vld [vmem:[%s4314_s1 + $0x258] sm:$0xff] }
  0x85   :  { %2289 = vmatpush1.bf16.msra.mxu1 %v2288_v33  ;;  %v160_v58 = vld [vmem:[%s4314_s1 + $0x168] sm:$0xff]  ;;  %2337 = vmatpush1.bf16.msra.mxu0 %v2336_v50  ;;  %v159_v4 = vld [vmem:[%s4314_s1 + $0x160] sm:$0xff]  ;;  %v2310_v33 = vpack.c.bf16 %v158_v25, %v150_v24  ;;  %v198_v60 = vld [vmem:[%s4314_s1 + $0x298] sm:$0xff] }
  0x86   :  { %2291 = vmatprep.subr.bf16.mxu1 %v2290_v34  ;;  %2339 = vmatprep.subr.bf16.mxu0 %v2338_v55  ;;  %v2342_v2 = vpack.c.bf16 %v160_v58, %v152_v57  ;;  %v168_v6 = vld [vmem:[%s4314_s1 + $0x1a8] sm:$0xff]  ;;  %v2344_v13 = vpack.c.bf16 %v159_v4, %v151_v3  ;;  %v167_v15 = vld [vmem:[%s4314_s1 + $0x1a0] sm:$0xff]  ;;  %v149_v34 = vld [vmem:[%s4314_s1 + $0x110] sm:$0xff]  ;;  %v2318_v57 = vpack.c.bf16 %v190_v49, %v182_v48 }
  0x87   :  { %v176_v7 = vld [vmem:[%s4314_s1 + $0x1e8] sm:$0xff]  ;;  %v175_v16 = vld [vmem:[%s4314_s1 + $0x1e0] sm:$0xff]  ;;  %v181_v58 = vld [vmem:[%s4314_s1 + $0x210] sm:$0xff] }
  0x88   :  { %v2346_v14 = vpack.c.bf16 %v176_v7, %v168_v6  ;;  %v3583_v17 = vld [vmem:[%s4313_s0] sm:$0x3]  ;;  %v184_v19 = vld [vmem:[%s4314_s1 + $0x228] sm:$0xff]  ;;  %v2348_v26 = vpack.c.bf16 %v175_v16, %v167_v15  ;;  %v206_v61 = vld [vmem:[%s4314_s1 + $0x2d8] sm:$0xff] }
  0x89   :  { %2293 = vmatpush1.bf16.msra.mxu1 %v2292_v39  ;;  %2341 = vmatpush1.bf16.msra.mxu0 %v2340_v0  ;;  %v192_v20 = vld [vmem:[%s4314_s1 + $0x268] sm:$0xff]  ;;  %v183_v28 = vld [vmem:[%s4314_s1 + $0x220] sm:$0xff]  ;;  %v578_v4 = vld [vmem:[#allocation5 + $0x8] sm:$0xff]  ;;  %v2322_v6 = vpack.c.bf16 %v206_v61, %v198_v60 }
  0x8a   :  { %2295 = vmatprep.subr.bf16.mxu1 %v2294_v42  ;;  %2343 = vmatprep.subr.bf16.mxu0 %v2342_v2  ;;  %v2350_v27 = vpack.c.bf16 %v192_v20, %v184_v19  ;;  %v191_v29 = vld [vmem:[%s4314_s1 + $0x260] sm:$0xff]  ;;  %v200_v31 = vld [vmem:[%s4314_s1 + $0x2a8] sm:$0xff]  ;;  %v2312_v42 = vpack.c.bf16 %v157_v35, %v149_v34  ;;  %v197_v7 = vld [vmem:[%s4314_s1 + $0x290] sm:$0xff]  ;;  %v2326_v19 = vpack.c.bf16 %v222_v10, %v214_v9 }
  0x8b   :  { %v208_v32 = vld [vmem:[%s4314_s1 + $0x2e8] sm:$0xff]  ;;  %v2352_v38 = vpack.c.bf16 %v191_v29, %v183_v28  ;;  %v199_v40 = vld [vmem:[%s4314_s1 + $0x2a0] sm:$0xff]  ;;  %v586_v16 = vld [vmem:[#allocation5 + $0x48] sm:$0xff] }
  0x8c   :  { %v2354_v39 = vpack.c.bf16 %v208_v32, %v200_v31  ;;  %v207_v41 = vld [vmem:[%s4314_s1 + $0x2e0] sm:$0xff]  ;;  %v216_v43 = vld [vmem:[%s4314_s1 + $0x328] sm:$0xff]  ;;  %v213_v20 = vld [vmem:[%s4314_s1 + $0x310] sm:$0xff] }
  0x8d   :  { %2297 = vmatpush1.bf16.msra.mxu1 %v2296_v54  ;;  %2345 = vmatpush1.bf16.msra.mxu0 %v2344_v13  ;;  %v224_v44 = vld [vmem:[%s4314_s1 + $0x368] sm:$0xff]  ;;  %v2356_v50 = vpack.c.bf16 %v207_v41, %v199_v40  ;;  %v215_v52 = vld [vmem:[%s4314_s1 + $0x320] sm:$0xff]  ;;  %v2316_v54 = vpack.c.bf16 %v173_v47, %v165_v46  ;;  %v230_v22 = vld [vmem:[%s4314_s1 + $0x398] sm:$0xff] }
  0x8e   :  { %2299 = vmatprep.subr.bf16.mxu1 %v2298_v59  ;;  %2347 = vmatprep.subr.bf16.mxu0 %v2346_v14  ;;  %v2358_v51 = vpack.c.bf16 %v224_v44, %v216_v43  ;;  %v223_v53 = vld [vmem:[%s4314_s1 + $0x360] sm:$0xff]  ;;  %v232_v55 = vld [vmem:[%s4314_s1 + $0x3a8] sm:$0xff]  ;;  %v189_v59 = vld [vmem:[%s4314_s1 + $0x250] sm:$0xff] }
  0x8f   :  { %v240_v56 = vld [vmem:[%s4314_s1 + $0x3e8] sm:$0xff]  ;;  %v2360_v62 = vpack.c.bf16 %v223_v53, %v215_v52  ;;  %v231_v0 = vld [vmem:[%s4314_s1 + $0x3a0] sm:$0xff]  ;;  %v2320_v3 = vpack.c.bf16 %v189_v59, %v181_v58  ;;  %v238_v23 = vld [vmem:[%s4314_s1 + $0x3d8] sm:$0xff] }
  0x90   :  { %v2362_v63 = vpack.c.bf16 %v240_v56, %v232_v55  ;;  %v239_v2 = vld [vmem:[%s4314_s1 + $0x3e0] sm:$0xff]  ;;  %v577_v13 = vld [vmem:[#allocation5] sm:$0xff]  ;;  %v594_v29 = vld [vmem:[#allocation5 + $0x88] sm:$0xff]  ;;  %v2330_v31 = vpack.c.bf16 %v238_v23, %v230_v22 }
  0x91   :  { %2301 = vmatpush1.bf16.msra.mxu1 %v2300_v5  ;;  %2349 = vmatpush1.bf16.msra.mxu0 %v2348_v26  ;;  %v582_v5 = vld [vmem:[#allocation5 + $0x28] sm:$0xff]  ;;  %v2364_v11 = vpack.c.bf16 %v239_v2, %v231_v0  ;;  %v581_v14 = vld [vmem:[#allocation5 + $0x20] sm:$0xff] }
  0x92   :  { %2303 = vmatprep.subr.bf16.mxu1 %v2302_v8  ;;  %2351 = vmatprep.subr.bf16.mxu0 %v2350_v27  ;;  %v205_v8 = vld [vmem:[%s4314_s1 + $0x2d0] sm:$0xff]  ;;  %v2398_v12 = vpack.c.bf16 %v582_v5, %v578_v4  ;;  %v2400_v24 = vpack.c.bf16 %v581_v14, %v577_v13  ;;  %v122_v34 = vld [vmem:[%s4314_s1 + $0x38] sm:$0xff] }
  0x93   :  { %v2324_v15 = vpack.c.bf16 %v205_v8, %v197_v7  ;;  %v585_v26 = vld [vmem:[#allocation5 + $0x40] sm:$0xff]  ;;  %v130_v35 = vld [vmem:[%s4314_s1 + $0x78] sm:$0xff] }
  0x94   :  { %350 = vmatmul.mubr.f32.vlgmr.msra.gmra.mrb[0].mxu1 %v3583_v17  ;;  %v589_v27 = vld [vmem:[#allocation5 + $0x60] sm:$0xff]  ;;  %v602_v41 = vld [vmem:[#allocation5 + $0xc8] sm:$0xff]  ;;  %v2366_v43 = vpack.c.bf16 %v130_v35, %v122_v34 }
  0x95   :  { %2305 = vmatpush1.bf16.msra.mxu1 %v2304_v18  ;;  %420 = vmatprep.mubr.f32.mxu1 %v3278_v1  ;;  %v590_v18 = vld [vmem:[#allocation5 + $0x68] sm:$0xff]  ;;  %v2404_v36 = vpack.c.bf16 %v589_v27, %v585_v26 }
  0x96   :  { %2307 = vmatprep.subr.bf16.mxu1 %v2306_v21  ;;  %2353 = vmatpush1.bf16.msra.mxu0 %v2352_v38  ;;  %v221_v21 = vld [vmem:[%s4314_s1 + $0x350] sm:$0xff]  ;;  %v2402_v25 = vpack.c.bf16 %v590_v18, %v586_v16  ;;  %v138_v46 = vld [vmem:[%s4314_s1 + $0xb8] sm:$0xff] }
  0x97   :  { %2355 = vmatprep.subr.bf16.mxu0 %v2354_v39  ;;  %v2328_v28 = vpack.c.bf16 %v221_v21, %v213_v20  ;;  %v229_v32 = vld [vmem:[%s4314_s1 + $0x390] sm:$0xff]  ;;  %v146_v47 = vld [vmem:[%s4314_s1 + $0xf8] sm:$0xff] }
  0x98   :  { %v593_v38 = vld [vmem:[#allocation5 + $0x80] sm:$0xff]  ;;  %v610_v53 = vld [vmem:[#allocation5 + $0x108] sm:$0xff]  ;;  %v2370_v55 = vpack.c.bf16 %v146_v47, %v138_v46 }
  0x99   :  { %2309 = vmatpush1.bf16.msra.mxu1 %v2308_v30  ;;  %v598_v30 = vld [vmem:[#allocation5 + $0xa8] sm:$0xff]  ;;  %v597_v39 = vld [vmem:[#allocation5 + $0xa0] sm:$0xff] }
  0x9a   :  { %2311 = vmatprep.subr.bf16.mxu1 %v2310_v33  ;;  %2357 = vmatpush1.bf16.msra.mxu0 %v2356_v50  ;;  %v237_v33 = vld [vmem:[%s4314_s1 + $0x3d0] sm:$0xff]  ;;  %v2406_v37 = vpack.c.bf16 %v598_v30, %v594_v29  ;;  %v2408_v48 = vpack.c.bf16 %v597_v39, %v593_v38  ;;  %v154_v58 = vld [vmem:[%s4314_s1 + $0x138] sm:$0xff] }
  0x9b   :  { %2359 = vmatprep.subr.bf16.mxu0 %v2358_v51  ;;  %v2332_v40 = vpack.c.bf16 %v237_v33, %v229_v32  ;;  %v121_v44 = vld [vmem:[%s4314_s1 + $0x30] sm:$0xff]  ;;  %v162_v59 = vld [vmem:[%s4314_s1 + $0x178] sm:$0xff] }
  0x9c   :  { %v601_v50 = vld [vmem:[#allocation5 + $0xc0] sm:$0xff]  ;;  %v618_v2 = vld [vmem:[#allocation5 + $0x148] sm:$0xff]  ;;  %v2374_v4 = vpack.c.bf16 %v162_v59, %v154_v58 }
  0x9d   :  { %2313 = vmatpush1.bf16.msra.mxu1 %v2312_v42  ;;  %v606_v42 = vld [vmem:[#allocation5 + $0xe8] sm:$0xff]  ;;  %v605_v51 = vld [vmem:[#allocation5 + $0xe0] sm:$0xff] }
  0x9e   :  { %2315 = vmatprep.subr.bf16.mxu1 %v2314_v45  ;;  %2361 = vmatpush1.bf16.msra.mxu0 %v2360_v62  ;;  %v129_v45 = vld [vmem:[%s4314_s1 + $0x70] sm:$0xff]  ;;  %v2410_v49 = vpack.c.bf16 %v606_v42, %v602_v41  ;;  %v2412_v60 = vpack.c.bf16 %v605_v51, %v601_v50  ;;  %v170_v7 = vld [vmem:[%s4314_s1 + $0x1b8] sm:$0xff] }
  0x9f   :  { %2363 = vmatprep.subr.bf16.mxu0 %v2362_v63  ;;  %v2368_v52 = vpack.c.bf16 %v129_v45, %v121_v44  ;;  %v137_v56 = vld [vmem:[%s4314_s1 + $0xb0] sm:$0xff]  ;;  %v178_v8 = vld [vmem:[%s4314_s1 + $0x1f8] sm:$0xff] }
  0xa0   :  { %v609_v62 = vld [vmem:[#allocation5 + $0x100] sm:$0xff]  ;;  %v626_v14 = vld [vmem:[#allocation5 + $0x188] sm:$0xff]  ;;  %v2378_v16 = vpack.c.bf16 %v178_v8, %v170_v7 }
  0xa1   :  { %2317 = vmatpush1.bf16.msra.mxu1 %v2316_v54  ;;  %v614_v54 = vld [vmem:[#allocation5 + $0x128] sm:$0xff]  ;;  %v613_v63 = vld [vmem:[#allocation5 + $0x120] sm:$0xff] }
  0xa2   :  { %2319 = vmatprep.subr.bf16.mxu1 %v2318_v57  ;;  %2365 = vmatpush1.bf16.msra.mxu0 %v2364_v11  ;;  %v145_v57 = vld [vmem:[%s4314_s1 + $0xf0] sm:$0xff]  ;;  %v2414_v61 = vpack.c.bf16 %v614_v54, %v610_v53  ;;  %v2416_v9 = vpack.c.bf16 %v613_v63, %v609_v62  ;;  %v186_v20 = vld [vmem:[%s4314_s1 + $0x238] sm:$0xff] }
  0xa3   :  { %2399 = vmatprep.subr.bf16.mxu0 %v2398_v12  ;;  %v2372_v0 = vpack.c.bf16 %v145_v57, %v137_v56  ;;  %v153_v5 = vld [vmem:[%s4314_s1 + $0x130] sm:$0xff]  ;;  %v194_v21 = vld [vmem:[%s4314_s1 + $0x278] sm:$0xff] }
  0xa4   :  { %v617_v11 = vld [vmem:[#allocation5 + $0x140] sm:$0xff]  ;;  %v634_v27 = vld [vmem:[#allocation5 + $0x1c8] sm:$0xff]  ;;  %v2382_v29 = vpack.c.bf16 %v194_v21, %v186_v20 }
  0xa5   :  { %2321 = vmatpush1.bf16.msra.mxu1 %v2320_v3  ;;  %492 = vmatmul.mubr.f32.vlgmr.msra.gmra.mrb[0].mxu0 %v3583_v17  ;;  %v622_v3 = vld [vmem:[#allocation5 + $0x168] sm:$0xff]  ;;  %v621_v12 = vld [vmem:[#allocation5 + $0x160] sm:$0xff] }
  0xa6   :  { %2323 = vmatprep.subr.bf16.mxu1 %v2322_v6  ;;  %2401 = vmatpush1.bf16.msra.mxu0 %v2400_v24  ;;  %v161_v6 = vld [vmem:[%s4314_s1 + $0x170] sm:$0xff]  ;;  %v2418_v10 = vpack.c.bf16 %v622_v3, %v618_v2  ;;  %v2420_v22 = vpack.c.bf16 %v621_v12, %v617_v11  ;;  %v202_v32 = vld [vmem:[%s4314_s1 + $0x2b8] sm:$0xff] }
  0xa7   :  { %2403 = vmatprep.subr.bf16.mxu0 %v2402_v25  ;;  %v2376_v13 = vpack.c.bf16 %v161_v6, %v153_v5  ;;  %v169_v18 = vld [vmem:[%s4314_s1 + $0x1b0] sm:$0xff]  ;;  %v210_v33 = vld [vmem:[%s4314_s1 + $0x2f8] sm:$0xff]  ;;  %v580_v5 = vld [vmem:[#allocation5 + $0x18] sm:$0xff] }
  0xa8   :  { %v625_v24 = vld [vmem:[#allocation5 + $0x180] sm:$0xff]  ;;  %v642_v39 = vld [vmem:[#allocation5 + $0x208] sm:$0xff]  ;;  %v2386_v41 = vpack.c.bf16 %v210_v33, %v202_v32  ;;  %v584_v6 = vld [vmem:[#allocation5 + $0x38] sm:$0xff] }
  0xa9   :  { %2325 = vmatpush1.bf16.msra.mxu1 %v2324_v15  ;;  %v630_v15 = vld [vmem:[#allocation5 + $0x1a8] sm:$0xff]  ;;  %v629_v25 = vld [vmem:[#allocation5 + $0x1a0] sm:$0xff] }
  0xaa   :  { %2327 = vmatprep.subr.bf16.mxu1 %v2326_v19  ;;  %2405 = vmatpush1.bf16.msra.mxu0 %v2404_v36  ;;  %v177_v19 = vld [vmem:[%s4314_s1 + $0x1f0] sm:$0xff]  ;;  %v2422_v23 = vpack.c.bf16 %v630_v15, %v626_v14  ;;  %v2424_v34 = vpack.c.bf16 %v629_v25, %v625_v24  ;;  %v218_v44 = vld [vmem:[%s4314_s1 + $0x338] sm:$0xff]  ;;  %v2654_v14 = vpack.c.bf16 %v584_v6, %v580_v5 }
  0xab   :  { %2407 = vmatprep.subr.bf16.mxu0 %v2406_v37  ;;  %v2380_v26 = vpack.c.bf16 %v177_v19, %v169_v18  ;;  %v185_v30 = vld [vmem:[%s4314_s1 + $0x230] sm:$0xff]  ;;  %v226_v45 = vld [vmem:[%s4314_s1 + $0x378] sm:$0xff]  ;;  %v588_v18 = vld [vmem:[#allocation5 + $0x58] sm:$0xff] }
  0xac   :  { %v633_v36 = vld [vmem:[#allocation5 + $0x1c0] sm:$0xff]  ;;  %v650_v51 = vld [vmem:[#allocation5 + $0x248] sm:$0xff]  ;;  %v2390_v53 = vpack.c.bf16 %v226_v45, %v218_v44  ;;  %v579_v15 = vld [vmem:[#allocation5 + $0x10] sm:$0xff] }
  0xad   :  { %2329 = vmatpush1.bf16.msra.mxu1 %v2328_v28  ;;  %v638_v28 = vld [vmem:[#allocation5 + $0x1e8] sm:$0xff]  ;;  %v637_v37 = vld [vmem:[#allocation5 + $0x1e0] sm:$0xff]  ;;  %v592_v19 = vld [vmem:[#allocation5 + $0x78] sm:$0xff] }
  0xae   :  { %2331 = vmatprep.subr.bf16.mxu1 %v2330_v31  ;;  %2409 = vmatpush1.bf16.msra.mxu0 %v2408_v48  ;;  %v193_v31 = vld [vmem:[%s4314_s1 + $0x270] sm:$0xff]  ;;  %v2426_v35 = vpack.c.bf16 %v638_v28, %v634_v27  ;;  %v2428_v46 = vpack.c.bf16 %v637_v37, %v633_v36  ;;  %v234_v56 = vld [vmem:[%s4314_s1 + $0x3b8] sm:$0xff]  ;;  %v2658_v27 = vpack.c.bf16 %v592_v19, %v588_v18 }
  0xaf   :  { %2411 = vmatprep.subr.bf16.mxu0 %v2410_v49  ;;  %v2384_v38 = vpack.c.bf16 %v193_v31, %v185_v30  ;;  %v201_v42 = vld [vmem:[%s4314_s1 + $0x2b0] sm:$0xff]  ;;  %v242_v57 = vld [vmem:[%s4314_s1 + $0x3f8] sm:$0xff]  ;;  %v596_v30 = vld [vmem:[#allocation5 + $0x98] sm:$0xff] }
  0xb0   :  { %v641_v48 = vld [vmem:[#allocation5 + $0x200] sm:$0xff]  ;;  %v658_v63 = vld [vmem:[#allocation5 + $0x288] sm:$0xff]  ;;  %v2394_v2 = vpack.c.bf16 %v242_v57, %v234_v56  ;;  %v587_v28 = vld [vmem:[#allocation5 + $0x50] sm:$0xff] }
  0xb1   :  { %2333 = vmatpush1.bf16.msra.mxu1 %v2332_v40  ;;  %v646_v40 = vld [vmem:[#allocation5 + $0x228] sm:$0xff]  ;;  %v645_v49 = vld [vmem:[#allocation5 + $0x220] sm:$0xff]  ;;  %v600_v31 = vld [vmem:[#allocation5 + $0xb8] sm:$0xff] }
  0xb2   :  { %2367 = vmatprep.subr.bf16.mxu1 %v2366_v43  ;;  %2413 = vmatpush1.bf16.msra.mxu0 %v2412_v60  ;;  %v209_v43 = vld [vmem:[%s4314_s1 + $0x2f0] sm:$0xff]  ;;  %v2430_v47 = vpack.c.bf16 %v646_v40, %v642_v39  ;;  %v2432_v58 = vpack.c.bf16 %v645_v49, %v641_v48  ;;  %v2662_v39 = vpack.c.bf16 %v600_v31, %v596_v30  ;;  %v595_v40 = vld [vmem:[#allocation5 + $0x90] sm:$0xff] }
  0xb3   :  { %2415 = vmatprep.subr.bf16.mxu0 %v2414_v61  ;;  %v2388_v50 = vpack.c.bf16 %v209_v43, %v201_v42  ;;  %v217_v54 = vld [vmem:[%s4314_s1 + $0x330] sm:$0xff]  ;;  %v604_v42 = vld [vmem:[#allocation5 + $0xd8] sm:$0xff]  ;;  %v619_v5 = vld [vmem:[#allocation5 + $0x150] sm:$0xff] }
  0xb4   :  { %421 = vmatmul.mubr.f32.vlgmr.msra.gmra.mrb[2].mxu1 %v3583_v17  ;;  %v649_v60 = vld [vmem:[#allocation5 + $0x240] sm:$0xff]  ;;  %v666_v12 = vld [vmem:[#allocation5 + $0x2c8] sm:$0xff]  ;;  %v608_v43 = vld [vmem:[#allocation5 + $0xf8] sm:$0xff] }
  0xb5   :  { %2369 = vmatpush1.bf16.msra.mxu1 %v2368_v52  ;;  %562 = vmatprep.mubr.f32.mxu1 %v3278_v1  ;;  %v654_v52 = vld [vmem:[#allocation5 + $0x268] sm:$0xff]  ;;  %v653_v61 = vld [vmem:[#allocation5 + $0x260] sm:$0xff]  ;;  %v623_v6 = vld [vmem:[#allocation5 + $0x170] sm:$0xff] }
  0xb6   :  { %2371 = vmatprep.subr.bf16.mxu1 %v2370_v55  ;;  %2417 = vmatpush1.bf16.msra.mxu0 %v2416_v9  ;;  %v225_v55 = vld [vmem:[%s4314_s1 + $0x370] sm:$0xff]  ;;  %v2434_v59 = vpack.c.bf16 %v654_v52, %v650_v51  ;;  %v2436_v7 = vpack.c.bf16 %v653_v61, %v649_v60  ;;  %v603_v51 = vld [vmem:[#allocation5 + $0xd0] sm:$0xff] }
  0xb7   :  { %2419 = vmatprep.subr.bf16.mxu0 %v2418_v10  ;;  %v2392_v62 = vpack.c.bf16 %v225_v55, %v217_v54  ;;  %v233_v3 = vld [vmem:[%s4314_s1 + $0x3b0] sm:$0xff]  ;;  %v607_v52 = vld [vmem:[#allocation5 + $0xf0] sm:$0xff]  ;;  %v616_v54 = vld [vmem:[#allocation5 + $0x138] sm:$0xff] }
  0xb8   :  { %v657_v9 = vld [vmem:[#allocation5 + $0x280] sm:$0xff]  ;;  %v674_v25 = vld [vmem:[#allocation5 + $0x308] sm:$0xff]  ;;  %v611_v61 = vld [vmem:[#allocation5 + $0x110] sm:$0xff] }
  0xb9   :  { %2373 = vmatpush1.bf16.msra.mxu1 %v2372_v0  ;;  %v662_v0 = vld [vmem:[#allocation5 + $0x2a8] sm:$0xff]  ;;  %v661_v10 = vld [vmem:[#allocation5 + $0x2a0] sm:$0xff] }
  0xba   :  { %2375 = vmatprep.subr.bf16.mxu1 %v2374_v4  ;;  %2421 = vmatpush1.bf16.msra.mxu0 %v2420_v22  ;;  %v241_v4 = vld [vmem:[%s4314_s1 + $0x3f0] sm:$0xff]  ;;  %v2438_v8 = vpack.c.bf16 %v662_v0, %v658_v63  ;;  %v2440_v20 = vpack.c.bf16 %v661_v10, %v657_v9  ;;  %v620_v63 = vld [vmem:[#allocation5 + $0x158] sm:$0xff]  ;;  %v2676_v9 = vpack.c.bf16 %v623_v6, %v619_v5  ;;  %v627_v10 = vld [vmem:[#allocation5 + $0x190] sm:$0xff] }
  0xbb   :  { %2423 = vmatprep.subr.bf16.mxu0 %v2422_v23  ;;  %v2396_v11 = vpack.c.bf16 %v241_v4, %v233_v3  ;;  %v665_v22 = vld [vmem:[#allocation5 + $0x2c0] sm:$0xff]  ;;  %v682_v37 = vld [vmem:[#allocation5 + $0x348] sm:$0xff]  ;;  %v624_v0 = vld [vmem:[#allocation5 + $0x178] sm:$0xff] }
  0xbc   :  { %v669_v23 = vld [vmem:[#allocation5 + $0x2e0] sm:$0xff]  ;;  %v690_v48 = vld [vmem:[#allocation5 + $0x388] sm:$0xff]  ;;  %v2674_v4 = vpack.c.bf16 %v624_v0, %v620_v63  ;;  %v687_v63 = vld [vmem:[#allocation5 + $0x370] sm:$0xff] }
  0xbd   :  { %2377 = vmatpush1.bf16.msra.mxu1 %v2376_v13  ;;  %v670_v13 = vld [vmem:[#allocation5 + $0x2e8] sm:$0xff]  ;;  %v2444_v32 = vpack.c.bf16 %v669_v23, %v665_v22  ;;  %v689_v57 = vld [vmem:[#allocation5 + $0x380] sm:$0xff]  ;;  %v635_v23 = vld [vmem:[#allocation5 + $0x1d0] sm:$0xff] }
  0xbe   :  { %2379 = vmatprep.subr.bf16.mxu1 %v2378_v16  ;;  %2425 = vmatpush1.bf16.msra.mxu0 %v2424_v34  ;;  %v583_v16 = vld [vmem:[#allocation5 + $0x30] sm:$0xff]  ;;  %v2442_v21 = vpack.c.bf16 %v670_v13, %v666_v12  ;;  %v673_v34 = vld [vmem:[#allocation5 + $0x300] sm:$0xff]  ;;  %v694_v49 = vld [vmem:[#allocation5 + $0x3a8] sm:$0xff] }
  0xbf   :  { %2427 = vmatprep.subr.bf16.mxu0 %v2426_v35  ;;  %v2656_v24 = vpack.c.bf16 %v583_v16, %v579_v15  ;;  %v677_v35 = vld [vmem:[#allocation5 + $0x320] sm:$0xff]  ;;  %v2454_v56 = vpack.c.bf16 %v694_v49, %v690_v48  ;;  %v636_v13 = vld [vmem:[#allocation5 + $0x1d8] sm:$0xff]  ;;  %v702_v15 = vld [vmem:[#allocation5 + $0x3e8] sm:$0xff] }
  0xc0   :  { %v2448_v44 = vpack.c.bf16 %v677_v35, %v673_v34  ;;  %v640_v16 = vld [vmem:[#allocation5 + $0x1f8] sm:$0xff]  ;;  %v697_v19 = vld [vmem:[#allocation5 + $0x3c0] sm:$0xff]  ;;  %v647_v34 = vld [vmem:[#allocation5 + $0x230] sm:$0xff] }
  0xc1   :  { %2381 = vmatpush1.bf16.msra.mxu1 %v2380_v26  ;;  %v678_v26 = vld [vmem:[#allocation5 + $0x328] sm:$0xff]  ;;  %v652_v35 = vld [vmem:[#allocation5 + $0x258] sm:$0xff]  ;;  %v691_v5 = vld [vmem:[#allocation5 + $0x390] sm:$0xff] }
  0xc2   :  { %2383 = vmatprep.subr.bf16.mxu1 %v2382_v29  ;;  %2429 = vmatpush1.bf16.msra.mxu0 %v2428_v46  ;;  %v591_v29 = vld [vmem:[#allocation5 + $0x70] sm:$0xff]  ;;  %v2446_v33 = vpack.c.bf16 %v678_v26, %v674_v25  ;;  %v681_v46 = vld [vmem:[#allocation5 + $0x340] sm:$0xff]  ;;  %v706_v26 = vld [vmem:[#allocation5 + $0x408] sm:$0xff] }
  0xc3   :  { %2431 = vmatprep.subr.bf16.mxu0 %v2430_v47  ;;  %v2660_v36 = vpack.c.bf16 %v591_v29, %v587_v28  ;;  %v639_v25 = vld [vmem:[#allocation5 + $0x1f0] sm:$0xff]  ;;  %v644_v28 = vld [vmem:[#allocation5 + $0x218] sm:$0xff] }
  0xc4   :  { %v648_v29 = vld [vmem:[#allocation5 + $0x238] sm:$0xff]  ;;  %v2684_v31 = vpack.c.bf16 %v639_v25, %v635_v23  ;;  %v695_v6 = vld [vmem:[#allocation5 + $0x3b0] sm:$0xff] }
  0xc5   :  { %2385 = vmatpush1.bf16.msra.mxu1 %v2384_v38  ;;  %v686_v38 = vld [vmem:[#allocation5 + $0x368] sm:$0xff]  ;;  %v692_v0 = vld [vmem:[#allocation5 + $0x398] sm:$0xff] }
  0xc6   :  { %2387 = vmatprep.subr.bf16.mxu1 %v2386_v41  ;;  %2433 = vmatpush1.bf16.msra.mxu0 %v2432_v58  ;;  %v599_v41 = vld [vmem:[#allocation5 + $0xb0] sm:$0xff]  ;;  %v2450_v45 = vpack.c.bf16 %v686_v38, %v682_v37  ;;  %v693_v58 = vld [vmem:[#allocation5 + $0x3a0] sm:$0xff] }
  0xc7   :  { %2435 = vmatprep.subr.bf16.mxu0 %v2434_v59  ;;  %v2664_v47 = vpack.c.bf16 %v599_v41, %v595_v40  ;;  %v2668_v59 = vpack.c.bf16 %v607_v52, %v603_v51  ;;  %v655_v40 = vld [vmem:[#allocation5 + $0x270] sm:$0xff]  ;;  %v660_v41 = vld [vmem:[#allocation5 + $0x298] sm:$0xff] }
  0xc8   :  { %v671_v51 = vld [vmem:[#allocation5 + $0x2f0] sm:$0xff]  ;;  %v676_v52 = vld [vmem:[#allocation5 + $0x318] sm:$0xff] }
  0xc9   :  { %2389 = vmatpush1.bf16.msra.mxu1 %v2388_v50  ;;  %v2666_v50 = vpack.c.bf16 %v608_v43, %v604_v42  ;;  %v664_v42 = vld [vmem:[#allocation5 + $0x2b8] sm:$0xff] }
  0xca   :  { %2391 = vmatprep.subr.bf16.mxu1 %v2390_v53  ;;  %2437 = vmatpush1.bf16.msra.mxu0 %v2436_v7  ;;  %v612_v53 = vld [vmem:[#allocation5 + $0x118] sm:$0xff] }
  0xcb   :  { %2439 = vmatprep.subr.bf16.mxu0 %v2438_v8  ;;  %v2670_v60 = vpack.c.bf16 %v616_v54, %v612_v53  ;;  %v628_v7 = vld [vmem:[#allocation5 + $0x198] sm:$0xff] }
  0xcc   :  { %v632_v8 = vld [vmem:[#allocation5 + $0x1b8] sm:$0xff] }
  0xcd   :  { %2393 = vmatpush1.bf16.msra.mxu1 %v2392_v62  ;;  %v615_v62 = vld [vmem:[#allocation5 + $0x130] sm:$0xff]  ;;  %v2678_v12 = vpack.c.bf16 %v632_v8, %v628_v7  ;;  %v680_v53 = vld [vmem:[#allocation5 + $0x338] sm:$0xff] }
  0xce   :  { %2395 = vmatprep.subr.bf16.mxu1 %v2394_v2  ;;  %2441 = vmatpush1.bf16.msra.mxu0 %v2440_v20  ;;  %v2456_v2 = vpack.c.bf16 %v693_v58, %v689_v57  ;;  %v2672_v3 = vpack.c.bf16 %v615_v62, %v611_v61  ;;  %v701_v20 = vld [vmem:[#allocation5 + $0x3e0] sm:$0xff]  ;;  %v679_v57 = vld [vmem:[#allocation5 + $0x330] sm:$0xff]  ;;  %v684_v58 = vld [vmem:[#allocation5 + $0x358] sm:$0xff] }
  0xcf   :  { %2443 = vmatprep.subr.bf16.mxu0 %v2442_v21  ;;  %v2460_v21 = vpack.c.bf16 %v701_v20, %v697_v19  ;;  %v683_v62 = vld [vmem:[#allocation5 + $0x350] sm:$0xff]  ;;  %v700_v7 = vld [vmem:[#allocation5 + $0x3d8] sm:$0xff] }
  0xd0   :  { %v704_v8 = vld [vmem:[#allocation5 + $0x3f8] sm:$0xff] }
  0xd1   :  { %2397 = vmatpush1.bf16.msra.mxu1 %v2396_v11  ;;  %v631_v11 = vld [vmem:[#allocation5 + $0x1b0] sm:$0xff] }
  0xd2   :  { %2655 = vmatprep.subr.bf16.mxu1 %v2654_v14  ;;  %2445 = vmatpush1.bf16.msra.mxu0 %v2444_v32  ;;  %v698_v14 = vld [vmem:[#allocation5 + $0x3c8] sm:$0xff]  ;;  %v2680_v22 = vpack.c.bf16 %v631_v11, %v627_v10  ;;  %v2686_v32 = vpack.c.bf16 %v648_v29, %v644_v28  ;;  %v2714_v10 = vpack.c.bf16 %v704_v8, %v700_v7  ;;  %v699_v11 = vld [vmem:[#allocation5 + $0x3d0] sm:$0xff] }
  0xd3   :  { %2447 = vmatprep.subr.bf16.mxu0 %v2446_v33  ;;  %v2458_v18 = vpack.c.bf16 %v702_v15, %v698_v14  ;;  %v643_v33 = vld [vmem:[#allocation5 + $0x210] sm:$0xff]  ;;  %v712_v14 = vld [vmem:[#allocation5 + $0x438] sm:$0xff]  ;;  %v738_v7 = vld [vmem:[#allocation5 + $0x508] sm:$0xff] }
  0xd4   :  { %563 = vmatmul.mubr.f32.vlgmr.msra.gmra.mrb[4].mxu1 %v3583_v17  ;;  %v685_v17 = vld [vmem:[#allocation5 + $0x360] sm:$0xff]  ;;  %v2688_v37 = vpack.c.bf16 %v647_v34, %v643_v33  ;;  %v718_v34 = vld [vmem:[#allocation5 + $0x468] sm:$0xff] }
  0xd5   :  { %2657 = vmatpush1.bf16.msra.mxu1 %v2656_v24  ;;  %v2452_v55 = vpack.c.bf16 %v685_v17, %v681_v46  ;;  %v2682_v24 = vpack.c.bf16 %v640_v16, %v636_v13  ;;  %v663_v46 = vld [vmem:[#allocation5 + $0x2b0] sm:$0xff]  ;;  %v668_v17 = vld [vmem:[#allocation5 + $0x2d8] sm:$0xff]  ;;  %v742_v8 = vld [vmem:[#allocation5 + $0x528] sm:$0xff] }
  0xd6   :  { %2659 = vmatprep.subr.bf16.mxu1 %v2658_v27  ;;  %2449 = vmatpush1.bf16.msra.mxu0 %v2448_v44  ;;  %v710_v27 = vld [vmem:[#allocation5 + $0x428] sm:$0xff]  ;;  %v2694_v44 = vpack.c.bf16 %v664_v42, %v660_v41  ;;  %v708_v13 = vld [vmem:[#allocation5 + $0x418] sm:$0xff]  ;;  %v717_v41 = vld [vmem:[#allocation5 + $0x460] sm:$0xff] }
  0xd7   :  { %2451 = vmatprep.subr.bf16.mxu0 %v2450_v45  ;;  %v2462_v30 = vpack.c.bf16 %v710_v27, %v706_v26  ;;  %v659_v45 = vld [vmem:[#allocation5 + $0x290] sm:$0xff]  ;;  %v2718_v16 = vpack.c.bf16 %v712_v14, %v708_v13  ;;  %v705_v26 = vld [vmem:[#allocation5 + $0x400] sm:$0xff] }
  0xd8   :  { %v2696_v48 = vpack.c.bf16 %v663_v46, %v659_v45  ;;  %v709_v27 = vld [vmem:[#allocation5 + $0x420] sm:$0xff]  ;;  %v715_v45 = vld [vmem:[#allocation5 + $0x450] sm:$0xff] }
  0xd9   :  { %2661 = vmatpush1.bf16.msra.mxu1 %v2660_v36  ;;  %v656_v36 = vld [vmem:[#allocation5 + $0x278] sm:$0xff]  ;;  %v719_v46 = vld [vmem:[#allocation5 + $0x470] sm:$0xff]  ;;  %v737_v13 = vld [vmem:[#allocation5 + $0x500] sm:$0xff] }
  0xda   :  { %2663 = vmatprep.subr.bf16.mxu1 %v2662_v39  ;;  %2453 = vmatpush1.bf16.msra.mxu0 %v2452_v55  ;;  %v2690_v38 = vpack.c.bf16 %v656_v36, %v652_v35  ;;  %v651_v39 = vld [vmem:[#allocation5 + $0x250] sm:$0xff]  ;;  %v2702_v55 = vpack.c.bf16 %v680_v53, %v676_v52  ;;  %v716_v35 = vld [vmem:[#allocation5 + $0x458] sm:$0xff]  ;;  %v721_v52 = vld [vmem:[#allocation5 + $0x480] sm:$0xff] }
  0xdb   :  { %2455 = vmatprep.subr.bf16.mxu0 %v2454_v56  ;;  %v2692_v43 = vpack.c.bf16 %v655_v40, %v651_v39  ;;  %v675_v56 = vld [vmem:[#allocation5 + $0x310] sm:$0xff]  ;;  %v720_v36 = vld [vmem:[#allocation5 + $0x478] sm:$0xff]  ;;  %v713_v40 = vld [vmem:[#allocation5 + $0x440] sm:$0xff] }
  0xdc   :  { %v725_v53 = vld [vmem:[#allocation5 + $0x4a0] sm:$0xff] }
  0xdd   :  { %2665 = vmatpush1.bf16.msra.mxu1 %v2664_v47  ;;  %v672_v47 = vld [vmem:[#allocation5 + $0x2f8] sm:$0xff]  ;;  %v741_v14 = vld [vmem:[#allocation5 + $0x520] sm:$0xff] }
  0xde   :  { %2667 = vmatprep.subr.bf16.mxu1 %v2666_v50  ;;  %2457 = vmatpush1.bf16.msra.mxu0 %v2456_v2  ;;  %v2698_v49 = vpack.c.bf16 %v672_v47, %v668_v17  ;;  %v667_v50 = vld [vmem:[#allocation5 + $0x2d0] sm:$0xff]  ;;  %v696_v2 = vld [vmem:[#allocation5 + $0x3b8] sm:$0xff]  ;;  %v722_v17 = vld [vmem:[#allocation5 + $0x488] sm:$0xff] }
  0xdf   :  { %2459 = vmatprep.subr.bf16.mxu0 %v2458_v18  ;;  %v2700_v54 = vpack.c.bf16 %v671_v51, %v667_v50  ;;  %v245_v18 = vlaneseq  ;;  %v726_v47 = vld [vmem:[#allocation5 + $0x4a8] sm:$0xff]  ;;  %v2468_v50 = vpack.c.bf16 %v717_v41, %v713_v40  ;;  %v2724_v51 = vpack.c.bf16 %v719_v46, %v715_v45  ;;  %v757_v45 = vld [vmem:[#allocation5 + $0x5a0] sm:$0xff] }
  0xe1   :  { %2669 = vmatpush1.bf16.msra.mxu1 %v2668_v59  ;;  %v688_v59 = vld [vmem:[#allocation5 + $0x378] sm:$0xff]  ;;  %v3813_v19 = vshrl.u32 %v245_v18, 7  ;;  %v739_v18 = vld [vmem:[#allocation5 + $0x510] sm:$0xff] }
  0xe2   :  { %2671 = vmatprep.subr.bf16.mxu1 %v2670_v60  ;;  %2461 = vmatpush1.bf16.msra.mxu0 %v2460_v21  ;;  %v2704_v60 = vpack.c.bf16 %v679_v57, %v675_v56  ;;  %v2706_v61 = vpack.c.bf16 %v688_v59, %v684_v58  ;;  %v3818_v21 = vld [vmem:[#allocation3] sm:$0xff]  ;;  %v723_v56 = vld [vmem:[#allocation5 + $0x490] sm:$0xff]  ;;  %v730_v58 = vld [vmem:[#allocation5 + $0x4c8] sm:$0xff] }
  0xe3   :  { %2463 = vmatprep.subr.bf16.mxu0 %v2462_v30  ;;  %v3816_v20 = vsub.s32 0, %v3813_v19  ;;  %v707_v30 = vld [vmem:[#allocation5 + $0x410] sm:$0xff]  ;;  %v734_v59 = vld [vmem:[#allocation5 + $0x4e8] sm:$0xff] }
  0xe4   :  { %v727_v57 = vld [vmem:[#allocation5 + $0x4b0] sm:$0xff] }
  0xe5   :  { %2673 = vmatpush1.bf16.msra.mxu1 %v2672_v3  ;;  %v2708_v3 = vpack.c.bf16 %v687_v63, %v683_v62  ;;  %v248_v23 = vrot.slane %v3818_v21, %v3816_v20  ;;  %v2472_v62 = vpack.c.bf16 %v725_v53, %v721_v52  ;;  %v2728_v63 = vpack.c.bf16 %v727_v57, %v723_v56  ;;  %v768_v52 = vld [vmem:[#allocation5 + $0x5f8] sm:$0xff]  ;;  %v761_v56 = vld [vmem:[#allocation5 + $0x5c0] sm:$0xff] }
  0xe6   :  { %2675 = vmatprep.subr.bf16.mxu1 %v2674_v4  ;;  %v2710_v4 = vpack.c.bf16 %v696_v2, %v692_v0  ;;  %v729_v0 = vld [vmem:[#allocation5 + $0x4c0] sm:$0xff]  ;;  %v259_v53 = vsub.s32 3, %v3813_v19 }
  0xe7   :  { %v733_v2 = vld [vmem:[#allocation5 + $0x4e0] sm:$0xff] }
  0xe8   :  { %v765_v57 = vld [vmem:[#allocation5 + $0x5e0] sm:$0xff] }
  0xe9   :  { %2677 = vmatpush1.bf16.msra.mxu1 %v2676_v9  ;;  %v2712_v9 = vpack.c.bf16 %v695_v6, %v691_v5  ;;  %v731_v5 = vld [vmem:[#allocation5 + $0x4d0] sm:$0xff] }
  0xea   :  { %2679 = vmatprep.subr.bf16.mxu1 %v2678_v12  ;;  %v703_v12 = vld [vmem:[#allocation5 + $0x3f0] sm:$0xff] }
  0xeb   :  { %v2716_v15 = vpack.c.bf16 %v703_v12, %v699_v11  ;;  %v735_v6 = vld [vmem:[#allocation5 + $0x4f0] sm:$0xff]  ;;  %v2476_v11 = vpack.c.bf16 %v733_v2, %v729_v0  ;;  %v772_v0 = vld [vmem:[#allocation5 + $0x618] sm:$0xff] }
  0xec   :  { %v2732_v12 = vpack.c.bf16 %v735_v6, %v731_v5  ;;  %v776_v2 = vld [vmem:[#allocation5 + $0x638] sm:$0xff]  ;;  %v769_v6 = vld [vmem:[#allocation5 + $0x600] sm:$0xff] }
  0xed   :  { %2681 = vmatpush1.bf16.msra.mxu1 %v2680_v22  ;;  %v3821_v22 = vsub.s32 1, %v3813_v19 }
  0xee   :  { %2683 = vmatprep.subr.bf16.mxu1 %v2682_v24 }
  0xef   :  { %v252_v24 = vrot.slane %v3818_v21, %v3821_v22 }
  0xf1   :  { %2685 = vmatpush1.bf16.msra.mxu1 %v2684_v31  ;;  %v711_v31 = vld [vmem:[#allocation5 + $0x430] sm:$0xff] }
  0xf2   :  { %2687 = vmatprep.subr.bf16.mxu1 %v2686_v32  ;;  %v714_v32 = vld [vmem:[#allocation5 + $0x448] sm:$0xff]  ;;  %v2720_v39 = vpack.c.bf16 %v711_v31, %v707_v30  ;;  %v745_v30 = vld [vmem:[#allocation5 + $0x540] sm:$0xff] }
  0xf3   :  { %v749_v31 = vld [vmem:[#allocation5 + $0x560] sm:$0xff] }
  0xf5   :  { %2689 = vmatpush1.bf16.msra.mxu1 %v2688_v37 }
  0xf6   :  { %2691 = vmatprep.subr.bf16.mxu1 %v2690_v38  ;;  %v2464_v38 = vpack.c.bf16 %v709_v27, %v705_v26  ;;  %v748_v26 = vld [vmem:[#allocation5 + $0x558] sm:$0xff] }
  0xf7   :  { %v752_v27 = vld [vmem:[#allocation5 + $0x578] sm:$0xff] }
  0xf9   :  { %2693 = vmatpush1.bf16.msra.mxu1 %v2692_v43  ;;  %v2466_v43 = vpack.c.bf16 %v718_v34, %v714_v32  ;;  %v747_v34 = vld [vmem:[#allocation5 + $0x550] sm:$0xff] }
  0xfa   :  { %2695 = vmatprep.subr.bf16.mxu1 %v2694_v44  ;;  %v2722_v44 = vpack.c.bf16 %v720_v36, %v716_v35  ;;  %v751_v35 = vld [vmem:[#allocation5 + $0x570] sm:$0xff]  ;;  %v754_v36 = vld [vmem:[#allocation5 + $0x588] sm:$0xff] }
  0xfd   :  { %2697 = vmatpush1.bf16.msra.mxu1 %v2696_v48  ;;  %v724_v48 = vld [vmem:[#allocation5 + $0x498] sm:$0xff] }
  0xfe   :  { %2699 = vmatprep.subr.bf16.mxu1 %v2698_v49  ;;  %v728_v49 = vld [vmem:[#allocation5 + $0x4b8] sm:$0xff] }
 0x101   :  { %2701 = vmatpush1.bf16.msra.mxu1 %v2700_v54  ;;  %v2470_v54 = vpack.c.bf16 %v726_v47, %v722_v17  ;;  %v755_v47 = vld [vmem:[#allocation5 + $0x590] sm:$0xff] }
 0x102   :  { %2703 = vmatprep.subr.bf16.mxu1 %v2702_v55  ;;  %v2726_v55 = vpack.c.bf16 %v728_v49, %v724_v48  ;;  %v759_v48 = vld [vmem:[#allocation5 + $0x5b0] sm:$0xff]  ;;  %v762_v49 = vld [vmem:[#allocation5 + $0x5c8] sm:$0xff] }
 0x105   :  { %2705 = vmatpush1.bf16.msra.mxu1 %v2704_v60  ;;  %v732_v60 = vld [vmem:[#allocation5 + $0x4d8] sm:$0xff] }
 0x106   :  { %2707 = vmatprep.subr.bf16.mxu1 %v2706_v61  ;;  %v736_v61 = vld [vmem:[#allocation5 + $0x4f8] sm:$0xff] }
 0x109   :  { %2709 = vmatpush1.bf16.msra.mxu1 %v2708_v3  ;;  %v2474_v3 = vpack.c.bf16 %v734_v59, %v730_v58 }
 0x10a   :  { %2711 = vmatprep.subr.bf16.mxu1 %v2710_v4  ;;  %v2730_v4 = vpack.c.bf16 %v736_v61, %v732_v60  ;;  %v763_v60 = vld [vmem:[#allocation5 + $0x5d0] sm:$0xff] }
 0x10b   :  { %v767_v61 = vld [vmem:[#allocation5 + $0x5f0] sm:$0xff] }
 0x10c   :  { %v2748_v5 = vpack.c.bf16 %v767_v61, %v763_v60  ;;  %v806_v60 = vld [vmem:[#allocation5 + $0x728] sm:$0xff]  ;;  %v804_v61 = vld [vmem:[#allocation5 + $0x718] sm:$0xff] }
 0x10d   :  { %2713 = vmatpush1.bf16.msra.mxu1 %v2712_v9  ;;  %v740_v9 = vld [vmem:[#allocation5 + $0x518] sm:$0xff] }
 0x10e   :  { %2715 = vmatprep.subr.bf16.mxu1 %v2714_v10  ;;  %v744_v10 = vld [vmem:[#allocation5 + $0x538] sm:$0xff] }
 0x111   :  { %2717 = vmatpush1.bf16.msra.mxu1 %v2716_v15  ;;  %v2478_v15 = vpack.c.bf16 %v742_v8, %v738_v7  ;;  %v773_v7 = vld [vmem:[#allocation5 + $0x620] sm:$0xff] }
 0x112   :  { %2719 = vmatprep.subr.bf16.mxu1 %v2718_v16  ;;  %v2734_v16 = vpack.c.bf16 %v744_v10, %v740_v9  ;;  %v2750_v10 = vpack.c.bf16 %v776_v2, %v772_v0  ;;  %v801_v2 = vld [vmem:[#allocation5 + $0x700] sm:$0xff] }
 0x167   :  { %v351_v25 = vpop.f32.mrb[0].mxu1 }
 0x168   :  { %v352_v28 = vadd.f32 %v351_v25, %v248_v23  ;;  %v353_v29 = vpop.f32.mrb[1].mxu1  ;;  %v743_v23 = vld [vmem:[#allocation5 + $0x530] sm:$0xff]  ;;  %v750_v25 = vld [vmem:[#allocation5 + $0x568] sm:$0xff] }
 0x169   :  { %v354_v33 = vadd.f32 %v353_v29, %v252_v24  ;;  %v746_v24 = vld [vmem:[#allocation5 + $0x548] sm:$0xff]  ;;  %v2736_v29 = vpack.c.bf16 %v743_v23, %v739_v18  ;;  %v784_v18 = vld [vmem:[#allocation5 + $0x678] sm:$0xff] }
 0x16a   :  { %v569_v42 = vmax.f32 %v352_v28, 0.0  ;;  %v2480_v28 = vpack.c.bf16 %v741_v14, %v737_v13  ;;  %v2482_v32 = vpack.c.bf16 %v750_v25, %v746_v24  ;;  %v778_v13 = vld [vmem:[#allocation5 + $0x648] sm:$0xff]  ;;  %v2496_v24 = vpack.c.bf16 %v773_v7, %v769_v6  ;;  %v803_v6 = vld [vmem:[#allocation5 + $0x710] sm:$0xff] }
 0x16b   :  { %v570_v37 = vmax.f32 %v354_v33, 0.0  ;;  %v2738_v33 = vpack.c.bf16 %v752_v27, %v748_v26  ;;  %v777_v26 = vld [vmem:[#allocation5 + $0x640] sm:$0xff]  ;;  %v807_v7 = vld [vmem:[#allocation5 + $0x730] sm:$0xff] }
 0x16c   :  { %v781_v27 = vld [vmem:[#allocation5 + $0x660] sm:$0xff] }
 0x16d   :  { %1175 = vmatprep.mubr.f32.mxu0 %v570_v37  ;;  %1459 = vmatprep.mubr.f32.mxu1 %v570_v37  ;;  %v758_v37 = vld [vmem:[#allocation5 + $0x5a8] sm:$0xff] }
 0x16e   :  { %1176 = vmatmul.mubr.f32.vlgmr.msra.gmra.mrb[2].mxu0 %v569_v42  ;;  %1460 = vmatmul.mubr.f32.vlgmr.msra.gmra.mrb[6].mxu1 %v569_v42  ;;  %v2484_v42 = vpack.c.bf16 %v749_v31, %v745_v30  ;;  %v2486_v46 = vpack.c.bf16 %v758_v37, %v754_v36  ;;  %v779_v31 = vld [vmem:[#allocation5 + $0x650] sm:$0xff]  ;;  %v792_v36 = vld [vmem:[#allocation5 + $0x6b8] sm:$0xff]  ;;  %v2500_v37 = vpack.c.bf16 %v781_v27, %v777_v26  ;;  %v818_v26 = vld [vmem:[#allocation5 + $0x788] sm:$0xff] }
 0x16f   :  { %2465 = vmatpush1.bf16.msra.mxu0 %v2464_v38  ;;  %2721 = vmatpush1.bf16.msra.mxu1 %v2720_v39  ;;  %v756_v38 = vld [vmem:[#allocation5 + $0x598] sm:$0xff]  ;;  %v822_v27 = vld [vmem:[#allocation5 + $0x7a8] sm:$0xff] }
 0x170   :  { %2467 = vmatprep.subr.bf16.mxu0 %v2466_v43  ;;  %2723 = vmatprep.subr.bf16.mxu1 %v2722_v44  ;;  %v760_v39 = vld [vmem:[#allocation5 + $0x5b8] sm:$0xff]  ;;  %v2740_v43 = vpack.c.bf16 %v751_v35, %v747_v34  ;;  %v753_v44 = vld [vmem:[#allocation5 + $0x580] sm:$0xff]  ;;  %v790_v34 = vld [vmem:[#allocation5 + $0x6a8] sm:$0xff] }
 0x171   :  { %v2742_v17 = vpack.c.bf16 %v760_v39, %v756_v38  ;;  %v788_v35 = vld [vmem:[#allocation5 + $0x698] sm:$0xff]  ;;  %v785_v39 = vld [vmem:[#allocation5 + $0x680] sm:$0xff] }
 0x173   :  { %2469 = vmatpush1.bf16.msra.mxu0 %v2468_v50  ;;  %2725 = vmatpush1.bf16.msra.mxu1 %v2724_v51  ;;  %v766_v50 = vld [vmem:[#allocation5 + $0x5e8] sm:$0xff]  ;;  %v764_v51 = vld [vmem:[#allocation5 + $0x5d8] sm:$0xff] }
 0x174   :  { %2471 = vmatprep.subr.bf16.mxu0 %v2470_v54  ;;  %2727 = vmatprep.subr.bf16.mxu1 %v2726_v55  ;;  %v2488_v54 = vpack.c.bf16 %v757_v45, %v753_v44  ;;  %v2744_v55 = vpack.c.bf16 %v759_v48, %v755_v47  ;;  %v2490_v58 = vpack.c.bf16 %v766_v50, %v762_v49  ;;  %v787_v45 = vld [vmem:[#allocation5 + $0x690] sm:$0xff]  ;;  %v798_v47 = vld [vmem:[#allocation5 + $0x6e8] sm:$0xff]  ;;  %v796_v48 = vld [vmem:[#allocation5 + $0x6d8] sm:$0xff] }
 0x175   :  { %v2746_v59 = vpack.c.bf16 %v768_v52, %v764_v51  ;;  %v2758_v44 = vpack.c.bf16 %v792_v36, %v788_v35  ;;  %v800_v49 = vld [vmem:[#allocation5 + $0x6f8] sm:$0xff]  ;;  %v793_v52 = vld [vmem:[#allocation5 + $0x6c0] sm:$0xff]  ;;  %v2518_v35 = vpack.c.bf16 %v822_v27, %v818_v26  ;;  %v850_v26 = vld [vmem:[#allocation5 + $0x888] sm:$0xff] }
 0x176   :  { %v854_v27 = vld [vmem:[#allocation5 + $0x8a8] sm:$0xff] }
 0x177   :  { %2473 = vmatpush1.bf16.msra.mxu0 %v2472_v62  ;;  %2729 = vmatpush1.bf16.msra.mxu1 %v2728_v63  ;;  %v770_v62 = vld [vmem:[#allocation5 + $0x608] sm:$0xff] }
 0x178   :  { %2475 = vmatprep.subr.bf16.mxu0 %v2474_v3  ;;  %2731 = vmatprep.subr.bf16.mxu1 %v2730_v4  ;;  %v3827_v40 = vpop.f32.mrb[0].mxu0  ;;  %v774_v63 = vld [vmem:[#allocation5 + $0x628] sm:$0xff]  ;;  %v260_v3 = vrot.slane %v3818_v21, %v259_v53  ;;  %v2492_v4 = vpack.c.bf16 %v765_v57, %v761_v56  ;;  %v2762_v56 = vpack.c.bf16 %v800_v49, %v796_v48  ;;  %v795_v57 = vld [vmem:[#allocation5 + $0x6d0] sm:$0xff]  ;;  %v825_v48 = vld [vmem:[#allocation5 + $0x7c0] sm:$0xff] }
 0x179   :  { %v3829_v41 = vpop.f32.mrb[1].mxu0  ;;  %v2494_v9 = vpack.c.bf16 %v774_v63, %v770_v62  ;;  %v808_v62 = vld [vmem:[#allocation5 + $0x738] sm:$0xff]  ;;  %v829_v49 = vld [vmem:[#allocation5 + $0x7e0] sm:$0xff] }
 0x17b   :  { %2477 = vmatpush1.bf16.msra.mxu0 %v2476_v11  ;;  %2733 = vmatpush1.bf16.msra.mxu1 %v2732_v12  ;;  %v771_v11 = vld [vmem:[#allocation5 + $0x610] sm:$0xff] }
 0x17c   :  { %2479 = vmatprep.subr.bf16.mxu0 %v2478_v15  ;;  %2735 = vmatprep.subr.bf16.mxu1 %v2734_v16  ;;  %v775_v12 = vld [vmem:[#allocation5 + $0x630] sm:$0xff]  ;;  %v782_v15 = vld [vmem:[#allocation5 + $0x668] sm:$0xff]  ;;  %v780_v16 = vld [vmem:[#allocation5 + $0x658] sm:$0xff] }
 0x17d   :  { %v2752_v25 = vpack.c.bf16 %v775_v12, %v771_v11  ;;  %v2754_v30 = vpack.c.bf16 %v784_v18, %v780_v16  ;;  %v812_v11 = vld [vmem:[#allocation5 + $0x758] sm:$0xff]  ;;  %v813_v16 = vld [vmem:[#allocation5 + $0x760] sm:$0xff] }
 0x17e   :  { %v816_v12 = vld [vmem:[#allocation5 + $0x778] sm:$0xff] }
 0x17f   :  { %2481 = vmatpush1.bf16.msra.mxu0 %v2480_v28  ;;  %2737 = vmatpush1.bf16.msra.mxu1 %v2736_v29  ;;  %v2498_v29 = vpack.c.bf16 %v782_v15, %v778_v13  ;;  %v809_v15 = vld [vmem:[#allocation5 + $0x740] sm:$0xff] }
 0x180   :  { %2483 = vmatprep.subr.bf16.mxu0 %v2482_v32  ;;  %2739 = vmatprep.subr.bf16.mxu1 %v2738_v33  ;;  %v783_v32 = vld [vmem:[#allocation5 + $0x670] sm:$0xff]  ;;  %v786_v33 = vld [vmem:[#allocation5 + $0x688] sm:$0xff] }
 0x181   :  { %v2756_v38 = vpack.c.bf16 %v783_v32, %v779_v31  ;;  %v2516_v31 = vpack.c.bf16 %v813_v16, %v809_v15  ;;  %v841_v15 = vld [vmem:[#allocation5 + $0x840] sm:$0xff] }
 0x182   :  { %v845_v16 = vld [vmem:[#allocation5 + $0x860] sm:$0xff] }
 0x183   :  { %2485 = vmatpush1.bf16.msra.mxu0 %v2484_v42  ;;  %2741 = vmatpush1.bf16.msra.mxu1 %v2740_v43  ;;  %v789_v42 = vld [vmem:[#allocation5 + $0x6a0] sm:$0xff]  ;;  %v2502_v43 = vpack.c.bf16 %v790_v34, %v786_v33 }
 0x184   :  { %2487 = vmatprep.subr.bf16.mxu0 %v2486_v46  ;;  %2743 = vmatprep.subr.bf16.mxu1 %v2742_v17  ;;  %v791_v46 = vld [vmem:[#allocation5 + $0x6b0] sm:$0xff]  ;;  %v794_v17 = vld [vmem:[#allocation5 + $0x6c8] sm:$0xff]  ;;  %v2504_v50 = vpack.c.bf16 %v789_v42, %v785_v39  ;;  %v817_v33 = vld [vmem:[#allocation5 + $0x780] sm:$0xff] }
 0x185   :  { %v2760_v51 = vpack.c.bf16 %v791_v46, %v787_v45  ;;  %v821_v34 = vld [vmem:[#allocation5 + $0x7a0] sm:$0xff]  ;;  %v826_v39 = vld [vmem:[#allocation5 + $0x7c8] sm:$0xff]  ;;  %v267_v45 = vsub.s32 5, %v3813_v19 }
 0x186   :  { %v830_v42 = vld [vmem:[#allocation5 + $0x7e8] sm:$0xff] }
 0x187   :  { %2489 = vmatpush1.bf16.msra.mxu0 %v2488_v54  ;;  %2745 = vmatpush1.bf16.msra.mxu1 %v2744_v55  ;;  %v3835_v8 = vpop.f32.mrb[2].mxu1  ;;  %v797_v54 = vld [vmem:[#allocation5 + $0x6e0] sm:$0xff]  ;;  %v2506_v55 = vpack.c.bf16 %v798_v47, %v794_v17  ;;  %v2520_v17 = vpack.c.bf16 %v821_v34, %v817_v33 }
 0x188   :  { %2491 = vmatprep.subr.bf16.mxu0 %v2490_v58  ;;  %2747 = vmatprep.subr.bf16.mxu1 %v2746_v59  ;;  %v424_v14 = vpop.f32.mrb[3].mxu1  ;;  %v799_v58 = vld [vmem:[#allocation5 + $0x6f0] sm:$0xff]  ;;  %v802_v59 = vld [vmem:[#allocation5 + $0x708] sm:$0xff]  ;;  %v2508_v63 = vpack.c.bf16 %v797_v54, %v793_v52  ;;  %v849_v33 = vld [vmem:[#allocation5 + $0x880] sm:$0xff] }
 0x189   :  { %v425_v23 = vadd.f32 %v424_v14, %v260_v3  ;;  %v2764_v0 = vpack.c.bf16 %v799_v58, %v795_v57  ;;  %v805_v3 = vld [vmem:[#allocation5 + $0x720] sm:$0xff]  ;;  %v2768_v14 = vpack.c.bf16 %v807_v7, %v803_v6  ;;  %v827_v52 = vld [vmem:[#allocation5 + $0x7d0] sm:$0xff]  ;;  %v836_v57 = vld [vmem:[#allocation5 + $0x818] sm:$0xff] }
 0x18a   :  { %v2512_v13 = vpack.c.bf16 %v805_v3, %v801_v2  ;;  %v831_v54 = vld [vmem:[#allocation5 + $0x7f0] sm:$0xff]  ;;  %v840_v58 = vld [vmem:[#allocation5 + $0x838] sm:$0xff]  ;;  %v842_v7 = vld [vmem:[#allocation5 + $0x848] sm:$0xff] }
 0x18b   :  { %2493 = vmatpush1.bf16.msra.mxu0 %v2492_v4  ;;  %2749 = vmatpush1.bf16.msra.mxu1 %v2748_v5  ;;  %v572_v28 = vmax.f32 %v425_v23, 0.0  ;;  %v2510_v4 = vpack.c.bf16 %v806_v60, %v802_v59  ;;  %v2766_v5 = vpack.c.bf16 %v808_v62, %v804_v61  ;;  %v2770_v23 = vpack.c.bf16 %v816_v12, %v812_v11  ;;  %v839_v6 = vld [vmem:[#allocation5 + $0x830] sm:$0xff]  ;;  %v853_v34 = vld [vmem:[#allocation5 + $0x8a0] sm:$0xff] }
 0x18c   :  { %2495 = vmatprep.subr.bf16.mxu0 %v2494_v9  ;;  %2751 = vmatprep.subr.bf16.mxu1 %v2750_v10  ;;  %v810_v9 = vld [vmem:[#allocation5 + $0x748] sm:$0xff]  ;;  %v268_v59 = vrot.slane %v3818_v21, %v267_v45  ;;  %v2524_v61 = vpack.c.bf16 %v829_v49, %v825_v48  ;;  %v2780_v62 = vpack.c.bf16 %v831_v54, %v827_v52 }
 0x18d   :  { %1246 = vmatprep.mubr.f32.mxu0 %v572_v28  ;;  %1530 = vmatprep.mubr.f32.mxu1 %v572_v28  ;;  %v814_v10 = vld [vmem:[#allocation5 + $0x768] sm:$0xff]  ;;  %v820_v28 = vld [vmem:[#allocation5 + $0x798] sm:$0xff]  ;;  %v2536_v45 = vpack.c.bf16 %v853_v34, %v849_v33 }
 0x18e   :  { %v2514_v18 = vpack.c.bf16 %v814_v10, %v810_v9  ;;  %v844_v10 = vld [vmem:[#allocation5 + $0x858] sm:$0xff]  ;;  %v496_v11 = vadd.f32 %v3829_v41, %v268_v59  ;;  %v2532_v41 = vpack.c.bf16 %v845_v16, %v841_v15  ;;  %v866_v52 = vld [vmem:[#allocation5 + $0x908] sm:$0xff]  ;;  %v865_v59 = vld [vmem:[#allocation5 + $0x900] sm:$0xff] }
 0x18f   :  { %2497 = vmatpush1.bf16.msra.mxu0 %v2496_v24  ;;  %2753 = vmatpush1.bf16.msra.mxu1 %v2752_v25  ;;  %v811_v24 = vld [vmem:[#allocation5 + $0x750] sm:$0xff]  ;;  %v870_v54 = vld [vmem:[#allocation5 + $0x928] sm:$0xff]  ;;  %v892_v34 = vld [vmem:[#allocation5 + $0x9d8] sm:$0xff] }
 0x190   :  { %2499 = vmatprep.subr.bf16.mxu0 %v2498_v29  ;;  %2755 = vmatprep.subr.bf16.mxu1 %v2754_v30  ;;  %v815_v25 = vld [vmem:[#allocation5 + $0x770] sm:$0xff]  ;;  %v824_v29 = vld [vmem:[#allocation5 + $0x7b8] sm:$0xff]  ;;  %v255_v30 = vsub.s32 2, %v3813_v19  ;;  %v882_v15 = vld [vmem:[#allocation5 + $0x988] sm:$0xff] }
 0x191   :  { %v2772_v32 = vpack.c.bf16 %v815_v25, %v811_v24  ;;  %v2774_v36 = vpack.c.bf16 %v824_v29, %v820_v28  ;;  %v843_v24 = vld [vmem:[#allocation5 + $0x850] sm:$0xff]  ;;  %v852_v28 = vld [vmem:[#allocation5 + $0x898] sm:$0xff]  ;;  %v886_v16 = vld [vmem:[#allocation5 + $0x9a8] sm:$0xff] }
 0x192   :  { %v256_v46 = vrot.slane %v3818_v21, %v255_v30  ;;  %v846_v21 = vld [vmem:[#allocation5 + $0x868] sm:$0xff]  ;;  %v847_v25 = vld [vmem:[#allocation5 + $0x870] sm:$0xff]  ;;  %v856_v29 = vld [vmem:[#allocation5 + $0x8b8] sm:$0xff] }
 0x193   :  { %2501 = vmatpush1.bf16.msra.mxu0 %v2500_v37  ;;  %2757 = vmatpush1.bf16.msra.mxu1 %v2756_v38  ;;  %v819_v37 = vld [vmem:[#allocation5 + $0x790] sm:$0xff]  ;;  %v894_v33 = vld [vmem:[#allocation5 + $0x9e8] sm:$0xff] }
 0x194   :  { %2503 = vmatprep.subr.bf16.mxu0 %v2502_v43  ;;  %2759 = vmatprep.subr.bf16.mxu1 %v2758_v44  ;;  %v823_v38 = vld [vmem:[#allocation5 + $0x7b0] sm:$0xff]  ;;  %v828_v43 = vld [vmem:[#allocation5 + $0x7d8] sm:$0xff]  ;;  %v423_v60 = vadd.f32 %v3835_v8, %v256_v46 }
 0x195   :  { %v832_v44 = vld [vmem:[#allocation5 + $0x7f8] sm:$0xff]  ;;  %v2776_v47 = vpack.c.bf16 %v823_v38, %v819_v37  ;;  %v851_v37 = vld [vmem:[#allocation5 + $0x890] sm:$0xff] }
 0x196   :  { %v848_v8 = vld [vmem:[#allocation5 + $0x878] sm:$0xff]  ;;  %v571_v12 = vmax.f32 %v423_v60, 0.0  ;;  %v855_v38 = vld [vmem:[#allocation5 + $0x8b0] sm:$0xff]  ;;  %v869_v60 = vld [vmem:[#allocation5 + $0x920] sm:$0xff] }
 0x197   :  { %2505 = vmatpush1.bf16.msra.mxu0 %v2504_v50  ;;  %2761 = vmatpush1.bf16.msra.mxu1 %v2760_v51  ;;  %v2522_v50 = vpack.c.bf16 %v830_v42, %v826_v39  ;;  %v2778_v51 = vpack.c.bf16 %v832_v44, %v828_v43  ;;  %v858_v39 = vld [vmem:[#allocation5 + $0x8c8] sm:$0xff]  ;;  %v860_v43 = vld [vmem:[#allocation5 + $0x8d8] sm:$0xff]  ;;  %v2792_v46 = vpack.c.bf16 %v855_v38, %v851_v37  ;;  %v889_v38 = vld [vmem:[#allocation5 + $0x9c0] sm:$0xff] }
 0x198   :  { %2507 = vmatprep.subr.bf16.mxu0 %v2506_v55  ;;  %2763 = vmatprep.subr.bf16.mxu1 %v2762_v56  ;;  %v834_v55 = vld [vmem:[#allocation5 + $0x808] sm:$0xff]  ;;  %v864_v44 = vld [vmem:[#allocation5 + $0x8f8] sm:$0xff] }
 0x199   :  { %v838_v56 = vld [vmem:[#allocation5 + $0x828] sm:$0xff]  ;;  %v2794_v49 = vpack.c.bf16 %v864_v44, %v860_v43  ;;  %v891_v44 = vld [vmem:[#allocation5 + $0x9d0] sm:$0xff] }
 0x19a   :  { %v2526_v3 = vpack.c.bf16 %v838_v56, %v834_v55  ;;  %v862_v42 = vld [vmem:[#allocation5 + $0x8e8] sm:$0xff]  ;;  %v868_v55 = vld [vmem:[#allocation5 + $0x918] sm:$0xff] }
 0x19b   :  { %2509 = vmatpush1.bf16.msra.mxu0 %v2508_v63  ;;  %2765 = vmatpush1.bf16.msra.mxu1 %v2764_v0  ;;  %v833_v63 = vld [vmem:[#allocation5 + $0x800] sm:$0xff]  ;;  %v2538_v48 = vpack.c.bf16 %v862_v42, %v858_v39  ;;  %v872_v56 = vld [vmem:[#allocation5 + $0x938] sm:$0xff] }
 0x19c   :  { %2511 = vmatprep.subr.bf16.mxu0 %v2510_v4  ;;  %2767 = vmatprep.subr.bf16.mxu1 %v2766_v5  ;;  %v837_v0 = vld [vmem:[#allocation5 + $0x820] sm:$0xff]  ;;  %v2782_v4 = vpack.c.bf16 %v840_v58, %v836_v57  ;;  %v835_v5 = vld [vmem:[#allocation5 + $0x810] sm:$0xff] }
 0x19d   :  { %v893_v39 = vld [vmem:[#allocation5 + $0x9e0] sm:$0xff] }
 0x19f   :  { %2513 = vmatpush1.bf16.msra.mxu0 %v2512_v13  ;;  %2769 = vmatpush1.bf16.msra.mxu1 %v2768_v14  ;;  %v2528_v13 = vpack.c.bf16 %v837_v0, %v833_v63  ;;  %v2784_v14 = vpack.c.bf16 %v839_v6, %v835_v5  ;;  %v867_v63 = vld [vmem:[#allocation5 + $0x910] sm:$0xff]  ;;  %v876_v5 = vld [vmem:[#allocation5 + $0x958] sm:$0xff] }
 0x1a0   :  { %2515 = vmatprep.subr.bf16.mxu0 %v2514_v18  ;;  %2771 = vmatprep.subr.bf16.mxu1 %v2770_v23  ;;  %v2530_v18 = vpack.c.bf16 %v846_v21, %v842_v7  ;;  %v2786_v23 = vpack.c.bf16 %v848_v8, %v844_v10  ;;  %v871_v0 = vld [vmem:[#allocation5 + $0x930] sm:$0xff]  ;;  %v880_v6 = vld [vmem:[#allocation5 + $0x978] sm:$0xff]  ;;  %v2544_v7 = vpack.c.bf16 %v869_v60, %v865_v59  ;;  %v873_v10 = vld [vmem:[#allocation5 + $0x940] sm:$0xff] }
 0x1a1   :  { %v2800_v21 = vpack.c.bf16 %v871_v0, %v867_v63  ;;  %v877_v8 = vld [vmem:[#allocation5 + $0x960] sm:$0xff]  ;;  %v910_v59 = vld [vmem:[#allocation5 + $0xa68] sm:$0xff]  ;;  %v908_v60 = vld [vmem:[#allocation5 + $0xa58] sm:$0xff] }
 0x1a2   :  { %v905_v0 = vld [vmem:[#allocation5 + $0xa40] sm:$0xff] }
 0x1a3   :  { %2517 = vmatpush1.bf16.msra.mxu0 %v2516_v31  ;;  %2773 = vmatpush1.bf16.msra.mxu1 %v2772_v32  ;;  %v574_v31 = vmax.f32 %v496_v11, 0.0  ;;  %v2788_v32 = vpack.c.bf16 %v847_v25, %v843_v24  ;;  %v2548_v24 = vpack.c.bf16 %v877_v8, %v873_v10  ;;  %v918_v10 = vld [vmem:[#allocation5 + $0xaa8] sm:$0xff]  ;;  %v916_v8 = vld [vmem:[#allocation5 + $0xa98] sm:$0xff] }
 0x1a4   :  { %2519 = vmatprep.subr.bf16.mxu0 %v2518_v35  ;;  %2775 = vmatprep.subr.bf16.mxu1 %v2774_v36  ;;  %v2534_v35 = vpack.c.bf16 %v854_v27, %v850_v26  ;;  %v2790_v36 = vpack.c.bf16 %v856_v29, %v852_v28  ;;  %v881_v26 = vld [vmem:[#allocation5 + $0x980] sm:$0xff]  ;;  %v2550_v28 = vpack.c.bf16 %v886_v16, %v882_v15 }
 0x1a5   :  { %v885_v27 = vld [vmem:[#allocation5 + $0x9a0] sm:$0xff] }
 0x1a6   :  { %v917_v15 = vld [vmem:[#allocation5 + $0xaa0] sm:$0xff] }
 0x1a7   :  { %2521 = vmatpush1.bf16.msra.mxu0 %v2520_v17  ;;  %2777 = vmatpush1.bf16.msra.mxu1 %v2776_v47  ;;  %v3844_v2 = vpop.f32.mrb[4].mxu1  ;;  %v857_v17 = vld [vmem:[#allocation5 + $0x8c0] sm:$0xff] }
 0x1a8   :  { %2523 = vmatprep.subr.bf16.mxu0 %v2522_v50  ;;  %2779 = vmatprep.subr.bf16.mxu1 %v2778_v51  ;;  %v3846_v9 = vpop.f32.mrb[5].mxu1  ;;  %v861_v47 = vld [vmem:[#allocation5 + $0x8e0] sm:$0xff]  ;;  %v859_v50 = vld [vmem:[#allocation5 + $0x8d0] sm:$0xff] }
 0x1a9   :  { %v863_v51 = vld [vmem:[#allocation5 + $0x8f0] sm:$0xff]  ;;  %v2540_v57 = vpack.c.bf16 %v861_v47, %v857_v17  ;;  %v902_v17 = vld [vmem:[#allocation5 + $0xa28] sm:$0xff]  ;;  %v900_v47 = vld [vmem:[#allocation5 + $0xa18] sm:$0xff] }
 0x1aa   :  { %v2796_v58 = vpack.c.bf16 %v863_v51, %v859_v50  ;;  %v897_v51 = vld [vmem:[#allocation5 + $0xa00] sm:$0xff] }
 0x1ab   :  { %2525 = vmatpush1.bf16.msra.mxu0 %v2524_v61  ;;  %2781 = vmatpush1.bf16.msra.mxu1 %v2780_v62  ;;  %v2542_v61 = vpack.c.bf16 %v870_v54, %v866_v52  ;;  %v2798_v62 = vpack.c.bf16 %v872_v56, %v868_v55  ;;  %v901_v52 = vld [vmem:[#allocation5 + $0xa20] sm:$0xff]  ;;  %v899_v56 = vld [vmem:[#allocation5 + $0xa10] sm:$0xff] }
 0x1ac   :  { %2527 = vmatprep.subr.bf16.mxu0 %v2526_v3  ;;  %2783 = vmatprep.subr.bf16.mxu1 %v2782_v4  ;;  %v874_v3 = vld [vmem:[#allocation5 + $0x948] sm:$0xff] }
 0x1ad   :  { %v878_v4 = vld [vmem:[#allocation5 + $0x968] sm:$0xff] }
 0x1ae   :  { %1247 = vmatmul.mubr.f32.vlgmr.msra.gmra.mrb[2].mxu0 %v571_v12  ;;  %1531 = vmatmul.mubr.f32.vlgmr.msra.gmra.mrb[6].mxu1 %v571_v12  ;;  %v2546_v11 = vpack.c.bf16 %v878_v4, %v874_v3  ;;  %v2802_v12 = vpack.c.bf16 %v880_v6, %v876_v5  ;;  %v909_v3 = vld [vmem:[#allocation5 + $0xa60] sm:$0xff]  ;;  %v907_v6 = vld [vmem:[#allocation5 + $0xa50] sm:$0xff] }
 0x1af   :  { %2529 = vmatpush1.bf16.msra.mxu0 %v2528_v13  ;;  %2785 = vmatpush1.bf16.msra.mxu1 %v2784_v14  ;;  %v875_v13 = vld [vmem:[#allocation5 + $0x950] sm:$0xff] }
 0x1b0   :  { %2531 = vmatprep.subr.bf16.mxu0 %v2530_v18  ;;  %2787 = vmatprep.subr.bf16.mxu1 %v2786_v23  ;;  %v879_v14 = vld [vmem:[#allocation5 + $0x970] sm:$0xff]  ;;  %v884_v18 = vld [vmem:[#allocation5 + $0x998] sm:$0xff] }
 0x1b1   :  { %1317 = vmatprep.mubr.f32.mxu0 %v574_v31  ;;  %1601 = vmatprep.mubr.f32.mxu1 %v574_v31  ;;  %v888_v23 = vld [vmem:[#allocation5 + $0x9b8] sm:$0xff]  ;;  %v2804_v25 = vpack.c.bf16 %v879_v14, %v875_v13  ;;  %v883_v31 = vld [vmem:[#allocation5 + $0x990] sm:$0xff]  ;;  %v913_v14 = vld [vmem:[#allocation5 + $0xa80] sm:$0xff] }
 0x1b2   :  { %v2806_v29 = vpack.c.bf16 %v888_v23, %v884_v18  ;;  %v915_v23 = vld [vmem:[#allocation5 + $0xa90] sm:$0xff] }
 0x1b3   :  { %2533 = vmatpush1.bf16.msra.mxu0 %v2532_v41  ;;  %2789 = vmatpush1.bf16.msra.mxu1 %v2788_v32  ;;  %v887_v41 = vld [vmem:[#allocation5 + $0x9b0] sm:$0xff]  ;;  %v890_v32 = vld [vmem:[#allocation5 + $0x9c8] sm:$0xff] }
 0x1b4   :  { %2535 = vmatprep.subr.bf16.mxu0 %v2534_v35  ;;  %2791 = vmatprep.subr.bf16.mxu1 %v2790_v36  ;;  %v896_v35 = vld [vmem:[#allocation5 + $0x9f8] sm:$0xff]  ;;  %v2552_v36 = vpack.c.bf16 %v885_v27, %v881_v26  ;;  %v2808_v37 = vpack.c.bf16 %v887_v41, %v883_v31  ;;  %v2554_v42 = vpack.c.bf16 %v894_v33, %v890_v32  ;;  %v926_v26 = vld [vmem:[#allocation5 + $0xae8] sm:$0xff]  ;;  %v921_v41 = vld [vmem:[#allocation5 + $0xac0] sm:$0xff] }
 0x1b5   :  { %v2810_v43 = vpack.c.bf16 %v896_v35, %v892_v34  ;;  %v924_v27 = vld [vmem:[#allocation5 + $0xad8] sm:$0xff]  ;;  %v925_v32 = vld [vmem:[#allocation5 + $0xae0] sm:$0xff]  ;;  %v923_v35 = vld [vmem:[#allocation5 + $0xad0] sm:$0xff] }
 0x1b7   :  { %2537 = vmatpush1.bf16.msra.mxu0 %v2536_v45  ;;  %2793 = vmatpush1.bf16.msra.mxu1 %v2792_v46  ;;  %v895_v45 = vld [vmem:[#allocation5 + $0x9f0] sm:$0xff]  ;;  %v898_v46 = vld [vmem:[#allocation5 + $0xa08] sm:$0xff] }
 0x1b8   :  { %2539 = vmatprep.subr.bf16.mxu0 %v2538_v48  ;;  %2795 = vmatprep.subr.bf16.mxu1 %v2794_v49  ;;  %v904_v48 = vld [vmem:[#allocation5 + $0xa38] sm:$0xff]  ;;  %v2556_v49 = vpack.c.bf16 %v893_v39, %v889_v38  ;;  %v2812_v50 = vpack.c.bf16 %v895_v45, %v891_v44  ;;  %v2558_v54 = vpack.c.bf16 %v902_v17, %v898_v46  ;;  %v934_v38 = vld [vmem:[#allocation5 + $0xb28] sm:$0xff]  ;;  %v929_v45 = vld [vmem:[#allocation5 + $0xb00] sm:$0xff] }
 0x1b9   :  { %v2814_v55 = vpack.c.bf16 %v904_v48, %v900_v47  ;;  %v932_v39 = vld [vmem:[#allocation5 + $0xb18] sm:$0xff]  ;;  %v933_v46 = vld [vmem:[#allocation5 + $0xb20] sm:$0xff]  ;;  %v931_v48 = vld [vmem:[#allocation5 + $0xb10] sm:$0xff] }
 0x1bb   :  { %2541 = vmatpush1.bf16.msra.mxu0 %v2540_v57  ;;  %2797 = vmatpush1.bf16.msra.mxu1 %v2796_v58  ;;  %v903_v57 = vld [vmem:[#allocation5 + $0xa30] sm:$0xff]  ;;  %v906_v58 = vld [vmem:[#allocation5 + $0xa48] sm:$0xff] }
 0x1bc   :  { %2543 = vmatprep.subr.bf16.mxu0 %v2542_v61  ;;  %2799 = vmatprep.subr.bf16.mxu1 %v2798_v62  ;;  %v912_v61 = vld [vmem:[#allocation5 + $0xa78] sm:$0xff]  ;;  %v2560_v62 = vpack.c.bf16 %v901_v52, %v897_v51  ;;  %v2816_v63 = vpack.c.bf16 %v903_v57, %v899_v56  ;;  %v2562_v4 = vpack.c.bf16 %v910_v59, %v906_v58  ;;  %v942_v51 = vld [vmem:[#allocation5 + $0xb68] sm:$0xff]  ;;  %v937_v57 = vld [vmem:[#allocation5 + $0xb40] sm:$0xff] }
 0x1bd   :  { %v2818_v5 = vpack.c.bf16 %v912_v61, %v908_v60  ;;  %v940_v52 = vld [vmem:[#allocation5 + $0xb58] sm:$0xff]  ;;  %v941_v58 = vld [vmem:[#allocation5 + $0xb60] sm:$0xff]  ;;  %v939_v61 = vld [vmem:[#allocation5 + $0xb50] sm:$0xff] }
 0x1bf   :  { %2545 = vmatpush1.bf16.msra.mxu0 %v2544_v7  ;;  %2801 = vmatpush1.bf16.msra.mxu1 %v2800_v21  ;;  %v911_v7 = vld [vmem:[#allocation5 + $0xa70] sm:$0xff]  ;;  %v914_v21 = vld [vmem:[#allocation5 + $0xa88] sm:$0xff] }
 0x1c0   :  { %2547 = vmatprep.subr.bf16.mxu0 %v2546_v11  ;;  %2803 = vmatprep.subr.bf16.mxu1 %v2802_v12  ;;  %v920_v11 = vld [vmem:[#allocation5 + $0xab8] sm:$0xff]  ;;  %v2564_v12 = vpack.c.bf16 %v909_v3, %v905_v0  ;;  %v2820_v13 = vpack.c.bf16 %v911_v7, %v907_v6  ;;  %v2566_v16 = vpack.c.bf16 %v918_v10, %v914_v21  ;;  %v950_v0 = vld [vmem:[#allocation5 + $0xba8] sm:$0xff]  ;;  %v945_v21 = vld [vmem:[#allocation5 + $0xb80] sm:$0xff] }
 0x1c1   :  { %v2822_v18 = vpack.c.bf16 %v920_v11, %v916_v8  ;;  %v948_v3 = vld [vmem:[#allocation5 + $0xb98] sm:$0xff]  ;;  %v2580_v6 = vpack.c.bf16 %v941_v58, %v937_v57  ;;  %v949_v10 = vld [vmem:[#allocation5 + $0xba0] sm:$0xff] }
 0x1c2   :  { %v969_v57 = vld [vmem:[#allocation5 + $0xc40] sm:$0xff] }
 0x1c3   :  { %2549 = vmatpush1.bf16.msra.mxu0 %v2548_v24  ;;  %2805 = vmatpush1.bf16.msra.mxu1 %v2804_v25  ;;  %v919_v24 = vld [vmem:[#allocation5 + $0xab0] sm:$0xff]  ;;  %v922_v25 = vld [vmem:[#allocation5 + $0xac8] sm:$0xff]  ;;  %v973_v58 = vld [vmem:[#allocation5 + $0xc60] sm:$0xff] }
 0x1c4   :  { %2551 = vmatprep.subr.bf16.mxu0 %v2550_v28  ;;  %2807 = vmatprep.subr.bf16.mxu1 %v2806_v29  ;;  %v928_v28 = vld [vmem:[#allocation5 + $0xaf8] sm:$0xff]  ;;  %v2568_v29 = vpack.c.bf16 %v917_v15, %v913_v14  ;;  %v2824_v31 = vpack.c.bf16 %v919_v24, %v915_v23  ;;  %v2570_v33 = vpack.c.bf16 %v926_v26, %v922_v25  ;;  %v954_v14 = vld [vmem:[#allocation5 + $0xbc8] sm:$0xff]  ;;  %v275_v23 = vsub.s32 7, %v3813_v19 }
 0x1c5   :  { %v2826_v34 = vpack.c.bf16 %v928_v28, %v924_v27  ;;  %v958_v15 = vld [vmem:[#allocation5 + $0xbe8] sm:$0xff]  ;;  %v3851_v24 = vld [vmem:[#allocation3] sm:$0xff]  ;;  %v2584_v26 = vpack.c.bf16 %v949_v10, %v945_v21  ;;  %v953_v28 = vld [vmem:[#allocation5 + $0xbc0] sm:$0xff] }
 0x1c6   :  { %v981_v21 = vld [vmem:[#allocation5 + $0xca0] sm:$0xff] }
 0x1c7   :  { %2553 = vmatpush1.bf16.msra.mxu0 %v2552_v36  ;;  %2809 = vmatpush1.bf16.msra.mxu1 %v2808_v37  ;;  %v927_v36 = vld [vmem:[#allocation5 + $0xaf0] sm:$0xff]  ;;  %v930_v37 = vld [vmem:[#allocation5 + $0xb08] sm:$0xff] }
 0x1c8   :  { %2555 = vmatprep.subr.bf16.mxu0 %v2554_v42  ;;  %2811 = vmatprep.subr.bf16.mxu1 %v2810_v43  ;;  %v936_v42 = vld [vmem:[#allocation5 + $0xb38] sm:$0xff]  ;;  %v2572_v43 = vpack.c.bf16 %v925_v32, %v921_v41  ;;  %v2828_v44 = vpack.c.bf16 %v927_v36, %v923_v35  ;;  %v2574_v17 = vpack.c.bf16 %v934_v38, %v930_v37  ;;  %v955_v32 = vld [vmem:[#allocation5 + $0xbd0] sm:$0xff]  ;;  %v966_v35 = vld [vmem:[#allocation5 + $0xc28] sm:$0xff] }
 0x1c9   :  { %v2830_v47 = vpack.c.bf16 %v936_v42, %v932_v39  ;;  %v964_v36 = vld [vmem:[#allocation5 + $0xc18] sm:$0xff]  ;;  %v276_v38 = vrot.slane %v3851_v24, %v275_v23 }
 0x1ca   :  { %v968_v37 = vld [vmem:[#allocation5 + $0xc38] sm:$0xff] }
 0x1cb   :  { %2557 = vmatpush1.bf16.msra.mxu0 %v2556_v49  ;;  %2813 = vmatpush1.bf16.msra.mxu1 %v2812_v50  ;;  %v935_v49 = vld [vmem:[#allocation5 + $0xb30] sm:$0xff]  ;;  %v938_v50 = vld [vmem:[#allocation5 + $0xb48] sm:$0xff] }
 0x1cc   :  { %2559 = vmatprep.subr.bf16.mxu0 %v2558_v54  ;;  %2815 = vmatprep.subr.bf16.mxu1 %v2814_v55  ;;  %v944_v54 = vld [vmem:[#allocation5 + $0xb78] sm:$0xff]  ;;  %v2576_v55 = vpack.c.bf16 %v933_v46, %v929_v45  ;;  %v2832_v56 = vpack.c.bf16 %v935_v49, %v931_v48  ;;  %v2578_v59 = vpack.c.bf16 %v942_v51, %v938_v50  ;;  %v965_v45 = vld [vmem:[#allocation5 + $0xc20] sm:$0xff]  ;;  %v967_v48 = vld [vmem:[#allocation5 + $0xc30] sm:$0xff] }
 0x1cd   :  { %v2834_v60 = vpack.c.bf16 %v944_v54, %v940_v52  ;;  %v970_v49 = vld [vmem:[#allocation5 + $0xc48] sm:$0xff]  ;;  %v972_v51 = vld [vmem:[#allocation5 + $0xc58] sm:$0xff]  ;;  %v567_v54 = vadd.f32 %v3846_v9, %v276_v38  ;;  %v2596_v9 = vpack.c.bf16 %v973_v58, %v969_v57  ;;  %v997_v38 = vld [vmem:[#allocation5 + $0xd20] sm:$0xff] }
 0x1ce   :  { %v974_v50 = vld [vmem:[#allocation5 + $0xc68] sm:$0xff]  ;;  %v976_v52 = vld [vmem:[#allocation5 + $0xc78] sm:$0xff] }
 0x1cf   :  { %2561 = vmatpush1.bf16.msra.mxu0 %v2560_v62  ;;  %2817 = vmatpush1.bf16.msra.mxu1 %v2816_v63  ;;  %v943_v62 = vld [vmem:[#allocation5 + $0xb70] sm:$0xff]  ;;  %v946_v63 = vld [vmem:[#allocation5 + $0xb88] sm:$0xff]  ;;  %v1012_v58 = vld [vmem:[#allocation5 + $0xd98] sm:$0xff] }
 0x1d0   :  { %2563 = vmatprep.subr.bf16.mxu0 %v2562_v4  ;;  %2819 = vmatprep.subr.bf16.mxu1 %v2818_v5  ;;  %v952_v4 = vld [vmem:[#allocation5 + $0xbb8] sm:$0xff]  ;;  %v263_v5 = vsub.s32 4, %v3813_v19  ;;  %v2836_v7 = vpack.c.bf16 %v943_v62, %v939_v61  ;;  %v2582_v8 = vpack.c.bf16 %v950_v0, %v946_v63  ;;  %v971_v61 = vld [vmem:[#allocation5 + $0xc50] sm:$0xff]  ;;  %v978_v63 = vld [vmem:[#allocation5 + $0xc88] sm:$0xff] }
 0x1d1   :  { %v2838_v11 = vpack.c.bf16 %v952_v4, %v948_v3  ;;  %v975_v62 = vld [vmem:[#allocation5 + $0xc70] sm:$0xff]  ;;  %v982_v0 = vld [vmem:[#allocation5 + $0xca8] sm:$0xff]  ;;  %v980_v3 = vld [vmem:[#allocation5 + $0xc98] sm:$0xff] }
 0x1d2   :  { %v264_v25 = vrot.slane %v3851_v24, %v263_v5  ;;  %v984_v4 = vld [vmem:[#allocation5 + $0xcb8] sm:$0xff]  ;;  %v576_v5 = vmax.f32 %v567_v54, 0.0  ;;  %v2598_v10 = vpack.c.bf16 %v982_v0, %v978_v63  ;;  %v1014_v57 = vld [vmem:[#allocation5 + $0xda8] sm:$0xff]  ;;  %v1013_v63 = vld [vmem:[#allocation5 + $0xda0] sm:$0xff] }
 0x1d3   :  { %2565 = vmatpush1.bf16.msra.mxu0 %v2564_v12  ;;  %2821 = vmatpush1.bf16.msra.mxu1 %v2820_v13  ;;  %v947_v12 = vld [vmem:[#allocation5 + $0xb90] sm:$0xff] }
 0x1d4   :  { %2567 = vmatprep.subr.bf16.mxu0 %v2566_v16  ;;  %2823 = vmatprep.subr.bf16.mxu1 %v2822_v18  ;;  %v951_v13 = vld [vmem:[#allocation5 + $0xbb0] sm:$0xff]  ;;  %v956_v16 = vld [vmem:[#allocation5 + $0xbd8] sm:$0xff]  ;;  %v494_v39 = vadd.f32 %v3827_v40, %v264_v25  ;;  %v985_v25 = vld [vmem:[#allocation5 + $0xcc0] sm:$0xff] }
 0x1d5   :  { %v960_v18 = vld [vmem:[#allocation5 + $0xbf8] sm:$0xff]  ;;  %v2840_v27 = vpack.c.bf16 %v951_v13, %v947_v12  ;;  %v983_v12 = vld [vmem:[#allocation5 + $0xcb0] sm:$0xff]  ;;  %v986_v13 = vld [vmem:[#allocation5 + $0xcc8] sm:$0xff] }
 0x1d6   :  { %v2842_v41 = vpack.c.bf16 %v960_v18, %v956_v16  ;;  %v992_v16 = vld [vmem:[#allocation5 + $0xcf8] sm:$0xff] }
 0x1d7   :  { %2569 = vmatpush1.bf16.msra.mxu0 %v2568_v29  ;;  %2825 = vmatpush1.bf16.msra.mxu1 %v2824_v31  ;;  %v957_v29 = vld [vmem:[#allocation5 + $0xbe0] sm:$0xff]  ;;  %v2586_v31 = vpack.c.bf16 %v958_v15, %v954_v14  ;;  %v990_v14 = vld [vmem:[#allocation5 + $0xce8] sm:$0xff]  ;;  %v988_v15 = vld [vmem:[#allocation5 + $0xcd8] sm:$0xff] }
 0x1d8   :  { %2571 = vmatprep.subr.bf16.mxu0 %v2570_v33  ;;  %2827 = vmatprep.subr.bf16.mxu1 %v2826_v34  ;;  %v959_v33 = vld [vmem:[#allocation5 + $0xbf0] sm:$0xff]  ;;  %v962_v34 = vld [vmem:[#allocation5 + $0xc08] sm:$0xff]  ;;  %v2588_v42 = vpack.c.bf16 %v957_v29, %v953_v28  ;;  %v2858_v28 = vpack.c.bf16 %v992_v16, %v988_v15 }
 0x1d9   :  { %v2590_v46 = vpack.c.bf16 %v966_v35, %v962_v34  ;;  %v987_v29 = vld [vmem:[#allocation5 + $0xcd0] sm:$0xff]  ;;  %v1000_v34 = vld [vmem:[#allocation5 + $0xd38] sm:$0xff] }
 0x1da   :  { %v1019_v15 = vld [vmem:[#allocation5 + $0xdd0] sm:$0xff] }
 0x1db   :  { %2573 = vmatpush1.bf16.msra.mxu0 %v2572_v43  ;;  %2829 = vmatpush1.bf16.msra.mxu1 %v2828_v44  ;;  %v2844_v43 = vpack.c.bf16 %v959_v33, %v955_v32  ;;  %v961_v44 = vld [vmem:[#allocation5 + $0xc00] sm:$0xff]  ;;  %v998_v32 = vld [vmem:[#allocation5 + $0xd28] sm:$0xff]  ;;  %v996_v33 = vld [vmem:[#allocation5 + $0xd18] sm:$0xff] }
 0x1dc   :  { %2575 = vmatprep.subr.bf16.mxu0 %v2574_v17  ;;  %2831 = vmatprep.subr.bf16.mxu1 %v2830_v47  ;;  %v2846_v17 = vpack.c.bf16 %v968_v37, %v964_v36  ;;  %v963_v47 = vld [vmem:[#allocation5 + $0xc10] sm:$0xff]  ;;  %v2592_v40 = vpack.c.bf16 %v965_v45, %v961_v44  ;;  %v993_v37 = vld [vmem:[#allocation5 + $0xd00] sm:$0xff]  ;;  %v1002_v45 = vld [vmem:[#allocation5 + $0xd48] sm:$0xff] }
 0x1dd   :  { %v999_v44 = vld [vmem:[#allocation5 + $0xd30] sm:$0xff] }
 0x1de   :  { %v1023_v16 = vld [vmem:[#allocation5 + $0xdf0] sm:$0xff] }
 0x1df   :  { %2577 = vmatpush1.bf16.msra.mxu0 %v2576_v55  ;;  %2833 = vmatpush1.bf16.msra.mxu1 %v2832_v56  ;;  %v573_v55 = vmax.f32 %v494_v39, 0.0  ;;  %v2848_v56 = vpack.c.bf16 %v967_v48, %v963_v47  ;;  %v1008_v47 = vld [vmem:[#allocation5 + $0xd78] sm:$0xff]  ;;  %v2608_v48 = vpack.c.bf16 %v997_v38, %v993_v37 }
 0x1e0   :  { %2579 = vmatprep.subr.bf16.mxu0 %v2578_v59  ;;  %2835 = vmatprep.subr.bf16.mxu1 %v2834_v60  ;;  %v2594_v59 = vpack.c.bf16 %v974_v50, %v970_v49  ;;  %v2850_v60 = vpack.c.bf16 %v976_v52, %v972_v51  ;;  %v1001_v50 = vld [vmem:[#allocation5 + $0xd40] sm:$0xff]  ;;  %v1036_v37 = vld [vmem:[#allocation5 + $0xe58] sm:$0xff] }
 0x1e1   :  { %v1005_v51 = vld [vmem:[#allocation5 + $0xd60] sm:$0xff]  ;;  %v1040_v38 = vld [vmem:[#allocation5 + $0xe78] sm:$0xff] }
 0x1e3   :  { %2581 = vmatpush1.bf16.msra.mxu0 %v2580_v6  ;;  %2837 = vmatpush1.bf16.msra.mxu1 %v2836_v7  ;;  %v2852_v6 = vpack.c.bf16 %v975_v62, %v971_v61  ;;  %v977_v7 = vld [vmem:[#allocation5 + $0xc80] sm:$0xff] }
 0x1e4   :  { %2583 = vmatprep.subr.bf16.mxu0 %v2582_v8  ;;  %2839 = vmatprep.subr.bf16.mxu1 %v2838_v11  ;;  %v2854_v8 = vpack.c.bf16 %v984_v4, %v980_v3  ;;  %v979_v11 = vld [vmem:[#allocation5 + $0xc90] sm:$0xff]  ;;  %v2600_v18 = vpack.c.bf16 %v981_v21, %v977_v7  ;;  %v1009_v62 = vld [vmem:[#allocation5 + $0xd80] sm:$0xff]  ;;  %v1020_v7 = vld [vmem:[#allocation5 + $0xdd8] sm:$0xff] }
 0x1e5   :  { %v2856_v23 = vpack.c.bf16 %v983_v12, %v979_v11  ;;  %v1011_v4 = vld [vmem:[#allocation5 + $0xd90] sm:$0xff]  ;;  %v1024_v21 = vld [vmem:[#allocation5 + $0xdf8] sm:$0xff]  ;;  %v1017_v11 = vld [vmem:[#allocation5 + $0xdc0] sm:$0xff] }
 0x1e6   :  { %v1021_v12 = vld [vmem:[#allocation5 + $0xde0] sm:$0xff] }
 0x1e7   :  { %2585 = vmatpush1.bf16.msra.mxu0 %v2584_v26  ;;  %2841 = vmatpush1.bf16.msra.mxu1 %v2840_v27  ;;  %v989_v26 = vld [vmem:[#allocation5 + $0xce0] sm:$0xff]  ;;  %v2602_v27 = vpack.c.bf16 %v990_v14, %v986_v13  ;;  %v2874_v14 = vpack.c.bf16 %v1024_v21, %v1020_v7  ;;  %v1051_v7 = vld [vmem:[#allocation5 + $0xed0] sm:$0xff] }
 0x1e8   :  { %2587 = vmatprep.subr.bf16.mxu0 %v2586_v31  ;;  %2843 = vmatprep.subr.bf16.mxu1 %v2842_v41  ;;  %v991_v31 = vld [vmem:[#allocation5 + $0xcf0] sm:$0xff]  ;;  %v994_v41 = vld [vmem:[#allocation5 + $0xd08] sm:$0xff]  ;;  %v2604_v35 = vpack.c.bf16 %v989_v26, %v985_v25  ;;  %v1028_v25 = vld [vmem:[#allocation5 + $0xe18] sm:$0xff] }
 0x1e9   :  { %v2860_v36 = vpack.c.bf16 %v991_v31, %v987_v29  ;;  %v2606_v39 = vpack.c.bf16 %v998_v32, %v994_v41  ;;  %v1032_v26 = vld [vmem:[#allocation5 + $0xe38] sm:$0xff]  ;;  %v1025_v29 = vld [vmem:[#allocation5 + $0xe00] sm:$0xff]  ;;  %v1055_v21 = vld [vmem:[#allocation5 + $0xef0] sm:$0xff] }
 0x1ea   :  { %v1029_v31 = vld [vmem:[#allocation5 + $0xe20] sm:$0xff]  ;;  %v2878_v32 = vpack.c.bf16 %v1032_v26, %v1028_v25  ;;  %v1059_v25 = vld [vmem:[#allocation5 + $0xf10] sm:$0xff] }
 0x1eb   :  { %2589 = vmatpush1.bf16.msra.mxu0 %v2588_v42  ;;  %2845 = vmatpush1.bf16.msra.mxu1 %v2844_v43  ;;  %v2862_v42 = vpack.c.bf16 %v1000_v34, %v996_v33  ;;  %v995_v43 = vld [vmem:[#allocation5 + $0xd10] sm:$0xff] }
 0x1ec   :  { %2591 = vmatprep.subr.bf16.mxu0 %v2590_v46  ;;  %2847 = vmatprep.subr.bf16.mxu1 %v2846_v17  ;;  %v1006_v46 = vld [vmem:[#allocation5 + $0xd68] sm:$0xff]  ;;  %v1004_v17 = vld [vmem:[#allocation5 + $0xd58] sm:$0xff]  ;;  %v2864_v49 = vpack.c.bf16 %v999_v44, %v995_v43  ;;  %v1027_v33 = vld [vmem:[#allocation5 + $0xe10] sm:$0xff] }
 0x1ed   :  { %v2610_v52 = vpack.c.bf16 %v1006_v46, %v1002_v45  ;;  %v2866_v54 = vpack.c.bf16 %v1008_v47, %v1004_v17  ;;  %v1031_v34 = vld [vmem:[#allocation5 + $0xe30] sm:$0xff]  ;;  %v1033_v43 = vld [vmem:[#allocation5 + $0xe40] sm:$0xff]  ;;  %v2882_v46 = vpack.c.bf16 %v1040_v38, %v1036_v37 }
 0x1ee   :  { %1318 = vmatmul.mubr.f32.vlgmr.msra.gmra.mrb[2].mxu0 %v573_v55  ;;  %1602 = vmatmul.mubr.f32.vlgmr.msra.gmra.mrb[6].mxu1 %v573_v55  ;;  %v1003_v55 = vld [vmem:[#allocation5 + $0xd50] sm:$0xff]  ;;  %v1037_v44 = vld [vmem:[#allocation5 + $0xe60] sm:$0xff] }
 0x1ef   :  { %2593 = vmatpush1.bf16.msra.mxu0 %v2592_v40  ;;  %2849 = vmatpush1.bf16.msra.mxu1 %v2848_v56  ;;  %v1007_v40 = vld [vmem:[#allocation5 + $0xd70] sm:$0xff]  ;;  %v1010_v56 = vld [vmem:[#allocation5 + $0xd88] sm:$0xff] }
 0x1f0   :  { %2595 = vmatprep.subr.bf16.mxu0 %v2594_v59  ;;  %2851 = vmatprep.subr.bf16.mxu1 %v2850_v60  ;;  %v1016_v59 = vld [vmem:[#allocation5 + $0xdb8] sm:$0xff]  ;;  %v2612_v60 = vpack.c.bf16 %v1005_v51, %v1001_v50  ;;  %v2868_v61 = vpack.c.bf16 %v1007_v40, %v1003_v55  ;;  %v2614_v0 = vpack.c.bf16 %v1014_v57, %v1010_v56  ;;  %v1035_v17 = vld [vmem:[#allocation5 + $0xe50] sm:$0xff]  ;;  %v1041_v55 = vld [vmem:[#allocation5 + $0xe80] sm:$0xff] }
 0x1f1   :  { %1388 = vmatprep.mubr.f32.mxu0 %v576_v5  ;;  %1672 = vmatprep.mubr.f32.mxu1 %v576_v5  ;;  %v2870_v3 = vpack.c.bf16 %v1016_v59, %v1012_v58  ;;  %v1015_v5 = vld [vmem:[#allocation5 + $0xdb0] sm:$0xff]  ;;  %v1044_v50 = vld [vmem:[#allocation5 + $0xe98] sm:$0xff]  ;;  %v1045_v40 = vld [vmem:[#allocation5 + $0xea0] sm:$0xff] }
 0x1f2   :  { %v1039_v47 = vld [vmem:[#allocation5 + $0xe70] sm:$0xff]  ;;  %v1048_v51 = vld [vmem:[#allocation5 + $0xeb8] sm:$0xff] }
 0x1f3   :  { %2597 = vmatpush1.bf16.msra.mxu0 %v2596_v9  ;;  %2853 = vmatpush1.bf16.msra.mxu1 %v2852_v6  ;;  %v1018_v9 = vld [vmem:[#allocation5 + $0xdc8] sm:$0xff]  ;;  %v2886_v57 = vpack.c.bf16 %v1048_v51, %v1044_v50  ;;  %v1043_v58 = vld [vmem:[#allocation5 + $0xe90] sm:$0xff] }
 0x1f4   :  { %2599 = vmatprep.subr.bf16.mxu0 %v2598_v10  ;;  %2855 = vmatprep.subr.bf16.mxu1 %v2854_v8  ;;  %v1022_v6 = vld [vmem:[#allocation5 + $0xde8] sm:$0xff]  ;;  %v2616_v10 = vpack.c.bf16 %v1013_v63, %v1009_v62  ;;  %v2872_v8 = vpack.c.bf16 %v1015_v5, %v1011_v4  ;;  %v1047_v59 = vld [vmem:[#allocation5 + $0xeb0] sm:$0xff]  ;;  %v1052_v62 = vld [vmem:[#allocation5 + $0xed8] sm:$0xff] }
 0x1f5   :  { %v2618_v13 = vpack.c.bf16 %v1022_v6, %v1018_v9  ;;  %v1056_v63 = vld [vmem:[#allocation5 + $0xef8] sm:$0xff]  ;;  %v1049_v4 = vld [vmem:[#allocation5 + $0xec0] sm:$0xff]  ;;  %v1063_v26 = vld [vmem:[#allocation5 + $0xf30] sm:$0xff] }
 0x1f6   :  { %v1053_v5 = vld [vmem:[#allocation5 + $0xee0] sm:$0xff]  ;;  %v2890_v6 = vpack.c.bf16 %v1056_v63, %v1052_v62  ;;  %v1067_v37 = vld [vmem:[#allocation5 + $0xf50] sm:$0xff] }
 0x1f7   :  { %2601 = vmatpush1.bf16.msra.mxu0 %v2600_v18  ;;  %2857 = vmatpush1.bf16.msra.mxu1 %v2856_v23  ;;  %v1026_v18 = vld [vmem:[#allocation5 + $0xe08] sm:$0xff]  ;;  %v1071_v38 = vld [vmem:[#allocation5 + $0xf70] sm:$0xff]  ;;  %v1085_v63 = vld [vmem:[#allocation5 + $0xfe0] sm:$0xff] }
 0x1f8   :  { %2603 = vmatprep.subr.bf16.mxu0 %v2602_v27  ;;  %2859 = vmatprep.subr.bf16.mxu1 %v2858_v28  ;;  %v1030_v23 = vld [vmem:[#allocation5 + $0xe28] sm:$0xff]  ;;  %v2620_v27 = vpack.c.bf16 %v1021_v12, %v1017_v11  ;;  %v2876_v28 = vpack.c.bf16 %v1023_v16, %v1019_v15  ;;  %v1060_v11 = vld [vmem:[#allocation5 + $0xf18] sm:$0xff]  ;;  %v1057_v15 = vld [vmem:[#allocation5 + $0xf00] sm:$0xff] }
 0x1f9   :  { %v2622_v41 = vpack.c.bf16 %v1030_v23, %v1026_v18  ;;  %v1064_v12 = vld [vmem:[#allocation5 + $0xf38] sm:$0xff]  ;;  %v1061_v16 = vld [vmem:[#allocation5 + $0xf20] sm:$0xff]  ;;  %v1075_v51 = vld [vmem:[#allocation5 + $0xf90] sm:$0xff] }
 0x1fa   :  { %v2894_v23 = vpack.c.bf16 %v1064_v12, %v1060_v11  ;;  %v1690_v11 = vld [vmem:[%s4318_s5 + $0x38] sm:$0xff] }
 0x1fb   :  { %2605 = vmatpush1.bf16.msra.mxu0 %v2604_v35  ;;  %2861 = vmatpush1.bf16.msra.mxu1 %v2860_v36  ;;  %v1034_v35 = vld [vmem:[#allocation5 + $0xe48] sm:$0xff] }
 0x1fc   :  { %2607 = vmatprep.subr.bf16.mxu0 %v2606_v39  ;;  %2863 = vmatprep.subr.bf16.mxu1 %v2862_v42  ;;  %v1038_v36 = vld [vmem:[#allocation5 + $0xe68] sm:$0xff]  ;;  %v2624_v39 = vpack.c.bf16 %v1029_v31, %v1025_v29  ;;  %v2880_v42 = vpack.c.bf16 %v1031_v34, %v1027_v33  ;;  %v1068_v29 = vld [vmem:[#allocation5 + $0xf58] sm:$0xff]  ;;  %v1065_v33 = vld [vmem:[#allocation5 + $0xf40] sm:$0xff] }
 0x1fd   :  { %v2626_v45 = vpack.c.bf16 %v1038_v36, %v1034_v35  ;;  %v1072_v31 = vld [vmem:[#allocation5 + $0xf78] sm:$0xff]  ;;  %v1069_v34 = vld [vmem:[#allocation5 + $0xf60] sm:$0xff] }
 0x1fe   :  { %v2898_v36 = vpack.c.bf16 %v1072_v31, %v1068_v29  ;;  %v1698_v29 = vld [vmem:[%s4318_s5 + $0x78] sm:$0xff] }
 0x1ff   :  { %2609 = vmatpush1.bf16.msra.mxu0 %v2608_v48  ;;  %2865 = vmatpush1.bf16.msra.mxu1 %v2864_v49  ;;  %v1042_v48 = vld [vmem:[#allocation5 + $0xe88] sm:$0xff] }
 0x200   :  { %2611 = vmatprep.subr.bf16.mxu0 %v2610_v52  ;;  %2867 = vmatprep.subr.bf16.mxu1 %v2866_v54  ;;  %v1046_v49 = vld [vmem:[#allocation5 + $0xea8] sm:$0xff]  ;;  %v2628_v52 = vpack.c.bf16 %v1037_v44, %v1033_v43  ;;  %v2884_v54 = vpack.c.bf16 %v1039_v47, %v1035_v17  ;;  %v1076_v43 = vld [vmem:[#allocation5 + $0xf98] sm:$0xff]  ;;  %v1073_v17 = vld [vmem:[#allocation5 + $0xf80] sm:$0xff] }
 0x201   :  { %v2630_v56 = vpack.c.bf16 %v1046_v49, %v1042_v48  ;;  %v1080_v44 = vld [vmem:[#allocation5 + $0xfb8] sm:$0xff]  ;;  %v1077_v47 = vld [vmem:[#allocation5 + $0xfa0] sm:$0xff]  ;;  %v271_v48 = vsub.s32 6, %v3813_v19 }
 0x202   :  { %v2902_v50 = vpack.c.bf16 %v1080_v44, %v1076_v43  ;;  %v1706_v43 = vld [vmem:[%s4318_s5 + $0xb8] sm:$0xff]  ;;  %v1979_v19 = vld [vmem:[#allocation10 + $0x60] sm:$0xff] }
 0x203   :  { %2613 = vmatpush1.bf16.msra.mxu0 %v2612_v60  ;;  %2869 = vmatpush1.bf16.msra.mxu1 %v2868_v61  ;;  %v1050_v60 = vld [vmem:[#allocation5 + $0xec8] sm:$0xff] }
 0x204   :  { %2615 = vmatprep.subr.bf16.mxu0 %v2614_v0  ;;  %2871 = vmatprep.subr.bf16.mxu1 %v2870_v3  ;;  %v1054_v61 = vld [vmem:[#allocation5 + $0xee8] sm:$0xff]  ;;  %v2632_v0 = vpack.c.bf16 %v1045_v40, %v1041_v55  ;;  %v2888_v3 = vpack.c.bf16 %v1047_v59, %v1043_v58  ;;  %v1084_v40 = vld [vmem:[#allocation5 + $0xfd8] sm:$0xff]  ;;  %v1081_v59 = vld [vmem:[#allocation5 + $0xfc0] sm:$0xff] }
 0x205   :  { %v2634_v9 = vpack.c.bf16 %v1054_v61, %v1050_v60  ;;  %v1086_v55 = vld [vmem:[#allocation5 + $0xfe8] sm:$0xff]  ;;  %v272_v60 = vrot.slane %v3851_v24, %v271_v48 }
 0x206   :  { %v1710_v48 = vld [vmem:[%s4318_s5 + $0xd8] sm:$0xff] }
 0x207   :  { %2617 = vmatpush1.bf16.msra.mxu0 %v2616_v10  ;;  %2873 = vmatpush1.bf16.msra.mxu1 %v2872_v8  ;;  %v1058_v10 = vld [vmem:[#allocation5 + $0xf08] sm:$0xff]  ;;  %v565_v24 = vadd.f32 %v3844_v2, %v272_v60 }
 0x208   :  { %2619 = vmatprep.subr.bf16.mxu0 %v2618_v13  ;;  %2875 = vmatprep.subr.bf16.mxu1 %v2874_v14  ;;  %v1062_v8 = vld [vmem:[#allocation5 + $0xf28] sm:$0xff]  ;;  %v2636_v13 = vpack.c.bf16 %v1053_v5, %v1049_v4  ;;  %v2892_v14 = vpack.c.bf16 %v1055_v21, %v1051_v7  ;;  %v1684_v4 = vld [vmem:[%s4318_s5 + $0x8] sm:$0xff]  ;;  %v1683_v21 = vld [vmem:[%s4318_s5] sm:$0xff] }
 0x209   :  { %v2638_v18 = vpack.c.bf16 %v1062_v8, %v1058_v10  ;;  %v1686_v5 = vld [vmem:[%s4318_s5 + $0x18] sm:$0xff]  ;;  %v1685_v10 = vld [vmem:[%s4318_s5 + $0x10] sm:$0xff]  ;;  %v1688_v8 = vld [vmem:[%s4318_s5 + $0x28] sm:$0xff]  ;;  %v575_v12 = vmax.f32 %v565_v24, 0.0 }
 0x20a   :  { %v2910_v7 = vpack.c.bf16 %v1686_v5, %v1684_v4  ;;  %v2912_v2 = vpack.c.bf16 %v1685_v10, %v1683_v21  ;;  %v1718_v60 = vld [vmem:[%s4318_s5 + $0x118] sm:$0xff]  ;;  %v1721_v24 = vld [vmem:[%s4318_s5 + $0x130] sm:$0xff] }
 0x20b   :  { %2621 = vmatpush1.bf16.msra.mxu0 %v2620_v27  ;;  %2877 = vmatpush1.bf16.msra.mxu1 %v2876_v28  ;;  %v1066_v27 = vld [vmem:[#allocation5 + $0xf48] sm:$0xff] }
 0x20c   :  { %2623 = vmatprep.subr.bf16.mxu0 %v2622_v41  ;;  %2879 = vmatprep.subr.bf16.mxu1 %v2878_v32  ;;  %v1070_v28 = vld [vmem:[#allocation5 + $0xf68] sm:$0xff]  ;;  %v2640_v41 = vpack.c.bf16 %v1061_v16, %v1057_v15  ;;  %v2896_v32 = vpack.c.bf16 %v1063_v26, %v1059_v25  ;;  %v1692_v16 = vld [vmem:[%s4318_s5 + $0x48] sm:$0xff]  ;;  %v1691_v26 = vld [vmem:[%s4318_s5 + $0x40] sm:$0xff] }
 0x20d   :  { %v2642_v35 = vpack.c.bf16 %v1070_v28, %v1066_v27  ;;  %v1689_v15 = vld [vmem:[%s4318_s5 + $0x30] sm:$0xff]  ;;  %v1696_v28 = vld [vmem:[%s4318_s5 + $0x68] sm:$0xff]  ;;  %v1722_v4 = vld [vmem:[%s4318_s5 + $0x138] sm:$0xff] }
 0x20e   :  { %v1693_v27 = vld [vmem:[%s4318_s5 + $0x50] sm:$0xff]  ;;  %v1726_v21 = vld [vmem:[%s4318_s5 + $0x158] sm:$0xff] }
 0x20f   :  { %2625 = vmatpush1.bf16.msra.mxu0 %v2624_v39  ;;  %2881 = vmatpush1.bf16.msra.mxu1 %v2880_v42  ;;  %v1074_v39 = vld [vmem:[#allocation5 + $0xf88] sm:$0xff]  ;;  %v2920_v31 = vpack.c.bf16 %v1693_v27, %v1691_v26 }
 0x210   :  { %2627 = vmatprep.subr.bf16.mxu0 %v2626_v45  ;;  %2883 = vmatprep.subr.bf16.mxu1 %v2882_v46  ;;  %v1078_v42 = vld [vmem:[#allocation5 + $0xfa8] sm:$0xff]  ;;  %v2644_v45 = vpack.c.bf16 %v1069_v34, %v1065_v33  ;;  %v2900_v46 = vpack.c.bf16 %v1071_v38, %v1067_v37  ;;  %v1700_v34 = vld [vmem:[%s4318_s5 + $0x88] sm:$0xff]  ;;  %v1699_v38 = vld [vmem:[%s4318_s5 + $0x80] sm:$0xff] }
 0x211   :  { %v2646_v49 = vpack.c.bf16 %v1078_v42, %v1074_v39  ;;  %v1697_v33 = vld [vmem:[%s4318_s5 + $0x70] sm:$0xff]  ;;  %v1704_v42 = vld [vmem:[%s4318_s5 + $0xa8] sm:$0xff] }
 0x212   :  { %v1701_v39 = vld [vmem:[%s4318_s5 + $0x90] sm:$0xff] }
 0x213   :  { %2629 = vmatpush1.bf16.msra.mxu0 %v2628_v52  ;;  %2885 = vmatpush1.bf16.msra.mxu1 %v2884_v54  ;;  %v1079_v52 = vld [vmem:[#allocation5 + $0xfb0] sm:$0xff]  ;;  %v1082_v54 = vld [vmem:[#allocation5 + $0xfc8] sm:$0xff]  ;;  %v2928_v44 = vpack.c.bf16 %v1701_v39, %v1699_v38 }
 0x214   :  { %2631 = vmatprep.subr.bf16.mxu0 %v2630_v56  ;;  %2887 = vmatprep.subr.bf16.mxu1 %v2886_v57  ;;  %v1088_v56 = vld [vmem:[#allocation5 + $0xff8] sm:$0xff]  ;;  %v2648_v57 = vpack.c.bf16 %v1077_v47, %v1073_v17  ;;  %v2904_v58 = vpack.c.bf16 %v1079_v52, %v1075_v51  ;;  %v2650_v61 = vpack.c.bf16 %v1086_v55, %v1082_v54  ;;  %v1705_v17 = vld [vmem:[%s4318_s5 + $0xb0] sm:$0xff]  ;;  %v1714_v55 = vld [vmem:[%s4318_s5 + $0xf8] sm:$0xff] }
 0x215   :  { %v2906_v62 = vpack.c.bf16 %v1088_v56, %v1084_v40  ;;  %v1708_v47 = vld [vmem:[%s4318_s5 + $0xc8] sm:$0xff]  ;;  %v1707_v51 = vld [vmem:[%s4318_s5 + $0xc0] sm:$0xff]  ;;  %v1709_v52 = vld [vmem:[%s4318_s5 + $0xd0] sm:$0xff] }
 0x216   :  { %v1712_v54 = vld [vmem:[%s4318_s5 + $0xe8] sm:$0xff]  ;;  %v2936_v40 = vpack.c.bf16 %v1709_v52, %v1707_v51  ;;  %v1750_v51 = vld [vmem:[%s4318_s5 + $0x218] sm:$0xff] }
 0x217   :  { %2633 = vmatpush1.bf16.msra.mxu0 %v2632_v0  ;;  %2889 = vmatpush1.bf16.msra.mxu1 %v2888_v3  ;;  %v1083_v0 = vld [vmem:[#allocation5 + $0xfd0] sm:$0xff]  ;;  %v2938_v56 = vpack.c.bf16 %v1714_v55, %v1712_v54  ;;  %v1983_v54 = vld [vmem:[#allocation10 + $0x80] sm:$0xff] }
 0x218   :  { %2635 = vmatprep.subr.bf16.mxu0 %v2634_v9  ;;  %2891 = vmatprep.subr.bf16.mxu1 %v2890_v6  ;;  %v1087_v3 = vld [vmem:[#allocation5 + $0xff0] sm:$0xff]  ;;  %v2652_v9 = vpack.c.bf16 %v1085_v63, %v1081_v59  ;;  %v1716_v59 = vld [vmem:[%s4318_s5 + $0x108] sm:$0xff] }
 0x219   :  { %v2908_v6 = vpack.c.bf16 %v1087_v3, %v1083_v0  ;;  %v1715_v63 = vld [vmem:[%s4318_s5 + $0x100] sm:$0xff]  ;;  %v1717_v0 = vld [vmem:[%s4318_s5 + $0x110] sm:$0xff]  ;;  %v1720_v3 = vld [vmem:[%s4318_s5 + $0x128] sm:$0xff] }
 0x21a   :  { %v2944_v5 = vpack.c.bf16 %v1717_v0, %v1715_v63  ;;  %v1984_v55 = vld [vmem:[#allocation10 + $0x88] sm:$0xff]  ;;  %v1970_v63 = vld [vmem:[#allocation10 + $0x18] sm:$0xff]  ;;  %v1987_v0 = vld [vmem:[#allocation10 + $0xa0] sm:$0xff] }
 0x21b   :  { %2637 = vmatpush1.bf16.msra.mxu0 %v2636_v13  ;;  %2893 = vmatpush1.bf16.msra.mxu1 %v2892_v14  ;;  %v2914_v13 = vpack.c.bf16 %v1690_v11, %v1688_v8  ;;  %v1687_v14 = vld [vmem:[%s4318_s5 + $0x20] sm:$0xff] }
 0x21c   :  { %2639 = vmatprep.subr.bf16.mxu0 %v2638_v18  ;;  %2895 = vmatprep.subr.bf16.mxu1 %v2894_v23  ;;  %v1694_v18 = vld [vmem:[%s4318_s5 + $0x58] sm:$0xff]  ;;  %v2916_v23 = vpack.c.bf16 %v1689_v15, %v1687_v14  ;;  %v1723_v11 = vld [vmem:[%s4318_s5 + $0x140] sm:$0xff] }
 0x21d   :  { %v2918_v25 = vpack.c.bf16 %v1694_v18, %v1692_v16  ;;  %v1727_v16 = vld [vmem:[%s4318_s5 + $0x160] sm:$0xff]  ;;  %v1729_v18 = vld [vmem:[%s4318_s5 + $0x170] sm:$0xff] }
 0x21e   :  { %v2956_v26 = vpack.c.bf16 %v1729_v18, %v1727_v16  ;;  %v1976_v16 = vld [vmem:[#allocation10 + $0x48] sm:$0xff]  ;;  %v1993_v18 = vld [vmem:[#allocation10 + $0xd0] sm:$0xff] }
 0x21f   :  { %2641 = vmatpush1.bf16.msra.mxu0 %v2640_v41  ;;  %2897 = vmatpush1.bf16.msra.mxu1 %v2896_v32  ;;  %v2922_v41 = vpack.c.bf16 %v1698_v29, %v1696_v28  ;;  %v1695_v32 = vld [vmem:[%s4318_s5 + $0x60] sm:$0xff]  ;;  %v1733_v29 = vld [vmem:[%s4318_s5 + $0x190] sm:$0xff] }
 0x220   :  { %2643 = vmatprep.subr.bf16.mxu0 %v2642_v35  ;;  %2899 = vmatprep.subr.bf16.mxu1 %v2898_v36  ;;  %v1702_v35 = vld [vmem:[%s4318_s5 + $0x98] sm:$0xff]  ;;  %v2924_v36 = vpack.c.bf16 %v1697_v33, %v1695_v32  ;;  %v1731_v28 = vld [vmem:[%s4318_s5 + $0x180] sm:$0xff] }
 0x221   :  { %v2926_v37 = vpack.c.bf16 %v1702_v35, %v1700_v34  ;;  %v2960_v32 = vpack.c.bf16 %v1733_v29, %v1731_v28  ;;  %v1735_v34 = vld [vmem:[%s4318_s5 + $0x1a0] sm:$0xff]  ;;  %v1737_v35 = vld [vmem:[%s4318_s5 + $0x1b0] sm:$0xff] }
 0x222   :  { %v2964_v38 = vpack.c.bf16 %v1737_v35, %v1735_v34  ;;  %v1978_v28 = vld [vmem:[#allocation10 + $0x58] sm:$0xff]  ;;  %v1995_v29 = vld [vmem:[#allocation10 + $0xe0] sm:$0xff] }
 0x223   :  { %2645 = vmatpush1.bf16.msra.mxu0 %v2644_v45  ;;  %2901 = vmatpush1.bf16.msra.mxu1 %v2900_v46  ;;  %v2930_v45 = vpack.c.bf16 %v1706_v43, %v1704_v42  ;;  %v1703_v46 = vld [vmem:[%s4318_s5 + $0xa0] sm:$0xff]  ;;  %v1741_v43 = vld [vmem:[%s4318_s5 + $0x1d0] sm:$0xff] }
 0x224   :  { %2647 = vmatprep.subr.bf16.mxu0 %v2646_v49  ;;  %2903 = vmatprep.subr.bf16.mxu1 %v2902_v50  ;;  %v2932_v49 = vpack.c.bf16 %v1705_v17, %v1703_v46  ;;  %v2934_v50 = vpack.c.bf16 %v1710_v48, %v1708_v47  ;;  %v1739_v42 = vld [vmem:[%s4318_s5 + $0x1c0] sm:$0xff]  ;;  %v1746_v46 = vld [vmem:[%s4318_s5 + $0x1f8] sm:$0xff]  ;;  %v1745_v48 = vld [vmem:[%s4318_s5 + $0x1f0] sm:$0xff] }
 0x225   :  { %v1743_v47 = vld [vmem:[%s4318_s5 + $0x1e0] sm:$0xff] }
 0x227   :  { %2649 = vmatpush1.bf16.msra.mxu0 %v2648_v57  ;;  %2905 = vmatpush1.bf16.msra.mxu1 %v2904_v58  ;;  %v1711_v57 = vld [vmem:[%s4318_s5 + $0xe0] sm:$0xff]  ;;  %v1713_v58 = vld [vmem:[%s4318_s5 + $0xf0] sm:$0xff] }
 0x228   :  { %2651 = vmatprep.subr.bf16.mxu0 %v2650_v61  ;;  %2907 = vmatprep.subr.bf16.mxu1 %v2906_v62  ;;  %v2940_v61 = vpack.c.bf16 %v1713_v58, %v1711_v57  ;;  %v2942_v62 = vpack.c.bf16 %v1718_v60, %v1716_v59  ;;  %v1968_v57 = vld [vmem:[#allocation10 + $0x8] sm:$0xff]  ;;  %v1985_v58 = vld [vmem:[#allocation10 + $0x90] sm:$0xff]  ;;  %v1986_v59 = vld [vmem:[#allocation10 + $0x98] sm:$0xff] }
 0x22b   :  { %2653 = vmatpush1.bf16.msra.mxu0 %v2652_v9  ;;  %2909 = vmatpush1.bf16.msra.mxu1 %v2908_v6  ;;  %v2946_v9 = vpack.c.bf16 %v1722_v4, %v1720_v3  ;;  %v1719_v6 = vld [vmem:[%s4318_s5 + $0x120] sm:$0xff]  ;;  %v1988_v3 = vld [vmem:[#allocation10 + $0xa8] sm:$0xff] }
 0x22c   :  { %2911 = vmatprep.subr.bf16.mxu0 %v2910_v7  ;;  %v1724_v7 = vld [vmem:[%s4318_s5 + $0x148] sm:$0xff]  ;;  %v2948_v10 = vpack.c.bf16 %v1721_v24, %v1719_v6  ;;  %v1972_v6 = vld [vmem:[#allocation10 + $0x28] sm:$0xff]  ;;  %v1989_v24 = vld [vmem:[#allocation10 + $0xb0] sm:$0xff] }
 0x22d   :  { %v2950_v8 = vpack.c.bf16 %v1726_v21, %v1724_v7  ;;  %v1990_v7 = vld [vmem:[#allocation10 + $0xb8] sm:$0xff] }
 0x22e   :  { %1389 = vmatmul.mubr.f32.vlgmr.msra.gmra.mrb[2].mxu0 %v575_v12  ;;  %1673 = vmatmul.mubr.f32.vlgmr.msra.gmra.mrb[6].mxu1 %v575_v12  ;;  %v1728_v12 = vld [vmem:[%s4318_s5 + $0x168] sm:$0xff] }
 0x22f   :  { %2913 = vmatpush1.bf16.msra.mxu0 %v2912_v2  ;;  %v1725_v2 = vld [vmem:[%s4318_s5 + $0x150] sm:$0xff] }
 0x230   :  { %2915 = vmatprep.subr.bf16.mxu0 %v2914_v13  ;;  %v1730_v13 = vld [vmem:[%s4318_s5 + $0x178] sm:$0xff]  ;;  %v2952_v14 = vpack.c.bf16 %v1725_v2, %v1723_v11  ;;  %v1974_v11 = vld [vmem:[#allocation10 + $0x38] sm:$0xff]  ;;  %v1991_v2 = vld [vmem:[#allocation10 + $0xc0] sm:$0xff] }
 0x231   :  { %v2954_v15 = vpack.c.bf16 %v1730_v13, %v1728_v12  ;;  %v1992_v12 = vld [vmem:[#allocation10 + $0xc8] sm:$0xff] }
 0x233   :  { %2917 = vmatpush1.bf16.msra.mxu0 %v2916_v23  ;;  %v1732_v23 = vld [vmem:[%s4318_s5 + $0x188] sm:$0xff] }
 0x234   :  { %2919 = vmatprep.subr.bf16.mxu0 %v2918_v25  ;;  %v1734_v25 = vld [vmem:[%s4318_s5 + $0x198] sm:$0xff] }
 0x235   :  { %v2958_v27 = vpack.c.bf16 %v1734_v25, %v1732_v23  ;;  %v1994_v23 = vld [vmem:[#allocation10 + $0xd8] sm:$0xff] }
 0x237   :  { %2921 = vmatpush1.bf16.msra.mxu0 %v2920_v31  ;;  %v1736_v31 = vld [vmem:[%s4318_s5 + $0x1a8] sm:$0xff] }
 0x238   :  { %2923 = vmatprep.subr.bf16.mxu0 %v2922_v41  ;;  %v1738_v41 = vld [vmem:[%s4318_s5 + $0x1b8] sm:$0xff] }
 0x239   :  { %v2962_v33 = vpack.c.bf16 %v1738_v41, %v1736_v31  ;;  %v1996_v31 = vld [vmem:[#allocation10 + $0xe8] sm:$0xff] }
 0x23b   :  { %2925 = vmatpush1.bf16.msra.mxu0 %v2924_v36  ;;  %v1740_v36 = vld [vmem:[%s4318_s5 + $0x1c8] sm:$0xff] }
 0x23c   :  { %2927 = vmatprep.subr.bf16.mxu0 %v2926_v37  ;;  %v1742_v37 = vld [vmem:[%s4318_s5 + $0x1d8] sm:$0xff] }
 0x23d   :  { %v2966_v39 = vpack.c.bf16 %v1742_v37, %v1740_v36 }
 0x23f   :  { %2929 = vmatpush1.bf16.msra.mxu0 %v2928_v44  ;;  %v2968_v44 = vpack.c.bf16 %v1741_v43, %v1739_v42 }
 0x240   :  { %2931 = vmatprep.subr.bf16.mxu0 %v2930_v45  ;;  %v1744_v45 = vld [vmem:[%s4318_s5 + $0x1e8] sm:$0xff] }
 0x241   :  { %v2970_v17 = vpack.c.bf16 %v1746_v46, %v1744_v45  ;;  %v1749_v45 = vld [vmem:[%s4318_s5 + $0x210] sm:$0xff] }
 0x243   :  { %2933 = vmatpush1.bf16.msra.mxu0 %v2932_v49  ;;  %v2972_v49 = vpack.c.bf16 %v1745_v48, %v1743_v47  ;;  %v1754_v47 = vld [vmem:[%s4318_s5 + $0x238] sm:$0xff] }
 0x244   :  { %2935 = vmatprep.subr.bf16.mxu0 %v2934_v50  ;;  %v1748_v50 = vld [vmem:[%s4318_s5 + $0x208] sm:$0xff] }
 0x245   :  { %v2974_v52 = vpack.c.bf16 %v1750_v51, %v1748_v50 }
 0x247   :  { %2937 = vmatpush1.bf16.msra.mxu0 %v2936_v40  ;;  %v1967_v40 = vld [vmem:[#allocation10] sm:$0xff] }
 0x248   :  { %2939 = vmatprep.subr.bf16.mxu0 %v2938_v56  ;;  %v3038_v56 = vpack.c.bf16 %v1984_v55, %v1983_v54  ;;  %v3040_v60 = vpack.c.bf16 %v1968_v57, %v1967_v40  ;;  %v1753_v54 = vld [vmem:[%s4318_s5 + $0x230] sm:$0xff]  ;;  %v1756_v40 = vld [vmem:[%s4318_s5 + $0x248] sm:$0xff] }
 0x24a   :  { %3039 = vmatprep.subr.bf16.mxu1 %v3038_v56  ;;  %v1758_v56 = vld [vmem:[%s4318_s5 + $0x258] sm:$0xff] }
 0x24b   :  { %2941 = vmatpush1.bf16.msra.mxu0 %v2940_v61  ;;  %v3042_v61 = vpack.c.bf16 %v1986_v59, %v1985_v58  ;;  %3041 = vmatpush3.bf16.msra.mxu1 %v3040_v60  ;;  %v2982_v58 = vpack.c.bf16 %v1758_v56, %v1756_v40  ;;  %v1755_v59 = vld [vmem:[%s4318_s5 + $0x240] sm:$0xff]  ;;  %v1757_v60 = vld [vmem:[%s4318_s5 + $0x250] sm:$0xff] }
 0x24c   :  { %2943 = vmatprep.subr.bf16.mxu0 %v2942_v62  ;;  %v1969_v62 = vld [vmem:[#allocation10 + $0x10] sm:$0xff] }
 0x24d   :  { %v3044_v4 = vpack.c.bf16 %v1970_v63, %v1969_v62  ;;  %3043 = vmatprep.subr.bf16.mxu1 %v3042_v61  ;;  %v1760_v61 = vld [vmem:[%s4318_s5 + $0x268] sm:$0xff]  ;;  %v1762_v62 = vld [vmem:[%s4318_s5 + $0x278] sm:$0xff]  ;;  %v2984_v63 = vpack.c.bf16 %v1757_v60, %v1755_v59  ;;  %v1791_v56 = vld [vmem:[%s4318_s5 + $0x360] sm:$0xff] }
 0x24e   :  { %v1798_v59 = vld [vmem:[%s4318_s5 + $0x398] sm:$0xff] }
 0x24f   :  { %2945 = vmatpush1.bf16.msra.mxu0 %v2944_v5  ;;  %v3046_v5 = vpack.c.bf16 %v1988_v3, %v1987_v0  ;;  %3045 = vmatpush3.bf16.msra.mxu1 %v3044_v4  ;;  %v2986_v0 = vpack.c.bf16 %v1762_v62, %v1760_v61  ;;  %v1759_v3 = vld [vmem:[%s4318_s5 + $0x260] sm:$0xff]  ;;  %v1761_v4 = vld [vmem:[%s4318_s5 + $0x270] sm:$0xff] }
 0x250   :  { %2947 = vmatprep.subr.bf16.mxu0 %v2946_v9  ;;  %v1971_v9 = vld [vmem:[#allocation10 + $0x20] sm:$0xff]  ;;  %v1795_v62 = vld [vmem:[%s4318_s5 + $0x380] sm:$0xff] }
 0x251   :  { %v3048_v21 = vpack.c.bf16 %v1972_v6, %v1971_v9  ;;  %3047 = vmatprep.subr.bf16.mxu1 %v3046_v5  ;;  %v1764_v5 = vld [vmem:[%s4318_s5 + $0x288] sm:$0xff]  ;;  %v1766_v9 = vld [vmem:[%s4318_s5 + $0x298] sm:$0xff]  ;;  %v2988_v6 = vpack.c.bf16 %v1761_v4, %v1759_v3 }
 0x252   :  { %v1802_v3 = vld [vmem:[%s4318_s5 + $0x3b8] sm:$0xff] }
 0x253   :  { %2949 = vmatpush1.bf16.msra.mxu0 %v2948_v10  ;;  %v3050_v10 = vpack.c.bf16 %v1990_v7, %v1989_v24  ;;  %3049 = vmatpush3.bf16.msra.mxu1 %v3048_v21  ;;  %v2990_v24 = vpack.c.bf16 %v1766_v9, %v1764_v5  ;;  %v1763_v7 = vld [vmem:[%s4318_s5 + $0x280] sm:$0xff]  ;;  %v1765_v21 = vld [vmem:[%s4318_s5 + $0x290] sm:$0xff] }
 0x254   :  { %2951 = vmatprep.subr.bf16.mxu0 %v2950_v8  ;;  %v1973_v8 = vld [vmem:[#allocation10 + $0x30] sm:$0xff] }
 0x255   :  { %v3052_v13 = vpack.c.bf16 %v1974_v11, %v1973_v8  ;;  %3051 = vmatprep.subr.bf16.mxu1 %v3050_v10  ;;  %v1768_v10 = vld [vmem:[%s4318_s5 + $0x2a8] sm:$0xff]  ;;  %v1770_v8 = vld [vmem:[%s4318_s5 + $0x2b8] sm:$0xff]  ;;  %v2992_v11 = vpack.c.bf16 %v1765_v21, %v1763_v7  ;;  %v1799_v9 = vld [vmem:[%s4318_s5 + $0x3a0] sm:$0xff] }
 0x256   :  { %v1806_v7 = vld [vmem:[%s4318_s5 + $0x3d8] sm:$0xff] }
 0x257   :  { %2953 = vmatpush1.bf16.msra.mxu0 %v2952_v14  ;;  %v3054_v14 = vpack.c.bf16 %v1992_v12, %v1991_v2  ;;  %3053 = vmatpush3.bf16.msra.mxu1 %v3052_v13  ;;  %v2994_v2 = vpack.c.bf16 %v1770_v8, %v1768_v10  ;;  %v1767_v12 = vld [vmem:[%s4318_s5 + $0x2a0] sm:$0xff]  ;;  %v1769_v13 = vld [vmem:[%s4318_s5 + $0x2b0] sm:$0xff] }
 0x258   :  { %2955 = vmatprep.subr.bf16.mxu0 %v2954_v15  ;;  %v1975_v15 = vld [vmem:[#allocation10 + $0x40] sm:$0xff]  ;;  %v1803_v8 = vld [vmem:[%s4318_s5 + $0x3c0] sm:$0xff] }
 0x259   :  { %v3056_v25 = vpack.c.bf16 %v1976_v16, %v1975_v15  ;;  %3055 = vmatprep.subr.bf16.mxu1 %v3054_v14  ;;  %v1772_v14 = vld [vmem:[%s4318_s5 + $0x2c8] sm:$0xff]  ;;  %v1774_v15 = vld [vmem:[%s4318_s5 + $0x2d8] sm:$0xff]  ;;  %v2996_v16 = vpack.c.bf16 %v1769_v13, %v1767_v12 }
 0x25a   :  { %v1810_v12 = vld [vmem:[%s4318_s5 + $0x3f8] sm:$0xff] }
 0x25b   :  { %2957 = vmatpush1.bf16.msra.mxu0 %v2956_v26  ;;  %v3058_v26 = vpack.c.bf16 %v1994_v23, %v1993_v18  ;;  %3057 = vmatpush3.bf16.msra.mxu1 %v3056_v25  ;;  %v2998_v18 = vpack.c.bf16 %v1774_v15, %v1772_v14  ;;  %v1771_v23 = vld [vmem:[%s4318_s5 + $0x2c0] sm:$0xff]  ;;  %v1773_v25 = vld [vmem:[%s4318_s5 + $0x2d0] sm:$0xff] }
 0x25c   :  { %2959 = vmatprep.subr.bf16.mxu0 %v2958_v27  ;;  %v1977_v27 = vld [vmem:[#allocation10 + $0x50] sm:$0xff] }
 0x25d   :  { %v3060_v41 = vpack.c.bf16 %v1978_v28, %v1977_v27  ;;  %3059 = vmatprep.subr.bf16.mxu1 %v3058_v26  ;;  %v1776_v26 = vld [vmem:[%s4318_s5 + $0x2e8] sm:$0xff]  ;;  %v1778_v27 = vld [vmem:[%s4318_s5 + $0x2f8] sm:$0xff]  ;;  %v3000_v28 = vpack.c.bf16 %v1773_v25, %v1771_v23 }
 0x25f   :  { %2961 = vmatpush1.bf16.msra.mxu0 %v2960_v32  ;;  %v3062_v32 = vpack.c.bf16 %v1996_v31, %v1995_v29  ;;  %3061 = vmatpush3.bf16.msra.mxu1 %v3060_v41  ;;  %v3002_v29 = vpack.c.bf16 %v1778_v27, %v1776_v26  ;;  %v1775_v31 = vld [vmem:[%s4318_s5 + $0x2e0] sm:$0xff]  ;;  %v1777_v41 = vld [vmem:[%s4318_s5 + $0x2f0] sm:$0xff] }
 0x260   :  { %2963 = vmatprep.subr.bf16.mxu0 %v2962_v33  ;;  %v4058_v33 = vld [vmem:[#allocation7] sm:$0xf]  ;;  %v1997_v27 = vld [vmem:[#allocation10 + $0xf0] sm:$0xff] }
 0x261   :  { %3063 = vmatprep.subr.bf16.mxu1 %v3062_v32  ;;  %v1094_v34 = vrot.slane %v4058_v33, %v3816_v20  ;;  %v1098_v35 = vrot.slane %v4058_v33, %v3821_v22  ;;  %v1106_v36 = vrot.slane %v4058_v33, %v259_v53  ;;  %v1752_v53 = vld [vmem:[%s4318_s5 + $0x228] sm:$0xff]  ;;  %v1102_v14 = vrot.slane %v4058_v33, %v255_v30  ;;  %v1980_v30 = vld [vmem:[#allocation10 + $0x68] sm:$0xff] }
 0x262   :  { %v2978_v51 = vpack.c.bf16 %v1754_v47, %v1752_v53  ;;  %v1780_v32 = vld [vmem:[%s4318_s5 + $0x308] sm:$0xff]  ;;  %v1790_v47 = vld [vmem:[%s4318_s5 + $0x358] sm:$0xff]  ;;  %v3064_v33 = vpack.c.bf16 %v1980_v30, %v1979_v19 }
 0x263   :  { %2965 = vmatpush1.bf16.msra.mxu0 %v2964_v38  ;;  %v1788_v53 = vld [vmem:[%s4318_s5 + $0x348] sm:$0xff] }
 0x264   :  { %2967 = vmatprep.subr.bf16.mxu0 %v2966_v39  ;;  %3065 = vmatpush3.bf16.msra.mxu1 %v3064_v33 }
 0x267   :  { %2969 = vmatpush1.bf16.msra.mxu0 %v2968_v44  ;;  %v1747_v44 = vld [vmem:[%s4318_s5 + $0x200] sm:$0xff] }
 0x268   :  { %2971 = vmatprep.subr.bf16.mxu0 %v2970_v17 }
 0x26b   :  { %2973 = vmatpush1.bf16.msra.mxu0 %v2972_v49  ;;  %v2976_v49 = vpack.c.bf16 %v1749_v45, %v1747_v44 }
 0x26c   :  { %2975 = vmatprep.subr.bf16.mxu0 %v2974_v52  ;;  %v1751_v52 = vld [vmem:[%s4318_s5 + $0x220] sm:$0xff] }
 0x26d   :  { %v2980_v57 = vpack.c.bf16 %v1753_v54, %v1751_v52  ;;  %v1792_v52 = vld [vmem:[%s4318_s5 + $0x368] sm:$0xff]  ;;  %v1794_v54 = vld [vmem:[%s4318_s5 + $0x378] sm:$0xff] }
 0x26e   :  { %v3018_v40 = vpack.c.bf16 %v1794_v54, %v1792_v52  ;;  %v2084_v52 = vld [vmem:[%s4322_s9 + $0x38] sm:$0xff] }
 0x301   :  { %v1390_v37 = vpop.f32.mrb[2].mxu0  ;;  %v4067_v38 = vpop.f32.mrb[6].mxu1 }
 0x302   :  { %v3094_v39 = vadd.f32 %v1390_v37, %v1094_v34  ;;  %v1392_v42 = vpop.f32.mrb[3].mxu0  ;;  %v1676_v43 = vpop.f32.mrb[7].mxu1  ;;  %v1782_v34 = vld [vmem:[%s4318_s5 + $0x318] sm:$0xff]  ;;  %v1779_v37 = vld [vmem:[%s4318_s5 + $0x300] sm:$0xff]  ;;  %v3096_v25 = vadd.f32 %v4067_v38, %v1102_v14 }
 0x303   :  { %v3095_v46 = vadd.f32 %v1392_v42, %v1098_v35  ;;  %v3097_v17 = vadd.f32 %v1676_v43, %v1106_v36  ;;  %v3004_v35 = vpack.c.bf16 %v1777_v41, %v1775_v31  ;;  %v3006_v36 = vpack.c.bf16 %v1782_v34, %v1780_v32  ;;  %v1784_v42 = vld [vmem:[%s4318_s5 + $0x328] sm:$0xff]  ;;  %v1786_v43 = vld [vmem:[%s4318_s5 + $0x338] sm:$0xff] }
 0x304   :  { %v1679_v50 = vmax.f32 %v3094_v39, 0.0  ;;  %v1781_v39 = vld [vmem:[%s4318_s5 + $0x310] sm:$0xff]  ;;  %v3010_v45 = vpack.c.bf16 %v1786_v43, %v1784_v42  ;;  %v1681_v26 = vmax.f32 %v3096_v25, 0.0  ;;  %v1981_v31 = vld [vmem:[#allocation10 + $0x70] sm:$0xff]  ;;  %v1982_v41 = vld [vmem:[#allocation10 + $0x78] sm:$0xff]  ;;  %v3279_v34 = vmov 0.0|0.0  }
 0x305   :  { %v1680_v48 = vmax.f32 %v3095_v46, 0.0  ;;  %v1682_v55 = vmax.f32 %v3097_v17, 0.0  ;;  %v3008_v44 = vpack.c.bf16 %v1781_v39, %v1779_v37  ;;  %v1783_v46 = vld [vmem:[%s4318_s5 + $0x320] sm:$0xff]  ;;  %v1785_v17 = vld [vmem:[%s4318_s5 + $0x330] sm:$0xff]  ;;  %v3068_v32 = vpack.c.bf16 %v1982_v41, %v1981_v31 }
 0x306   :  { %v2077_v43 = vld [vmem:[%s4322_s9] sm:$0xff] }
 0x307   :  { %1887 = vmatprep.mubr.f32.mxu0 %v1680_v48  ;;  %v3012_v48 = vpack.c.bf16 %v1785_v17, %v1783_v46 }
 0x308   :  { %1888 = vmatmul.mubr.f32.vlgmr.msra.gmra.mrb[4].mxu0 %v1679_v50  ;;  %v1787_v50 = vld [vmem:[%s4318_s5 + $0x340] sm:$0xff] }
 0x309   :  { %2977 = vmatpush1.bf16.msra.mxu0 %v2976_v49  ;;  %1958 = vmatprep.mubr.f32.mxu0 %v1682_v55  ;;  %v3014_v49 = vpack.c.bf16 %v1790_v47, %v1788_v53 }
 0x30a   :  { %2979 = vmatprep.subr.bf16.mxu0 %v2978_v51  ;;  %v1789_v51 = vld [vmem:[%s4318_s5 + $0x350] sm:$0xff] }
 0x30b   :  { %v3016_v55 = vpack.c.bf16 %v1789_v51, %v1787_v50  ;;  %v2083_v51 = vld [vmem:[%s4322_s9 + $0x30] sm:$0xff] }
 0x30c   :  { %v3080_v54 = vpack.c.bf16 %v2084_v52, %v2083_v51 }
 0x30d   :  { %2981 = vmatpush1.bf16.msra.mxu0 %v2980_v57  ;;  %v1793_v57 = vld [vmem:[%s4318_s5 + $0x370] sm:$0xff] }
 0x30e   :  { %2983 = vmatprep.subr.bf16.mxu0 %v2982_v58  ;;  %v1796_v58 = vld [vmem:[%s4318_s5 + $0x388] sm:$0xff]  ;;  %v3020_v60 = vpack.c.bf16 %v1793_v57, %v1791_v56  ;;  %v2087_v57 = vld [vmem:[%s4322_s9 + $0x50] sm:$0xff] }
 0x30f   :  { %v3022_v61 = vpack.c.bf16 %v1798_v59, %v1796_v58  ;;  %v2088_v58 = vld [vmem:[%s4322_s9 + $0x58] sm:$0xff] }
 0x310   :  { %v3086_v59 = vpack.c.bf16 %v2088_v58, %v2087_v57 }
 0x311   :  { %2985 = vmatpush1.bf16.msra.mxu0 %v2984_v63  ;;  %v1797_v63 = vld [vmem:[%s4318_s5 + $0x390] sm:$0xff] }
 0x312   :  { %2987 = vmatprep.subr.bf16.mxu0 %v2986_v0  ;;  %v1800_v0 = vld [vmem:[%s4318_s5 + $0x3a8] sm:$0xff]  ;;  %v3024_v4 = vpack.c.bf16 %v1797_v63, %v1795_v62  ;;  %v2091_v63 = vld [vmem:[%s4322_s9 + $0x70] sm:$0xff] }
 0x313   :  { %v3026_v5 = vpack.c.bf16 %v1802_v3, %v1800_v0  ;;  %v2092_v0 = vld [vmem:[%s4322_s9 + $0x78] sm:$0xff] }
 0x314   :  { %v3092_v3 = vpack.c.bf16 %v2092_v0, %v2091_v63 }
 0x315   :  { %2989 = vmatpush1.bf16.msra.mxu0 %v2988_v6  ;;  %v1801_v6 = vld [vmem:[%s4318_s5 + $0x3b0] sm:$0xff] }
 0x316   :  { %2991 = vmatprep.subr.bf16.mxu0 %v2990_v24  ;;  %v1804_v24 = vld [vmem:[%s4318_s5 + $0x3c8] sm:$0xff]  ;;  %v3028_v21 = vpack.c.bf16 %v1801_v6, %v1799_v9 }
 0x317   :  { %v3030_v10 = vpack.c.bf16 %v1806_v7, %v1804_v24 }
 0x319   :  { %2993 = vmatpush1.bf16.msra.mxu0 %v2992_v11  ;;  %v1805_v11 = vld [vmem:[%s4318_s5 + $0x3d0] sm:$0xff] }
 0x31a   :  { %2995 = vmatprep.subr.bf16.mxu0 %v2994_v2  ;;  %v1808_v2 = vld [vmem:[%s4318_s5 + $0x3e8] sm:$0xff]  ;;  %v3032_v13 = vpack.c.bf16 %v1805_v11, %v1803_v8 }
 0x31b   :  { %v3034_v15 = vpack.c.bf16 %v1810_v12, %v1808_v2 }
 0x31d   :  { %2997 = vmatpush1.bf16.msra.mxu0 %v2996_v16  ;;  %v1807_v16 = vld [vmem:[%s4318_s5 + $0x3e0] sm:$0xff] }
 0x31e   :  { %2999 = vmatprep.subr.bf16.mxu0 %v2998_v18  ;;  %v1809_v18 = vld [vmem:[%s4318_s5 + $0x3f0] sm:$0xff] }
 0x31f   :  { %v3036_v23 = vpack.c.bf16 %v1809_v18, %v1807_v16 }
 0x321   :  { %3001 = vmatpush1.bf16.msra.mxu0 %v3000_v28  ;;  %v1998_v28 = vld [vmem:[#allocation10 + $0xf8] sm:$0xff] }
 0x322   :  { %3003 = vmatprep.subr.bf16.mxu0 %v3002_v29  ;;  %v3066_v29 = vpack.c.bf16 %v1998_v28, %v1997_v27 }
 0x324   :  { %3067 = vmatprep.subr.bf16.mxu1 %v3066_v29 }
 0x325   :  { %3005 = vmatpush1.bf16.msra.mxu0 %v3004_v35  ;;  %3069 = vmatpush3.bf16.msra.mxu1 %v3068_v32  ;;  %v1811_v35 = vld [vmem:[#allocation8] sm:$0x3] }
 0x326   :  { %3007 = vmatprep.subr.bf16.mxu0 %v3006_v36  ;;  %3070 = vmatprep.subr.bf16.mxu1 %v3279_v34  ;;  %v1816_v38 = vrot.slane %v1811_v35, %v3816_v20  ;;  %v1820_v36 = vrot.slane %v1811_v35, %v3821_v22  ;;  %v2079_v20 = vld [vmem:[%s4322_s9 + $0x10] sm:$0xff]  ;;  %v2080_v22 = vld [vmem:[%s4322_s9 + $0x18] sm:$0xff] }
 0x327   :  { %v3074_v47 = vpack.c.bf16 %v2080_v22, %v2079_v20 }
 0x329   :  { %3009 = vmatpush1.bf16.msra.mxu0 %v3008_v44  ;;  %v2078_v44 = vld [vmem:[%s4322_s9 + $0x8] sm:$0xff] }
 0x32a   :  { %3011 = vmatprep.subr.bf16.mxu0 %v3010_v45  ;;  %v3071_v17 = vpack.c.bf16 %v2078_v44, %v2077_v43 }
 0x32d   :  { %3013 = vmatpush1.bf16.msra.mxu0 %v3012_v48  ;;  %v2081_v48 = vld [vmem:[%s4322_s9 + $0x20] sm:$0xff] }
 0x32e   :  { %3015 = vmatprep.subr.bf16.mxu0 %v3014_v49  ;;  %v2082_v49 = vld [vmem:[%s4322_s9 + $0x28] sm:$0xff] }
 0x32f   :  { %v3077_v50 = vpack.c.bf16 %v2082_v49, %v2081_v48 }
 0x331   :  { %3017 = vmatpush1.bf16.msra.mxu0 %v3016_v55  ;;  %v2085_v55 = vld [vmem:[%s4322_s9 + $0x40] sm:$0xff] }
 0x332   :  { %3019 = vmatprep.subr.bf16.mxu0 %v3018_v40  ;;  %v2086_v40 = vld [vmem:[%s4322_s9 + $0x48] sm:$0xff] }
 0x333   :  { %v3083_v56 = vpack.c.bf16 %v2086_v40, %v2085_v55 }
 0x335   :  { %3021 = vmatpush1.bf16.msra.mxu0 %v3020_v60  ;;  %v2089_v60 = vld [vmem:[%s4322_s9 + $0x60] sm:$0xff] }
 0x336   :  { %3023 = vmatprep.subr.bf16.mxu0 %v3022_v61  ;;  %v2090_v61 = vld [vmem:[%s4322_s9 + $0x68] sm:$0xff] }
 0x337   :  { %v3089_v62 = vpack.c.bf16 %v2090_v61, %v2089_v60 }
 0x339   :  { %3025 = vmatpush1.bf16.msra.mxu0 %v3024_v4 }
 0x33a   :  { %3027 = vmatprep.subr.bf16.mxu0 %v3026_v5  ;;  %v2181_v5 = vld [vmem:[#allocation11] ss:$0 sm:$0xff] }
 0x33d   :  { %3029 = vmatpush1.bf16.msra.mxu0 %v3028_v21  ;;  %v2182_v21 = vld [vmem:[#allocation2] ss:$0 sm:$0xff] }
 0x33e   :  { %3031 = vmatprep.subr.bf16.mxu0 %v3030_v10 }
 0x341   :  { %3033 = vmatpush1.bf16.msra.mxu0 %v3032_v13 }
 0x342   :  { %3035 = vmatprep.subr.bf16.mxu0 %v3034_v15 }
 0x345   :  { %3037 = vmatpush1.bf16.msra.mxu0 %v3036_v23 }
 0x348   :  { %1959 = vmatmul.mubr.f32.vlgmr.msra.gmra.mrb[4].mxu0 %v1681_v26 }
 0x41b   :  { %v1960_v37 = vpop.f32.mrb[4].mxu0 }
 0x41c   :  { %v3098_v39 = vadd.f32 %v1960_v37, %v1816_v38  ;;  %v1962_v42 = vpop.f32.mrb[5].mxu0 }
 0x41d   :  { %v3099_v45 = vadd.f32 %v1962_v42, %v1820_v36 }
 0x41e   :  { %v1965_v53 = vmax.f32 %v3098_v39, 0.0 }
 0x41f   :  { %v1966_v46 = vmax.f32 %v3099_v45, 0.0 }
 0x421   :  { %2070 = vmatprep.mubr.f32.mxu1 %v1966_v46 }
 0x422   :  { %2071 = vmatmul.mubr.f32.vlgmr.msra.gmra.mrb[8].mxu1 %v1965_v53 }
 0x423   :  { %3072 = vmatpush3.bf16.msra.mxu1 %v3071_v17  ;;  %2267 = vmatprep.mubr.msk.f32.mxu1 %vm3280_vm0, %v3278_v1 }
 0x424   :  { %3073 = vmatprep.subr.bf16.mxu1 %v3279_v34 }
 0x427   :  { %3075 = vmatpush3.bf16.msra.mxu1 %v3074_v47 }
 0x428   :  { %3076 = vmatprep.subr.bf16.mxu1 %v3279_v34 }
 0x42b   :  { %3078 = vmatpush3.bf16.msra.mxu1 %v3077_v50 }
 0x42c   :  { %3079 = vmatprep.subr.bf16.mxu1 %v3279_v34 }
 0x42f   :  { %3081 = vmatpush3.bf16.msra.mxu1 %v3080_v54 }
 0x430   :  { %3082 = vmatprep.subr.bf16.mxu1 %v3279_v34 }
 0x433   :  { %3084 = vmatpush3.bf16.msra.mxu1 %v3083_v56 }
 0x434   :  { %3085 = vmatprep.subr.bf16.mxu1 %v3279_v34 }
 0x437   :  { %3087 = vmatpush3.bf16.msra.mxu1 %v3086_v59 }
 0x438   :  { %3088 = vmatprep.subr.bf16.mxu1 %v3279_v34 }
 0x43b   :  { %3090 = vmatpush3.bf16.msra.mxu1 %v3089_v62 }
 0x43c   :  { %3091 = vmatprep.subr.bf16.mxu1 %v3279_v34 }
 0x43f   :  { %3093 = vmatpush3.bf16.msra.mxu1 %v3092_v3 }
 0x4f5   :  { %v2215_v4 = vpop.f32.mrb[8].mxu1 }
 0x4f6   :  { %v2216_v9 = vpop.f32.mrb[9].mxu1 }
 0x4f7   :  { %v2217_v6 = vadd.f32 %v2216_v9, %v2215_v4 }
 0x4f9   :  { %v2073_v24 = vadd.f32 %v2217_v6, %v2181_v5 }
 0x4fb   :  { %v2076_v7 = vmax.f32 %v2073_v24, 0.0 }
 0x4fd   :  { %2268 = vmatmul.mubr.f32.vlgmr.msra.gmra.mrb[10].mxu1 %v2076_v7 }
 0x5d0   :  { %v2166_v10 = vpop.f32.mrb[10].mxu1 }
 0x5d1   :  { %v2167_v8 = vadd.f32 %v2182_v21, %v2166_v10  ;;  %v2269_v11 = vpop.f32.mrb[11].mxu1 }
 0x5d3   :  { %v2170_v2 = vmax.f32 %v2167_v8, 0.0 }
 0x5d5   :  { %2172 = vst.msk [vmem:[%s4324_s11] sm:$0x3] %vm2171_vm1, %v2170_v2 }
 0x5d6   :  { %2177 = vsyncpa [#allocation4], 1 }
 0x5d7   :  { %2178 = vsyncpa [#allocation6], 1 }
 0x5d8   :  { %2179 = vsyncpa [#allocation9], 1 }
 0x5d9   :  { %2180 = vsyncpa [#allocation12], 1 }

</bundles_post_ra>
